<compile_context>
chip_gen: v5e
topology: v5e:2x2
jax: 0.10.0
libtpu: 0.0.40
codegen_flags: <defaults>
</compile_context>

<pallas_src>
import jax
import jax.numpy as jnp
from jax.experimental import pallas as pl
from jax.experimental.pallas import tpu as pltpu


def _round_up(x, m):
    return (x + m - 1) // m * m


# --------------------------------------------------------------------------
# Kernel 1: embedding gather + context mean.
# --------------------------------------------------------------------------
def _gather_mean_kernel(idx_ref, emb_hbm, mean_ref, rows, sems):
    # idx_ref : SMEM (B, C) int32   (scalar-prefetched token indices)
    # emb_hbm : HBM  (V, E)         (embedding table; never fully loaded)
    # mean_ref: VMEM (B, E) f32     (context-mean embeddings, output)
    # rows    : VMEM (B*C, E)       (gathered rows scratch)
    # sems    : DMA semaphores, one per gathered row
    B, C = idx_ref.shape
    n_rows = B * C

    # Issue all row DMAs up front (max overlap), then wait, then reduce.
    # B*C is small here; a production kernel with large B would pipeline
    # these in double-buffered waves instead.
    for i in range(n_rows):
        b, c = divmod(i, C)
        pltpu.make_async_copy(
            emb_hbm.at[idx_ref[b, c]], rows.at[i], sems.at[i]
        ).start()
    for i in range(n_rows):
        pltpu.make_async_copy(emb_hbm.at[0], rows.at[i], sems.at[i]).wait()

    gathered = rows[...].astype(jnp.float32).reshape(B, C, -1)   # (B, C, E)
    mean_ref[...] = jnp.mean(gathered, axis=1).astype(mean_ref.dtype)


# --------------------------------------------------------------------------
# Kernel 2: output projection, tiled over the vocab axis.
# --------------------------------------------------------------------------
def _projection_kernel(mean_ref, wt_ref, bias_ref, out_ref):
    # mean_ref: (B, E) resident; wt_ref: (E, TN); bias_ref: (1, TN); out: (B, TN)
    out_ref[...] = (
        jnp.dot(mean_ref[...], wt_ref[...], preferred_element_type=jnp.float32)
        + bias_ref[...]
    ).astype(out_ref.dtype)


# --------------------------------------------------------------------------
# One-time parameter preparation (do NOT call per forward pass).
# --------------------------------------------------------------------------
def cbow_prepare_params(emb_table, lin_w, lin_b, *, target_tile_n=512):
    """Transpose nn.Linear's (V, E) weight to a lane-dense (E, V_pad) layout and
    zero-pad the vocab axis to a multiple of the projection tile width."""
    V, E = emb_table.shape
    assert lin_w.shape == (V, E) and lin_b.shape == (V,)
    tile_n = target_tile_n if V >= target_tile_n else _round_up(V, 128)
    v_pad = _round_up(V, tile_n)
    wt = jnp.zeros((E, v_pad), lin_w.dtype).at[:, :V].set(lin_w.T)
    bias = jnp.zeros((1, v_pad), lin_b.dtype).at[:, :V].set(lin_b[None, :])
    return dict(emb=emb_table, wt=wt, bias=bias, vocab=V, tile_n=tile_n)


# --------------------------------------------------------------------------
# Forward pass.
# --------------------------------------------------------------------------
def cbow_forward(params, indices):
    """indices: (B, C) integer token ids. Returns logits (B, V) float32."""
    emb, wt, bias = params["emb"], params["wt"], params["bias"]
    V, tile_n = params["vocab"], params["tile_n"]
    E = emb.shape[1]
    v_pad = wt.shape[1]

    B, C = indices.shape
    b_pad = max(_round_up(B, 8), 8)
    idx = indices.astype(jnp.int32)
    if b_pad != B:
        idx = jnp.pad(idx, ((0, b_pad - B), (0, 0)))   # padded rows use token 0

    # ---- Kernel 1: embedding gather + context mean -> (B_pad, E) -----------
    gather_vmem = (b_pad * C * E + b_pad * E) * emb.dtype.itemsize + (4 << 20)
    mean_emb = pl.pallas_call(
        _gather_mean_kernel,
        out_shape=jax.ShapeDtypeStruct((b_pad, E), jnp.float32),
        grid_spec=pltpu.PrefetchScalarGridSpec(
            num_scalar_prefetch=1,
            grid=(1,),
            in_specs=[pl.BlockSpec(memory_space=pl.ANY)],   # table stays in HBM
            out_specs=pl.BlockSpec((b_pad, E), lambda i, idx_ref: (0, 0)),
            scratch_shapes=[
                pltpu.VMEM((b_pad * C, E), emb.dtype),
                pltpu.SemaphoreType.DMA((b_pad * C,)),
            ],
        ),
        compiler_params=pltpu.CompilerParams(
            dimension_semantics=("arbitrary",),
            vmem_limit_bytes=int(max(gather_vmem, 16 << 20)),
        ),
    )(idx, emb)

    # ---- Kernel 2: projection, grid over vocab tiles ------------------------
    # Per-step VMEM: double-buffered (E,TN)+(1,TN) inputs + (B,TN) output tile
    # + the resident (B,E) mean -- a few MiB at most even for V=50k, E=300,
    # comfortably inside the 32 MiB scoped limit on v5e/v6e/v7x.
    ntiles = v_pad // tile_n
    logits = pl.pallas_call(
        _projection_kernel,
        out_shape=jax.ShapeDtypeStruct((b_pad, v_pad), jnp.float32),
        grid_spec=pltpu.PrefetchScalarGridSpec(
            num_scalar_prefetch=0,
            grid=(ntiles,),
            in_specs=[
                pl.BlockSpec((b_pad, E), lambda j: (0, 0)),    # resident
                pl.BlockSpec((E, tile_n), lambda j: (0, j)),   # streamed weight tile
                pl.BlockSpec((1, tile_n), lambda j: (0, j)),   # streamed bias tile
            ],
            out_specs=pl.BlockSpec((b_pad, tile_n), lambda j: (0, j)),
        ),
        compiler_params=pltpu.CompilerParams(
            # v7x: vocab tiles are independent -> shard across both TensorCores.
            dimension_semantics=("parallel",),
            vmem_limit_bytes=32 << 20,
        ),
    )(mean_emb, wt, bias)

    return logits[:B, :V]


if __name__ == "__main__":
    # Small, TPU-friendly shapes consistent with the module.
    vocab_size = 1024     # V  -> 512-wide lane-dense tiles, 2 grid steps
    embedding_dim = 128   # E  -> full 128-lane vregs / MXU depth
    batch = 8             # B  (real workloads should batch >= 128/256)
    context = 8           # C  (CBOW context window length)

    key = jax.random.PRNGKey(0)
    k_idx, k_emb, k_w, k_b = jax.random.split(key, 4)

    # Deterministic synthetic parameters (shapes per nn.Embedding / nn.Linear).
    emb_table = jax.random.normal(k_emb, (vocab_size, embedding_dim),
                                  dtype=jnp.float32)
    bound = 1.0 / (embedding_dim ** 0.5)
    lin_w = jax.random.uniform(k_w, (vocab_size, embedding_dim),
                               minval=-bound, maxval=bound, dtype=jnp.float32)
    lin_b = jax.random.uniform(k_b, (vocab_size,),
                               minval=-bound, maxval=bound, dtype=jnp.float32)

    indices = jax.random.randint(k_idx, (batch, context), 0, vocab_size,
                                 dtype=jnp.int32)

    params = cbow_prepare_params(emb_table, lin_w, lin_b)   # one-time prep
    logits = cbow_forward(params, indices)
    logits = jax.block_until_ready(logits)

    # Pure-JAX reference of the PyTorch forward for a sanity check.
    ref = jnp.mean(emb_table[indices], axis=1) @ lin_w.T + lin_b
    assert logits.shape == (batch, vocab_size)
    assert jnp.allclose(logits, ref, atol=1e-4, rtol=1e-4), \
        float(jnp.max(jnp.abs(logits - ref)))

    print("KERNEL_OK")
</pallas_src>

<mosaic_0001>
module attributes {stable_mosaic.version = 11 : i64} {
  func.func @_gather_mean_kernel(%arg0: i32, %arg1: memref<8x8xi32, #tpu.memory_space<smem>>, %arg2: memref<1024x128xf32, #tpu.memory_space<any>>, %arg3: memref<8x128xf32, #tpu.memory_space<vmem>>, %arg4: memref<64x128xf32, #tpu.memory_space<vmem>>, %arg5: memref<64x!tpu.dma_semaphore, #tpu.memory_space<semaphore_mem>>) attributes {dimension_semantics = [#tpu.dimension_semantics<arbitrary>], iteration_bounds = array<i64: 1>, scalar_prefetch = 1 : i64, scratch_operands = 2 : i64, tpu.core_type = #tpu.core_type<tc>, window_params = [{}, {pipeline_mode = #tpu.pipeline_mode<synchronous>, transform_indices = @transform_1, window_bounds = array<i64: 8, 128>}]} {
    %c0 = arith.constant 0 : index
    %c0_0 = arith.constant 0 : index
    %0 = memref.load %arg1[%c0, %c0_0] : memref<8x8xi32, #tpu.memory_space<smem>>
    %c0_i32 = arith.constant 0 : i32
    %c0_i32_1 = arith.constant 0 : i32
    %c0_i32_2 = arith.constant 0 : i32
    %1 = tpu.memref_slice %arg2[%0, %c0_i32_2] : memref<1024x128xf32, #tpu.memory_space<any>> -> memref<1x128xf32, #tpu.memory_space<any>>
    %2 = tpu.memref_squeeze %1 : memref<1x128xf32, #tpu.memory_space<any>> -> memref<128xf32, #tpu.memory_space<any>>
    %c0_i32_3 = arith.constant 0 : i32
    %3 = tpu.memref_slice %arg4[%c0_i32, %c0_i32_3] : memref<64x128xf32, #tpu.memory_space<vmem>> -> memref<1x128xf32, #tpu.memory_space<vmem>>
    %4 = tpu.memref_squeeze %3 : memref<1x128xf32, #tpu.memory_space<vmem>> -> memref<128xf32, #tpu.memory_space<vmem>>
    %5 = tpu.memref_slice %arg5[%c0_i32_1] : memref<64x!tpu.dma_semaphore, #tpu.memory_space<semaphore_mem>> -> memref<1x!tpu.dma_semaphore, #tpu.memory_space<semaphore_mem>>
    %6 = tpu.memref_squeeze %5 : memref<1x!tpu.dma_semaphore, #tpu.memory_space<semaphore_mem>> -> memref<!tpu.dma_semaphore, #tpu.memory_space<semaphore_mem>>
    tpu.enqueue_dma source(%2 : memref<128xf32, #tpu.memory_space<any>>) target(%4 : memref<128xf32, #tpu.memory_space<vmem>>) target_semaphore(%6 : memref<!tpu.dma_semaphore, #tpu.memory_space<semaphore_mem>>)
    %c0_4 = arith.constant 0 : index
    %c1 = arith.constant 1 : index
    %7 = memref.load %arg1[%c0_4, %c1] : memref<8x8xi32, #tpu.memory_space<smem>>
    %c1_i32 = arith.constant 1 : i32
    %c1_i32_5 = arith.constant 1 : i32
    %c0_i32_6 = arith.constant 0 : i32
    %8 = tpu.memref_slice %arg2[%7, %c0_i32_6] : memref<1024x128xf32, #tpu.memory_space<any>> -> memref<1x128xf32, #tpu.memory_space<any>>
    %9 = tpu.memref_squeeze %8 : memref<1x128xf32, #tpu.memory_space<any>> -> memref<128xf32, #tpu.memory_space<any>>
    %c0_i32_7 = arith.constant 0 : i32
    %10 = tpu.memref_slice %arg4[%c1_i32, %c0_i32_7] : memref<64x128xf32, #tpu.memory_space<vmem>> -> memref<1x128xf32, #tpu.memory_space<vmem>>
    %11 = tpu.memref_squeeze %10 : memref<1x128xf32, #tpu.memory_space<vmem>> -> memref<128xf32, #tpu.memory_space<vmem>>
    %12 = tpu.memref_slice %arg5[%c1_i32_5] : memref<64x!tpu.dma_semaphore, #tpu.memory_space<semaphore_mem>> -> memref<1x!tpu.dma_semaphore, #tpu.memory_space<semaphore_mem>>
    %13 = tpu.memref_squeeze %12 : memref<1x!tpu.dma_semaphore, #tpu.memory_space<semaphore_mem>> -> memref<!tpu.dma_semaphore, #tpu.memory_space<semaphore_mem>>
    tpu.enqueue_dma source(%9 : memref<128xf32, #tpu.memory_space<any>>) target(%11 : memref<128xf32, #tpu.memory_space<vmem>>) target_semaphore(%13 : memref<!tpu.dma_semaphore, #tpu.memory_space<semaphore_mem>>)
    %c0_8 = arith.constant 0 : index
    %c2 = arith.constant 2 : index
    %14 = memref.load %arg1[%c0_8, %c2] : memref<8x8xi32, #tpu.memory_space<smem>>
    %c2_i32 = arith.constant 2 : i32
    %c2_i32_9 = arith.constant 2 : i32
    %c0_i32_10 = arith.constant 0 : i32
    %15 = tpu.memref_slice %arg2[%14, %c0_i32_10] : memref<1024x128xf32, #tpu.memory_space<any>> -> memref<1x128xf32, #tpu.memory_space<any>>
    %16 = tpu.memref_squeeze %15 : memref<1x128xf32, #tpu.memory_space<any>> -> memref<128xf32, #tpu.memory_space<any>>
    %c0_i32_11 = arith.constant 0 : i32
    %17 = tpu.memref_slice %arg4[%c2_i32, %c0_i32_11] : memref<64x128xf32, #tpu.memory_space<vmem>> -> memref<1x128xf32, #tpu.memory_space<vmem>>
    %18 = tpu.memref_squeeze %17 : memref<1x128xf32, #tpu.memory_space<vmem>> -> memref<128xf32, #tpu.memory_space<vmem>>
    %19 = tpu.memref_slice %arg5[%c2_i32_9] : memref<64x!tpu.dma_semaphore, #tpu.memory_space<semaphore_mem>> -> memref<1x!tpu.dma_semaphore, #tpu.memory_space<semaphore_mem>>
    %20 = tpu.memref_squeeze %19 : memref<1x!tpu.dma_semaphore, #tpu.memory_space<semaphore_mem>> -> memref<!tpu.dma_semaphore, #tpu.memory_space<semaphore_mem>>
    tpu.enqueue_dma source(%16 : memref<128xf32, #tpu.memory_space<any>>) target(%18 : memref<128xf32, #tpu.memory_space<vmem>>) target_semaphore(%20 : memref<!tpu.dma_semaphore, #tpu.memory_space<semaphore_mem>>)
    %c0_12 = arith.constant 0 : index
    %c3 = arith.constant 3 : index
    %21 = memref.load %arg1[%c0_12, %c3] : memref<8x8xi32, #tpu.memory_space<smem>>
    %c3_i32 = arith.constant 3 : i32
    %c3_i32_13 = arith.constant 3 : i32
    %c0_i32_14 = arith.constant 0 : i32
    %22 = tpu.memref_slice %arg2[%21, %c0_i32_14] : memref<1024x128xf32, #tpu.memory_space<any>> -> memref<1x128xf32, #tpu.memory_space<any>>
    %23 = tpu.memref_squeeze %22 : memref<1x128xf32, #tpu.memory_space<any>> -> memref<128xf32, #tpu.memory_space<any>>
    %c0_i32_15 = arith.constant 0 : i32
    %24 = tpu.memref_slice %arg4[%c3_i32, %c0_i32_15] : memref<64x128xf32, #tpu.memory_space<vmem>> -> memref<1x128xf32, #tpu.memory_space<vmem>>
    %25 = tpu.memref_squeeze %24 : memref<1x128xf32, #tpu.memory_space<vmem>> -> memref<128xf32, #tpu.memory_space<vmem>>
    %26 = tpu.memref_slice %arg5[%c3_i32_13] : memref<64x!tpu.dma_semaphore, #tpu.memory_space<semaphore_mem>> -> memref<1x!tpu.dma_semaphore, #tpu.memory_space<semaphore_mem>>
    %27 = tpu.memref_squeeze %26 : memref<1x!tpu.dma_semaphore, #tpu.memory_space<semaphore_mem>> -> memref<!tpu.dma_semaphore, #tpu.memory_space<semaphore_mem>>
    tpu.enqueue_dma source(%23 : memref<128xf32, #tpu.memory_space<any>>) target(%25 : memref<128xf32, #tpu.memory_space<vmem>>) target_semaphore(%27 : memref<!tpu.dma_semaphore, #tpu.memory_space<semaphore_mem>>)
    %c0_16 = arith.constant 0 : index
    %c4 = arith.constant 4 : index
    %28 = memref.load %arg1[%c0_16, %c4] : memref<8x8xi32, #tpu.memory_space<smem>>
    %c4_i32 = arith.constant 4 : i32
    %c4_i32_17 = arith.constant 4 : i32
    %c0_i32_18 = arith.constant 0 : i32
    %29 = tpu.memref_slice %arg2[%28, %c0_i32_18] : memref<1024x128xf32, #tpu.memory_space<any>> -> memref<1x128xf32, #tpu.memory_space<any>>
    %30 = tpu.memref_squeeze %29 : memref<1x128xf32, #tpu.memory_space<any>> -> memref<128xf32, #tpu.memory_space<any>>
    %c0_i32_19 = arith.constant 0 : i32
    %31 = tpu.memref_slice %arg4[%c4_i32, %c0_i32_19] : memref<64x128xf32, #tpu.memory_space<vmem>> -> memref<1x128xf32, #tpu.memory_space<vmem>>
    %32 = tpu.memref_squeeze %31 : memref<1x128xf32, #tpu.memory_space<vmem>> -> memref<128xf32, #tpu.memory_space<vmem>>
    %33 = tpu.memref_slice %arg5[%c4_i32_17] : memref<64x!tpu.dma_semaphore, #tpu.memory_space<semaphore_mem>> -> memref<1x!tpu.dma_semaphore, #tpu.memory_space<semaphore_mem>>
    %34 = tpu.memref_squeeze %33 : memref<1x!tpu.dma_semaphore, #tpu.memory_space<semaphore_mem>> -> memref<!tpu.dma_semaphore, #tpu.memory_space<semaphore_mem>>
    tpu.enqueue_dma source(%30 : memref<128xf32, #tpu.memory_space<any>>) target(%32 : memref<128xf32, #tpu.memory_space<vmem>>) target_semaphore(%34 : memref<!tpu.dma_semaphore, #tpu.memory_space<semaphore_mem>>)
    %c0_20 = arith.constant 0 : index
    %c5 = arith.constant 5 : index
    %35 = memref.load %arg1[%c0_20, %c5] : memref<8x8xi32, #tpu.memory_space<smem>>
    %c5_i32 = arith.constant 5 : i32
    %c5_i32_21 = arith.constant 5 : i32
    %c0_i32_22 = arith.constant 0 : i32
    %36 = tpu.memref_slice %arg2[%35, %c0_i32_22] : memref<1024x128xf32, #tpu.memory_space<any>> -> memref<1x128xf32, #tpu.memory_space<any>>
    %37 = tpu.memref_squeeze %36 : memref<1x128xf32, #tpu.memory_space<any>> -> memref<128xf32, #tpu.memory_space<any>>
    %c0_i32_23 = arith.constant 0 : i32
    %38 = tpu.memref_slice %arg4[%c5_i32, %c0_i32_23] : memref<64x128xf32, #tpu.memory_space<vmem>> -> memref<1x128xf32, #tpu.memory_space<vmem>>
    %39 = tpu.memref_squeeze %38 : memref<1x128xf32, #tpu.memory_space<vmem>> -> memref<128xf32, #tpu.memory_space<vmem>>
    %40 = tpu.memref_slice %arg5[%c5_i32_21] : memref<64x!tpu.dma_semaphore, #tpu.memory_space<semaphore_mem>> -> memref<1x!tpu.dma_semaphore, #tpu.memory_space<semaphore_mem>>
    %41 = tpu.memref_squeeze %40 : memref<1x!tpu.dma_semaphore, #tpu.memory_space<semaphore_mem>> -> memref<!tpu.dma_semaphore, #tpu.memory_space<semaphore_mem>>
    tpu.enqueue_dma source(%37 : memref<128xf32, #tpu.memory_space<any>>) target(%39 : memref<128xf32, #tpu.memory_space<vmem>>) target_semaphore(%41 : memref<!tpu.dma_semaphore, #tpu.memory_space<semaphore_mem>>)
    %c0_24 = arith.constant 0 : index
    %c6 = arith.constant 6 : index
    %42 = memref.load %arg1[%c0_24, %c6] : memref<8x8xi32, #tpu.memory_space<smem>>
    %c6_i32 = arith.constant 6 : i32
    %c6_i32_25 = arith.constant 6 : i32
    %c0_i32_26 = arith.constant 0 : i32
    %43 = tpu.memref_slice %arg2[%42, %c0_i32_26] : memref<1024x128xf32, #tpu.memory_space<any>> -> memref<1x128xf32, #tpu.memory_space<any>>
    %44 = tpu.memref_squeeze %43 : memref<1x128xf32, #tpu.memory_space<any>> -> memref<128xf32, #tpu.memory_space<any>>
    %c0_i32_27 = arith.constant 0 : i32
    %45 = tpu.memref_slice %arg4[%c6_i32, %c0_i32_27] : memref<64x128xf32, #tpu.memory_space<vmem>> -> memref<1x128xf32, #tpu.memory_space<vmem>>
    %46 = tpu.memref_squeeze %45 : memref<1x128xf32, #tpu.memory_space<vmem>> -> memref<128xf32, #tpu.memory_space<vmem>>
    %47 = tpu.memref_slice %arg5[%c6_i32_25] : memref<64x!tpu.dma_semaphore, #tpu.memory_space<semaphore_mem>> -> memref<1x!tpu.dma_semaphore, #tpu.memory_space<semaphore_mem>>
    %48 = tpu.memref_squeeze %47 : memref<1x!tpu.dma_semaphore, #tpu.memory_space<semaphore_mem>> -> memref<!tpu.dma_semaphore, #tpu.memory_space<semaphore_mem>>
    tpu.enqueue_dma source(%44 : memref<128xf32, #tpu.memory_space<any>>) target(%46 : memref<128xf32, #tpu.memory_space<vmem>>) target_semaphore(%48 : memref<!tpu.dma_semaphore, #tpu.memory_space<semaphore_mem>>)
    %c0_28 = arith.constant 0 : index
    %c7 = arith.constant 7 : index
    %49 = memref.load %arg1[%c0_28, %c7] : memref<8x8xi32, #tpu.memory_space<smem>>
    %c7_i32 = arith.constant 7 : i32
    %c7_i32_29 = arith.constant 7 : i32
    %c0_i32_30 = arith.constant 0 : i32
    %50 = tpu.memref_slice %arg2[%49, %c0_i32_30] : memref<1024x128xf32, #tpu.memory_space<any>> -> memref<1x128xf32, #tpu.memory_space<any>>
    %51 = tpu.memref_squeeze %50 : memref<1x128xf32, #tpu.memory_space<any>> -> memref<128xf32, #tpu.memory_space<any>>
    %c0_i32_31 = arith.constant 0 : i32
    %52 = tpu.memref_slice %arg4[%c7_i32, %c0_i32_31] : memref<64x128xf32, #tpu.memory_space<vmem>> -> memref<1x128xf32, #tpu.memory_space<vmem>>
    %53 = tpu.memref_squeeze %52 : memref<1x128xf32, #tpu.memory_space<vmem>> -> memref<128xf32, #tpu.memory_space<vmem>>
    %54 = tpu.memref_slice %arg5[%c7_i32_29] : memref<64x!tpu.dma_semaphore, #tpu.memory_space<semaphore_mem>> -> memref<1x!tpu.dma_semaphore, #tpu.memory_space<semaphore_mem>>
    %55 = tpu.memref_squeeze %54 : memref<1x!tpu.dma_semaphore, #tpu.memory_space<semaphore_mem>> -> memref<!tpu.dma_semaphore, #tpu.memory_space<semaphore_mem>>
    tpu.enqueue_dma source(%51 : memref<128xf32, #tpu.memory_space<any>>) target(%53 : memref<128xf32, #tpu.memory_space<vmem>>) target_semaphore(%55 : memref<!tpu.dma_semaphore, #tpu.memory_space<semaphore_mem>>)
    %c1_32 = arith.constant 1 : index
    %c0_33 = arith.constant 0 : index
    %56 = memref.load %arg1[%c1_32, %c0_33] : memref<8x8xi32, #tpu.memory_space<smem>>
    %c8_i32 = arith.constant 8 : i32
    %c8_i32_34 = arith.constant 8 : i32
    %c0_i32_35 = arith.constant 0 : i32
    %57 = tpu.memref_slice %arg2[%56, %c0_i32_35] : memref<1024x128xf32, #tpu.memory_space<any>> -> memref<1x128xf32, #tpu.memory_space<any>>
    %58 = tpu.memref_squeeze %57 : memref<1x128xf32, #tpu.memory_space<any>> -> memref<128xf32, #tpu.memory_space<any>>
    %c0_i32_36 = arith.constant 0 : i32
    %59 = tpu.memref_slice %arg4[%c8_i32, %c0_i32_36] : memref<64x128xf32, #tpu.memory_space<vmem>> -> memref<1x128xf32, #tpu.memory_space<vmem>>
    %60 = tpu.memref_squeeze %59 : memref<1x128xf32, #tpu.memory_space<vmem>> -> memref<128xf32, #tpu.memory_space<vmem>>
    %61 = tpu.memref_slice %arg5[%c8_i32_34] : memref<64x!tpu.dma_semaphore, #tpu.memory_space<semaphore_mem>> -> memref<1x!tpu.dma_semaphore, #tpu.memory_space<semaphore_mem>>
    %62 = tpu.memref_squeeze %61 : memref<1x!tpu.dma_semaphore, #tpu.memory_space<semaphore_mem>> -> memref<!tpu.dma_semaphore, #tpu.memory_space<semaphore_mem>>
    tpu.enqueue_dma source(%58 : memref<128xf32, #tpu.memory_space<any>>) target(%60 : memref<128xf32, #tpu.memory_space<vmem>>) target_semaphore(%62 : memref<!tpu.dma_semaphore, #tpu.memory_space<semaphore_mem>>)
    %c1_37 = arith.constant 1 : index
    %c1_38 = arith.constant 1 : index
    %63 = memref.load %arg1[%c1_37, %c1_38] : memref<8x8xi32, #tpu.memory_space<smem>>
    %c9_i32 = arith.constant 9 : i32
    %c9_i32_39 = arith.constant 9 : i32
    %c0_i32_40 = arith.constant 0 : i32
    %64 = tpu.memref_slice %arg2[%63, %c0_i32_40] : memref<1024x128xf32, #tpu.memory_space<any>> -> memref<1x128xf32, #tpu.memory_space<any>>
    %65 = tpu.memref_squeeze %64 : memref<1x128xf32, #tpu.memory_space<any>> -> memref<128xf32, #tpu.memory_space<any>>
    %c0_i32_41 = arith.constant 0 : i32
    %66 = tpu.memref_slice %arg4[%c9_i32, %c0_i32_41] : memref<64x128xf32, #tpu.memory_space<vmem>> -> memref<1x128xf32, #tpu.memory_space<vmem>>
    %67 = tpu.memref_squeeze %66 : memref<1x128xf32, #tpu.memory_space<vmem>> -> memref<128xf32, #tpu.memory_space<vmem>>
    %68 = tpu.memref_slice %arg5[%c9_i32_39] : memref<64x!tpu.dma_semaphore, #tpu.memory_space<semaphore_mem>> -> memref<1x!tpu.dma_semaphore, #tpu.memory_space<semaphore_mem>>
    %69 = tpu.memref_squeeze %68 : memref<1x!tpu.dma_semaphore, #tpu.memory_space<semaphore_mem>> -> memref<!tpu.dma_semaphore, #tpu.memory_space<semaphore_mem>>
    tpu.enqueue_dma source(%65 : memref<128xf32, #tpu.memory_space<any>>) target(%67 : memref<128xf32, #tpu.memory_space<vmem>>) target_semaphore(%69 : memref<!tpu.dma_semaphore, #tpu.memory_space<semaphore_mem>>)
    %c1_42 = arith.constant 1 : index
    %c2_43 = arith.constant 2 : index
    %70 = memref.load %arg1[%c1_42, %c2_43] : memref<8x8xi32, #tpu.memory_space<smem>>
    %c10_i32 = arith.constant 10 : i32
    %c10_i32_44 = arith.constant 10 : i32
    %c0_i32_45 = arith.constant 0 : i32
    %71 = tpu.memref_slice %arg2[%70, %c0_i32_45] : memref<1024x128xf32, #tpu.memory_space<any>> -> memref<1x128xf32, #tpu.memory_space<any>>
    %72 = tpu.memref_squeeze %71 : memref<1x128xf32, #tpu.memory_space<any>> -> memref<128xf32, #tpu.memory_space<any>>
    %c0_i32_46 = arith.constant 0 : i32
    %73 = tpu.memref_slice %arg4[%c10_i32, %c0_i32_46] : memref<64x128xf32, #tpu.memory_space<vmem>> -> memref<1x128xf32, #tpu.memory_space<vmem>>
    %74 = tpu.memref_squeeze %73 : memref<1x128xf32, #tpu.memory_space<vmem>> -> memref<128xf32, #tpu.memory_space<vmem>>
    %75 = tpu.memref_slice %arg5[%c10_i32_44] : memref<64x!tpu.dma_semaphore, #tpu.memory_space<semaphore_mem>> -> memref<1x!tpu.dma_semaphore, #tpu.memory_space<semaphore_mem>>
    %76 = tpu.memref_squeeze %75 : memref<1x!tpu.dma_semaphore, #tpu.memory_space<semaphore_mem>> -> memref<!tpu.dma_semaphore, #tpu.memory_space<semaphore_mem>>
    tpu.enqueue_dma source(%72 : memref<128xf32, #tpu.memory_space<any>>) target(%74 : memref<128xf32, #tpu.memory_space<vmem>>) target_semaphore(%76 : memref<!tpu.dma_semaphore, #tpu.memory_space<semaphore_mem>>)
    %c1_47 = arith.constant 1 : index
    %c3_48 = arith.constant 3 : index
    %77 = memref.load %arg1[%c1_47, %c3_48] : memref<8x8xi32, #tpu.memory_space<smem>>
    %c11_i32 = arith.constant 11 : i32
    %c11_i32_49 = arith.constant 11 : i32
    %c0_i32_50 = arith.constant 0 : i32
    %78 = tpu.memref_slice %arg2[%77, %c0_i32_50] : memref<1024x128xf32, #tpu.memory_space<any>> -> memref<1x128xf32, #tpu.memory_space<any>>
    %79 = tpu.memref_squeeze %78 : memref<1x128xf32, #tpu.memory_space<any>> -> memref<128xf32, #tpu.memory_space<any>>
    %c0_i32_51 = arith.constant 0 : i32
    %80 = tpu.memref_slice %arg4[%c11_i32, %c0_i32_51] : memref<64x128xf32, #tpu.memory_space<vmem>> -> memref<1x128xf32, #tpu.memory_space<vmem>>
    %81 = tpu.memref_squeeze %80 : memref<1x128xf32, #tpu.memory_space<vmem>> -> memref<128xf32, #tpu.memory_space<vmem>>
    %82 = tpu.memref_slice %arg5[%c11_i32_49] : memref<64x!tpu.dma_semaphore, #tpu.memory_space<semaphore_mem>> -> memref<1x!tpu.dma_semaphore, #tpu.memory_space<semaphore_mem>>
    %83 = tpu.memref_squeeze %82 : memref<1x!tpu.dma_semaphore, #tpu.memory_space<semaphore_mem>> -> memref<!tpu.dma_semaphore, #tpu.memory_space<semaphore_mem>>
    tpu.enqueue_dma source(%79 : memref<128xf32, #tpu.memory_space<any>>) target(%81 : memref<128xf32, #tpu.memory_space<vmem>>) target_semaphore(%83 : memref<!tpu.dma_semaphore, #tpu.memory_space<semaphore_mem>>)
    %c1_52 = arith.constant 1 : index
    %c4_53 = arith.constant 4 : index
    %84 = memref.load %arg1[%c1_52, %c4_53] : memref<8x8xi32, #tpu.memory_space<smem>>
    %c12_i32 = arith.constant 12 : i32
    %c12_i32_54 = arith.constant 12 : i32
    %c0_i32_55 = arith.constant 0 : i32
    %85 = tpu.memref_slice %arg2[%84, %c0_i32_55] : memref<1024x128xf32, #tpu.memory_space<any>> -> memref<1x128xf32, #tpu.memory_space<any>>
    %86 = tpu.memref_squeeze %85 : memref<1x128xf32, #tpu.memory_space<any>> -> memref<128xf32, #tpu.memory_space<any>>
    %c0_i32_56 = arith.constant 0 : i32
    %87 = tpu.memref_slice %arg4[%c12_i32, %c0_i32_56] : memref<64x128xf32, #tpu.memory_space<vmem>> -> memref<1x128xf32, #tpu.memory_space<vmem>>
    %88 = tpu.memref_squeeze %87 : memref<1x128xf32, #tpu.memory_space<vmem>> -> memref<128xf32, #tpu.memory_space<vmem>>
    %89 = tpu.memref_slice %arg5[%c12_i32_54] : memref<64x!tpu.dma_semaphore, #tpu.memory_space<semaphore_mem>> -> memref<1x!tpu.dma_semaphore, #tpu.memory_space<semaphore_mem>>
    %90 = tpu.memref_squeeze %89 : memref<1x!tpu.dma_semaphore, #tpu.memory_space<semaphore_mem>> -> memref<!tpu.dma_semaphore, #tpu.memory_space<semaphore_mem>>
    tpu.enqueue_dma source(%86 : memref<128xf32, #tpu.memory_space<any>>) target(%88 : memref<128xf32, #tpu.memory_space<vmem>>) target_semaphore(%90 : memref<!tpu.dma_semaphore, #tpu.memory_space<semaphore_mem>>)
    %c1_57 = arith.constant 1 : index
    %c5_58 = arith.constant 5 : index
    %91 = memref.load %arg1[%c1_57, %c5_58] : memref<8x8xi32, #tpu.memory_space<smem>>
    %c13_i32 = arith.constant 13 : i32
    %c13_i32_59 = arith.constant 13 : i32
    %c0_i32_60 = arith.constant 0 : i32
    %92 = tpu.memref_slice %arg2[%91, %c0_i32_60] : memref<1024x128xf32, #tpu.memory_space<any>> -> memref<1x128xf32, #tpu.memory_space<any>>
    %93 = tpu.memref_squeeze %92 : memref<1x128xf32, #tpu.memory_space<any>> -> memref<128xf32, #tpu.memory_space<any>>
    %c0_i32_61 = arith.constant 0 : i32
    %94 = tpu.memref_slice %arg4[%c13_i32, %c0_i32_61] : memref<64x128xf32, #tpu.memory_space<vmem>> -> memref<1x128xf32, #tpu.memory_space<vmem>>
    %95 = tpu.memref_squeeze %94 : memref<1x128xf32, #tpu.memory_space<vmem>> -> memref<128xf32, #tpu.memory_space<vmem>>
    %96 = tpu.memref_slice %arg5[%c13_i32_59] : memref<64x!tpu.dma_semaphore, #tpu.memory_space<semaphore_mem>> -> memref<1x!tpu.dma_semaphore, #tpu.memory_space<semaphore_mem>>
    %97 = tpu.memref_squeeze %96 : memref<1x!tpu.dma_semaphore, #tpu.memory_space<semaphore_mem>> -> memref<!tpu.dma_semaphore, #tpu.memory_space<semaphore_mem>>
    tpu.enqueue_dma source(%93 : memref<128xf32, #tpu.memory_space<any>>) target(%95 : memref<128xf32, #tpu.memory_space<vmem>>) target_semaphore(%97 : memref<!tpu.dma_semaphore, #tpu.memory_space<semaphore_mem>>)
    %c1_62 = arith.constant 1 : index
    %c6_63 = arith.constant 6 : index
    %98 = memref.load %arg1[%c1_62, %c6_63] : memref<8x8xi32, #tpu.memory_space<smem>>
    %c14_i32 = arith.constant 14 : i32
    %c14_i32_64 = arith.constant 14 : i32
    %c0_i32_65 = arith.constant 0 : i32
    %99 = tpu.memref_slice %arg2[%98, %c0_i32_65] : memref<1024x128xf32, #tpu.memory_space<any>> -> memref<1x128xf32, #tpu.memory_space<any>>
    %100 = tpu.memref_squeeze %99 : memref<1x128xf32, #tpu.memory_space<any>> -> memref<128xf32, #tpu.memory_space<any>>
    %c0_i32_66 = arith.constant 0 : i32
    %101 = tpu.memref_slice %arg4[%c14_i32, %c0_i32_66] : memref<64x128xf32, #tpu.memory_space<vmem>> -> memref<1x128xf32, #tpu.memory_space<vmem>>
    %102 = tpu.memref_squeeze %101 : memref<1x128xf32, #tpu.memory_space<vmem>> -> memref<128xf32, #tpu.memory_space<vmem>>
    %103 = tpu.memref_slice %arg5[%c14_i32_64] : memref<64x!tpu.dma_semaphore, #tpu.memory_space<semaphore_mem>> -> memref<1x!tpu.dma_semaphore, #tpu.memory_space<semaphore_mem>>
    %104 = tpu.memref_squeeze %103 : memref<1x!tpu.dma_semaphore, #tpu.memory_space<semaphore_mem>> -> memref<!tpu.dma_semaphore, #tpu.memory_space<semaphore_mem>>
    tpu.enqueue_dma source(%100 : memref<128xf32, #tpu.memory_space<any>>) target(%102 : memref<128xf32, #tpu.memory_space<vmem>>) target_semaphore(%104 : memref<!tpu.dma_semaphore, #tpu.memory_space<semaphore_mem>>)
    %c1_67 = arith.constant 1 : index
    %c7_68 = arith.constant 7 : index
    %105 = memref.load %arg1[%c1_67, %c7_68] : memref<8x8xi32, #tpu.memory_space<smem>>
    %c15_i32 = arith.constant 15 : i32
    %c15_i32_69 = arith.constant 15 : i32
    %c0_i32_70 = arith.constant 0 : i32
    %106 = tpu.memref_slice %arg2[%105, %c0_i32_70] : memref<1024x128xf32, #tpu.memory_space<any>> -> memref<1x128xf32, #tpu.memory_space<any>>
    %107 = tpu.memref_squeeze %106 : memref<1x128xf32, #tpu.memory_space<any>> -> memref<128xf32, #tpu.memory_space<any>>
    %c0_i32_71 = arith.constant 0 : i32
    %108 = tpu.memref_slice %arg4[%c15_i32, %c0_i32_71] : memref<64x128xf32, #tpu.memory_space<vmem>> -> memref<1x128xf32, #tpu.memory_space<vmem>>
    %109 = tpu.memref_squeeze %108 : memref<1x128xf32, #tpu.memory_space<vmem>> -> memref<128xf32, #tpu.memory_space<vmem>>
    %110 = tpu.memref_slice %arg5[%c15_i32_69] : memref<64x!tpu.dma_semaphore, #tpu.memory_space<semaphore_mem>> -> memref<1x!tpu.dma_semaphore, #tpu.memory_space<semaphore_mem>>
    %111 = tpu.memref_squeeze %110 : memref<1x!tpu.dma_semaphore, #tpu.memory_space<semaphore_mem>> -> memref<!tpu.dma_semaphore, #tpu.memory_space<semaphore_mem>>
    tpu.enqueue_dma source(%107 : memref<128xf32, #tpu.memory_space<any>>) target(%109 : memref<128xf32, #tpu.memory_space<vmem>>) target_semaphore(%111 : memref<!tpu.dma_semaphore, #tpu.memory_space<semaphore_mem>>)
    %c2_72 = arith.constant 2 : index
    %c0_73 = arith.constant 0 : index
    %112 = memref.load %arg1[%c2_72, %c0_73] : memref<8x8xi32, #tpu.memory_space<smem>>
    %c16_i32 = arith.constant 16 : i32
    %c16_i32_74 = arith.constant 16 : i32
    %c0_i32_75 = arith.constant 0 : i32
    %113 = tpu.memref_slice %arg2[%112, %c0_i32_75] : memref<1024x128xf32, #tpu.memory_space<any>> -> memref<1x128xf32, #tpu.memory_space<any>>
    %114 = tpu.memref_squeeze %113 : memref<1x128xf32, #tpu.memory_space<any>> -> memref<128xf32, #tpu.memory_space<any>>
    %c0_i32_76 = arith.constant 0 : i32
    %115 = tpu.memref_slice %arg4[%c16_i32, %c0_i32_76] : memref<64x128xf32, #tpu.memory_space<vmem>> -> memref<1x128xf32, #tpu.memory_space<vmem>>
    %116 = tpu.memref_squeeze %115 : memref<1x128xf32, #tpu.memory_space<vmem>> -> memref<128xf32, #tpu.memory_space<vmem>>
    %117 = tpu.memref_slice %arg5[%c16_i32_74] : memref<64x!tpu.dma_semaphore, #tpu.memory_space<semaphore_mem>> -> memref<1x!tpu.dma_semaphore, #tpu.memory_space<semaphore_mem>>
    %118 = tpu.memref_squeeze %117 : memref<1x!tpu.dma_semaphore, #tpu.memory_space<semaphore_mem>> -> memref<!tpu.dma_semaphore, #tpu.memory_space<semaphore_mem>>
    tpu.enqueue_dma source(%114 : memref<128xf32, #tpu.memory_space<any>>) target(%116 : memref<128xf32, #tpu.memory_space<vmem>>) target_semaphore(%118 : memref<!tpu.dma_semaphore, #tpu.memory_space<semaphore_mem>>)
    %c2_77 = arith.constant 2 : index
    %c1_78 = arith.constant 1 : index
    %119 = memref.load %arg1[%c2_77, %c1_78] : memref<8x8xi32, #tpu.memory_space<smem>>
    %c17_i32 = arith.constant 17 : i32
    %c17_i32_79 = arith.constant 17 : i32
    %c0_i32_80 = arith.constant 0 : i32
    %120 = tpu.memref_slice %arg2[%119, %c0_i32_80] : memref<1024x128xf32, #tpu.memory_space<any>> -> memref<1x128xf32, #tpu.memory_space<any>>
    %121 = tpu.memref_squeeze %120 : memref<1x128xf32, #tpu.memory_space<any>> -> memref<128xf32, #tpu.memory_space<any>>
    %c0_i32_81 = arith.constant 0 : i32
    %122 = tpu.memref_slice %arg4[%c17_i32, %c0_i32_81] : memref<64x128xf32, #tpu.memory_space<vmem>> -> memref<1x128xf32, #tpu.memory_space<vmem>>
    %123 = tpu.memref_squeeze %122 : memref<1x128xf32, #tpu.memory_space<vmem>> -> memref<128xf32, #tpu.memory_space<vmem>>
    %124 = tpu.memref_slice %arg5[%c17_i32_79] : memref<64x!tpu.dma_semaphore, #tpu.memory_space<semaphore_mem>> -> memref<1x!tpu.dma_semaphore, #tpu.memory_space<semaphore_mem>>
    %125 = tpu.memref_squeeze %124 : memref<1x!tpu.dma_semaphore, #tpu.memory_space<semaphore_mem>> -> memref<!tpu.dma_semaphore, #tpu.memory_space<semaphore_mem>>
    tpu.enqueue_dma source(%121 : memref<128xf32, #tpu.memory_space<any>>) target(%123 : memref<128xf32, #tpu.memory_space<vmem>>) target_semaphore(%125 : memref<!tpu.dma_semaphore, #tpu.memory_space<semaphore_mem>>)
    %c2_82 = arith.constant 2 : index
    %c2_83 = arith.constant 2 : index
    %126 = memref.load %arg1[%c2_82, %c2_83] : memref<8x8xi32, #tpu.memory_space<smem>>
    %c18_i32 = arith.constant 18 : i32
    %c18_i32_84 = arith.constant 18 : i32
    %c0_i32_85 = arith.constant 0 : i32
    %127 = tpu.memref_slice %arg2[%126, %c0_i32_85] : memref<1024x128xf32, #tpu.memory_space<any>> -> memref<1x128xf32, #tpu.memory_space<any>>
    %128 = tpu.memref_squeeze %127 : memref<1x128xf32, #tpu.memory_space<any>> -> memref<128xf32, #tpu.memory_space<any>>
    %c0_i32_86 = arith.constant 0 : i32
    %129 = tpu.memref_slice %arg4[%c18_i32, %c0_i32_86] : memref<64x128xf32, #tpu.memory_space<vmem>> -> memref<1x128xf32, #tpu.memory_space<vmem>>
    %130 = tpu.memref_squeeze %129 : memref<1x128xf32, #tpu.memory_space<vmem>> -> memref<128xf32, #tpu.memory_space<vmem>>
    %131 = tpu.memref_slice %arg5[%c18_i32_84] : memref<64x!tpu.dma_semaphore, #tpu.memory_space<semaphore_mem>> -> memref<1x!tpu.dma_semaphore, #tpu.memory_space<semaphore_mem>>
    %132 = tpu.memref_squeeze %131 : memref<1x!tpu.dma_semaphore, #tpu.memory_space<semaphore_mem>> -> memref<!tpu.dma_semaphore, #tpu.memory_space<semaphore_mem>>
    tpu.enqueue_dma source(%128 : memref<128xf32, #tpu.memory_space<any>>) target(%130 : memref<128xf32, #tpu.memory_space<vmem>>) target_semaphore(%132 : memref<!tpu.dma_semaphore, #tpu.memory_space<semaphore_mem>>)
    %c2_87 = arith.constant 2 : index
    %c3_88 = arith.constant 3 : index
    %133 = memref.load %arg1[%c2_87, %c3_88] : memref<8x8xi32, #tpu.memory_space<smem>>
    %c19_i32 = arith.constant 19 : i32
    %c19_i32_89 = arith.constant 19 : i32
    %c0_i32_90 = arith.constant 0 : i32
    %134 = tpu.memref_slice %arg2[%133, %c0_i32_90] : memref<1024x128xf32, #tpu.memory_space<any>> -> memref<1x128xf32, #tpu.memory_space<any>>
    %135 = tpu.memref_squeeze %134 : memref<1x128xf32, #tpu.memory_space<any>> -> memref<128xf32, #tpu.memory_space<any>>
    %c0_i32_91 = arith.constant 0 : i32
    %136 = tpu.memref_slice %arg4[%c19_i32, %c0_i32_91] : memref<64x128xf32, #tpu.memory_space<vmem>> -> memref<1x128xf32, #tpu.memory_space<vmem>>
    %137 = tpu.memref_squeeze %136 : memref<1x128xf32, #tpu.memory_space<vmem>> -> memref<128xf32, #tpu.memory_space<vmem>>
    %138 = tpu.memref_slice %arg5[%c19_i32_89] : memref<64x!tpu.dma_semaphore, #tpu.memory_space<semaphore_mem>> -> memref<1x!tpu.dma_semaphore, #tpu.memory_space<semaphore_mem>>
    %139 = tpu.memref_squeeze %138 : memref<1x!tpu.dma_semaphore, #tpu.memory_space<semaphore_mem>> -> memref<!tpu.dma_semaphore, #tpu.memory_space<semaphore_mem>>
    tpu.enqueue_dma source(%135 : memref<128xf32, #tpu.memory_space<any>>) target(%137 : memref<128xf32, #tpu.memory_space<vmem>>) target_semaphore(%139 : memref<!tpu.dma_semaphore, #tpu.memory_space<semaphore_mem>>)
    %c2_92 = arith.constant 2 : index
    %c4_93 = arith.constant 4 : index
    %140 = memref.load %arg1[%c2_92, %c4_93] : memref<8x8xi32, #tpu.memory_space<smem>>
    %c20_i32 = arith.constant 20 : i32
    %c20_i32_94 = arith.constant 20 : i32
    %c0_i32_95 = arith.constant 0 : i32
    %141 = tpu.memref_slice %arg2[%140, %c0_i32_95] : memref<1024x128xf32, #tpu.memory_space<any>> -> memref<1x128xf32, #tpu.memory_space<any>>
    %142 = tpu.memref_squeeze %141 : memref<1x128xf32, #tpu.memory_space<any>> -> memref<128xf32, #tpu.memory_space<any>>
    %c0_i32_96 = arith.constant 0 : i32
    %143 = tpu.memref_slice %arg4[%c20_i32, %c0_i32_96] : memref<64x128xf32, #tpu.memory_space<vmem>> -> memref<1x128xf32, #tpu.memory_space<vmem>>
    %144 = tpu.memref_squeeze %143 : memref<1x128xf32, #tpu.memory_space<vmem>> -> memref<128xf32, #tpu.memory_space<vmem>>
    %145 = tpu.memref_slice %arg5[%c20_i32_94] : memref<64x!tpu.dma_semaphore, #tpu.memory_space<semaphore_mem>> -> memref<1x!tpu.dma_semaphore, #tpu.memory_space<semaphore_mem>>
    %146 = tpu.memref_squeeze %145 : memref<1x!tpu.dma_semaphore, #tpu.memory_space<semaphore_mem>> -> memref<!tpu.dma_semaphore, #tpu.memory_space<semaphore_mem>>
    tpu.enqueue_dma source(%142 : memref<128xf32, #tpu.memory_space<any>>) target(%144 : memref<128xf32, #tpu.memory_space<vmem>>) target_semaphore(%146 : memref<!tpu.dma_semaphore, #tpu.memory_space<semaphore_mem>>)
    %c2_97 = arith.constant 2 : index
    %c5_98 = arith.constant 5 : index
    %147 = memref.load %arg1[%c2_97, %c5_98] : memref<8x8xi32, #tpu.memory_space<smem>>
    %c21_i32 = arith.constant 21 : i32
    %c21_i32_99 = arith.constant 21 : i32
    %c0_i32_100 = arith.constant 0 : i32
    %148 = tpu.memref_slice %arg2[%147, %c0_i32_100] : memref<1024x128xf32, #tpu.memory_space<any>> -> memref<1x128xf32, #tpu.memory_space<any>>
    %149 = tpu.memref_squeeze %148 : memref<1x128xf32, #tpu.memory_space<any>> -> memref<128xf32, #tpu.memory_space<any>>
    %c0_i32_101 = arith.constant 0 : i32
    %150 = tpu.memref_slice %arg4[%c21_i32, %c0_i32_101] : memref<64x128xf32, #tpu.memory_space<vmem>> -> memref<1x128xf32, #tpu.memory_space<vmem>>
    %151 = tpu.memref_squeeze %150 : memref<1x128xf32, #tpu.memory_space<vmem>> -> memref<128xf32, #tpu.memory_space<vmem>>
    %152 = tpu.memref_slice %arg5[%c21_i32_99] : memref<64x!tpu.dma_semaphore, #tpu.memory_space<semaphore_mem>> -> memref<1x!tpu.dma_semaphore, #tpu.memory_space<semaphore_mem>>
    %153 = tpu.memref_squeeze %152 : memref<1x!tpu.dma_semaphore, #tpu.memory_space<semaphore_mem>> -> memref<!tpu.dma_semaphore, #tpu.memory_space<semaphore_mem>>
    tpu.enqueue_dma source(%149 : memref<128xf32, #tpu.memory_space<any>>) target(%151 : memref<128xf32, #tpu.memory_space<vmem>>) target_semaphore(%153 : memref<!tpu.dma_semaphore, #tpu.memory_space<semaphore_mem>>)
    %c2_102 = arith.constant 2 : index
    %c6_103 = arith.constant 6 : index
    %154 = memref.load %arg1[%c2_102, %c6_103] : memref<8x8xi32, #tpu.memory_space<smem>>
    %c22_i32 = arith.constant 22 : i32
    %c22_i32_104 = arith.constant 22 : i32
    %c0_i32_105 = arith.constant 0 : i32
    %155 = tpu.memref_slice %arg2[%154, %c0_i32_105] : memref<1024x128xf32, #tpu.memory_space<any>> -> memref<1x128xf32, #tpu.memory_space<any>>
    %156 = tpu.memref_squeeze %155 : memref<1x128xf32, #tpu.memory_space<any>> -> memref<128xf32, #tpu.memory_space<any>>
    %c0_i32_106 = arith.constant 0 : i32
    %157 = tpu.memref_slice %arg4[%c22_i32, %c0_i32_106] : memref<64x128xf32, #tpu.memory_space<vmem>> -> memref<1x128xf32, #tpu.memory_space<vmem>>
    %158 = tpu.memref_squeeze %157 : memref<1x128xf32, #tpu.memory_space<vmem>> -> memref<128xf32, #tpu.memory_space<vmem>>
    %159 = tpu.memref_slice %arg5[%c22_i32_104] : memref<64x!tpu.dma_semaphore, #tpu.memory_space<semaphore_mem>> -> memref<1x!tpu.dma_semaphore, #tpu.memory_space<semaphore_mem>>
    %160 = tpu.memref_squeeze %159 : memref<1x!tpu.dma_semaphore, #tpu.memory_space<semaphore_mem>> -> memref<!tpu.dma_semaphore, #tpu.memory_space<semaphore_mem>>
    tpu.enqueue_dma source(%156 : memref<128xf32, #tpu.memory_space<any>>) target(%158 : memref<128xf32, #tpu.memory_space<vmem>>) target_semaphore(%160 : memref<!tpu.dma_semaphore, #tpu.memory_space<semaphore_mem>>)
    %c2_107 = arith.constant 2 : index
    %c7_108 = arith.constant 7 : index
    %161 = memref.load %arg1[%c2_107, %c7_108] : memref<8x8xi32, #tpu.memory_space<smem>>
    %c23_i32 = arith.constant 23 : i32
    %c23_i32_109 = arith.constant 23 : i32
    %c0_i32_110 = arith.constant 0 : i32
    %162 = tpu.memref_slice %arg2[%161, %c0_i32_110] : memref<1024x128xf32, #tpu.memory_space<any>> -> memref<1x128xf32, #tpu.memory_space<any>>
    %163 = tpu.memref_squeeze %162 : memref<1x128xf32, #tpu.memory_space<any>> -> memref<128xf32, #tpu.memory_space<any>>
    %c0_i32_111 = arith.constant 0 : i32
    %164 = tpu.memref_slice %arg4[%c23_i32, %c0_i32_111] : memref<64x128xf32, #tpu.memory_space<vmem>> -> memref<1x128xf32, #tpu.memory_space<vmem>>
    %165 = tpu.memref_squeeze %164 : memref<1x128xf32, #tpu.memory_space<vmem>> -> memref<128xf32, #tpu.memory_space<vmem>>
    %166 = tpu.memref_slice %arg5[%c23_i32_109] : memref<64x!tpu.dma_semaphore, #tpu.memory_space<semaphore_mem>> -> memref<1x!tpu.dma_semaphore, #tpu.memory_space<semaphore_mem>>
    %167 = tpu.memref_squeeze %166 : memref<1x!tpu.dma_semaphore, #tpu.memory_space<semaphore_mem>> -> memref<!tpu.dma_semaphore, #tpu.memory_space<semaphore_mem>>
    tpu.enqueue_dma source(%163 : memref<128xf32, #tpu.memory_space<any>>) target(%165 : memref<128xf32, #tpu.memory_space<vmem>>) target_semaphore(%167 : memref<!tpu.dma_semaphore, #tpu.memory_space<semaphore_mem>>)
    %c3_112 = arith.constant 3 : index
    %c0_113 = arith.constant 0 : index
    %168 = memref.load %arg1[%c3_112, %c0_113] : memref<8x8xi32, #tpu.memory_space<smem>>
    %c24_i32 = arith.constant 24 : i32
    %c24_i32_114 = arith.constant 24 : i32
    %c0_i32_115 = arith.constant 0 : i32
    %169 = tpu.memref_slice %arg2[%168, %c0_i32_115] : memref<1024x128xf32, #tpu.memory_space<any>> -> memref<1x128xf32, #tpu.memory_space<any>>
    %170 = tpu.memref_squeeze %169 : memref<1x128xf32, #tpu.memory_space<any>> -> memref<128xf32, #tpu.memory_space<any>>
    %c0_i32_116 = arith.constant 0 : i32
    %171 = tpu.memref_slice %arg4[%c24_i32, %c0_i32_116] : memref<64x128xf32, #tpu.memory_space<vmem>> -> memref<1x128xf32, #tpu.memory_space<vmem>>
    %172 = tpu.memref_squeeze %171 : memref<1x128xf32, #tpu.memory_space<vmem>> -> memref<128xf32, #tpu.memory_space<vmem>>
    %173 = tpu.memref_slice %arg5[%c24_i32_114] : memref<64x!tpu.dma_semaphore, #tpu.memory_space<semaphore_mem>> -> memref<1x!tpu.dma_semaphore, #tpu.memory_space<semaphore_mem>>
    %174 = tpu.memref_squeeze %173 : memref<1x!tpu.dma_semaphore, #tpu.memory_space<semaphore_mem>> -> memref<!tpu.dma_semaphore, #tpu.memory_space<semaphore_mem>>
    tpu.enqueue_dma source(%170 : memref<128xf32, #tpu.memory_space<any>>) target(%172 : memref<128xf32, #tpu.memory_space<vmem>>) target_semaphore(%174 : memref<!tpu.dma_semaphore, #tpu.memory_space<semaphore_mem>>)
    %c3_117 = arith.constant 3 : index
    %c1_118 = arith.constant 1 : index
    %175 = memref.load %arg1[%c3_117, %c1_118] : memref<8x8xi32, #tpu.memory_space<smem>>
    %c25_i32 = arith.constant 25 : i32
    %c25_i32_119 = arith.constant 25 : i32
    %c0_i32_120 = arith.constant 0 : i32
    %176 = tpu.memref_slice %arg2[%175, %c0_i32_120] : memref<1024x128xf32, #tpu.memory_space<any>> -> memref<1x128xf32, #tpu.memory_space<any>>
    %177 = tpu.memref_squeeze %176 : memref<1x128xf32, #tpu.memory_space<any>> -> memref<128xf32, #tpu.memory_space<any>>
    %c0_i32_121 = arith.constant 0 : i32
    %178 = tpu.memref_slice %arg4[%c25_i32, %c0_i32_121] : memref<64x128xf32, #tpu.memory_space<vmem>> -> memref<1x128xf32, #tpu.memory_space<vmem>>
    %179 = tpu.memref_squeeze %178 : memref<1x128xf32, #tpu.memory_space<vmem>> -> memref<128xf32, #tpu.memory_space<vmem>>
    %180 = tpu.memref_slice %arg5[%c25_i32_119] : memref<64x!tpu.dma_semaphore, #tpu.memory_space<semaphore_mem>> -> memref<1x!tpu.dma_semaphore, #tpu.memory_space<semaphore_mem>>
    %181 = tpu.memref_squeeze %180 : memref<1x!tpu.dma_semaphore, #tpu.memory_space<semaphore_mem>> -> memref<!tpu.dma_semaphore, #tpu.memory_space<semaphore_mem>>
    tpu.enqueue_dma source(%177 : memref<128xf32, #tpu.memory_space<any>>) target(%179 : memref<128xf32, #tpu.memory_space<vmem>>) target_semaphore(%181 : memref<!tpu.dma_semaphore, #tpu.memory_space<semaphore_mem>>)
    %c3_122 = arith.constant 3 : index
    %c2_123 = arith.constant 2 : index
    %182 = memref.load %arg1[%c3_122, %c2_123] : memref<8x8xi32, #tpu.memory_space<smem>>
    %c26_i32 = arith.constant 26 : i32
    %c26_i32_124 = arith.constant 26 : i32
    %c0_i32_125 = arith.constant 0 : i32
    %183 = tpu.memref_slice %arg2[%182, %c0_i32_125] : memref<1024x128xf32, #tpu.memory_space<any>> -> memref<1x128xf32, #tpu.memory_space<any>>
    %184 = tpu.memref_squeeze %183 : memref<1x128xf32, #tpu.memory_space<any>> -> memref<128xf32, #tpu.memory_space<any>>
    %c0_i32_126 = arith.constant 0 : i32
    %185 = tpu.memref_slice %arg4[%c26_i32, %c0_i32_126] : memref<64x128xf32, #tpu.memory_space<vmem>> -> memref<1x128xf32, #tpu.memory_space<vmem>>
    %186 = tpu.memref_squeeze %185 : memref<1x128xf32, #tpu.memory_space<vmem>> -> memref<128xf32, #tpu.memory_space<vmem>>
    %187 = tpu.memref_slice %arg5[%c26_i32_124] : memref<64x!tpu.dma_semaphore, #tpu.memory_space<semaphore_mem>> -> memref<1x!tpu.dma_semaphore, #tpu.memory_space<semaphore_mem>>
    %188 = tpu.memref_squeeze %187 : memref<1x!tpu.dma_semaphore, #tpu.memory_space<semaphore_mem>> -> memref<!tpu.dma_semaphore, #tpu.memory_space<semaphore_mem>>
    tpu.enqueue_dma source(%184 : memref<128xf32, #tpu.memory_space<any>>) target(%186 : memref<128xf32, #tpu.memory_space<vmem>>) target_semaphore(%188 : memref<!tpu.dma_semaphore, #tpu.memory_space<semaphore_mem>>)
    %c3_127 = arith.constant 3 : index
    %c3_128 = arith.constant 3 : index
    %189 = memref.load %arg1[%c3_127, %c3_128] : memref<8x8xi32, #tpu.memory_space<smem>>
    %c27_i32 = arith.constant 27 : i32
    %c27_i32_129 = arith.constant 27 : i32
    %c0_i32_130 = arith.constant 0 : i32
    %190 = tpu.memref_slice %arg2[%189, %c0_i32_130] : memref<1024x128xf32, #tpu.memory_space<any>> -> memref<1x128xf32, #tpu.memory_space<any>>
    %191 = tpu.memref_squeeze %190 : memref<1x128xf32, #tpu.memory_space<any>> -> memref<128xf32, #tpu.memory_space<any>>
    %c0_i32_131 = arith.constant 0 : i32
    %192 = tpu.memref_slice %arg4[%c27_i32, %c0_i32_131] : memref<64x128xf32, #tpu.memory_space<vmem>> -> memref<1x128xf32, #tpu.memory_space<vmem>>
    %193 = tpu.memref_squeeze %192 : memref<1x128xf32, #tpu.memory_space<vmem>> -> memref<128xf32, #tpu.memory_space<vmem>>
    %194 = tpu.memref_slice %arg5[%c27_i32_129] : memref<64x!tpu.dma_semaphore, #tpu.memory_space<semaphore_mem>> -> memref<1x!tpu.dma_semaphore, #tpu.memory_space<semaphore_mem>>
    %195 = tpu.memref_squeeze %194 : memref<1x!tpu.dma_semaphore, #tpu.memory_space<semaphore_mem>> -> memref<!tpu.dma_semaphore, #tpu.memory_space<semaphore_mem>>
    tpu.enqueue_dma source(%191 : memref<128xf32, #tpu.memory_space<any>>) target(%193 : memref<128xf32, #tpu.memory_space<vmem>>) target_semaphore(%195 : memref<!tpu.dma_semaphore, #tpu.memory_space<semaphore_mem>>)
    %c3_132 = arith.constant 3 : index
    %c4_133 = arith.constant 4 : index
    %196 = memref.load %arg1[%c3_132, %c4_133] : memref<8x8xi32, #tpu.memory_space<smem>>
    %c28_i32 = arith.constant 28 : i32
    %c28_i32_134 = arith.constant 28 : i32
    %c0_i32_135 = arith.constant 0 : i32
    %197 = tpu.memref_slice %arg2[%196, %c0_i32_135] : memref<1024x128xf32, #tpu.memory_space<any>> -> memref<1x128xf32, #tpu.memory_space<any>>
    %198 = tpu.memref_squeeze %197 : memref<1x128xf32, #tpu.memory_space<any>> -> memref<128xf32, #tpu.memory_space<any>>
    %c0_i32_136 = arith.constant 0 : i32
    %199 = tpu.memref_slice %arg4[%c28_i32, %c0_i32_136] : memref<64x128xf32, #tpu.memory_space<vmem>> -> memref<1x128xf32, #tpu.memory_space<vmem>>
    %200 = tpu.memref_squeeze %199 : memref<1x128xf32, #tpu.memory_space<vmem>> -> memref<128xf32, #tpu.memory_space<vmem>>
    %201 = tpu.memref_slice %arg5[%c28_i32_134] : memref<64x!tpu.dma_semaphore, #tpu.memory_space<semaphore_mem>> -> memref<1x!tpu.dma_semaphore, #tpu.memory_space<semaphore_mem>>
    %202 = tpu.memref_squeeze %201 : memref<1x!tpu.dma_semaphore, #tpu.memory_space<semaphore_mem>> -> memref<!tpu.dma_semaphore, #tpu.memory_space<semaphore_mem>>
    tpu.enqueue_dma source(%198 : memref<128xf32, #tpu.memory_space<any>>) target(%200 : memref<128xf32, #tpu.memory_space<vmem>>) target_semaphore(%202 : memref<!tpu.dma_semaphore, #tpu.memory_space<semaphore_mem>>)
    %c3_137 = arith.constant 3 : index
    %c5_138 = arith.constant 5 : index
    %203 = memref.load %arg1[%c3_137, %c5_138] : memref<8x8xi32, #tpu.memory_space<smem>>
    %c29_i32 = arith.constant 29 : i32
    %c29_i32_139 = arith.constant 29 : i32
    %c0_i32_140 = arith.constant 0 : i32
    %204 = tpu.memref_slice %arg2[%203, %c0_i32_140] : memref<1024x128xf32, #tpu.memory_space<any>> -> memref<1x128xf32, #tpu.memory_space<any>>
    %205 = tpu.memref_squeeze %204 : memref<1x128xf32, #tpu.memory_space<any>> -> memref<128xf32, #tpu.memory_space<any>>
    %c0_i32_141 = arith.constant 0 : i32
    %206 = tpu.memref_slice %arg4[%c29_i32, %c0_i32_141] : memref<64x128xf32, #tpu.memory_space<vmem>> -> memref<1x128xf32, #tpu.memory_space<vmem>>
    %207 = tpu.memref_squeeze %206 : memref<1x128xf32, #tpu.memory_space<vmem>> -> memref<128xf32, #tpu.memory_space<vmem>>
    %208 = tpu.memref_slice %arg5[%c29_i32_139] : memref<64x!tpu.dma_semaphore, #tpu.memory_space<semaphore_mem>> -> memref<1x!tpu.dma_semaphore, #tpu.memory_space<semaphore_mem>>
    %209 = tpu.memref_squeeze %208 : memref<1x!tpu.dma_semaphore, #tpu.memory_space<semaphore_mem>> -> memref<!tpu.dma_semaphore, #tpu.memory_space<semaphore_mem>>
    tpu.enqueue_dma source(%205 : memref<128xf32, #tpu.memory_space<any>>) target(%207 : memref<128xf32, #tpu.memory_space<vmem>>) target_semaphore(%209 : memref<!tpu.dma_semaphore, #tpu.memory_space<semaphore_mem>>)
    %c3_142 = arith.constant 3 : index
    %c6_143 = arith.constant 6 : index
    %210 = memref.load %arg1[%c3_142, %c6_143] : memref<8x8xi32, #tpu.memory_space<smem>>
    %c30_i32 = arith.constant 30 : i32
    %c30_i32_144 = arith.constant 30 : i32
    %c0_i32_145 = arith.constant 0 : i32
    %211 = tpu.memref_slice %arg2[%210, %c0_i32_145] : memref<1024x128xf32, #tpu.memory_space<any>> -> memref<1x128xf32, #tpu.memory_space<any>>
    %212 = tpu.memref_squeeze %211 : memref<1x128xf32, #tpu.memory_space<any>> -> memref<128xf32, #tpu.memory_space<any>>
    %c0_i32_146 = arith.constant 0 : i32
    %213 = tpu.memref_slice %arg4[%c30_i32, %c0_i32_146] : memref<64x128xf32, #tpu.memory_space<vmem>> -> memref<1x128xf32, #tpu.memory_space<vmem>>
    %214 = tpu.memref_squeeze %213 : memref<1x128xf32, #tpu.memory_space<vmem>> -> memref<128xf32, #tpu.memory_space<vmem>>
    %215 = tpu.memref_slice %arg5[%c30_i32_144] : memref<64x!tpu.dma_semaphore, #tpu.memory_space<semaphore_mem>> -> memref<1x!tpu.dma_semaphore, #tpu.memory_space<semaphore_mem>>
    %216 = tpu.memref_squeeze %215 : memref<1x!tpu.dma_semaphore, #tpu.memory_space<semaphore_mem>> -> memref<!tpu.dma_semaphore, #tpu.memory_space<semaphore_mem>>
    tpu.enqueue_dma source(%212 : memref<128xf32, #tpu.memory_space<any>>) target(%214 : memref<128xf32, #tpu.memory_space<vmem>>) target_semaphore(%216 : memref<!tpu.dma_semaphore, #tpu.memory_space<semaphore_mem>>)
    %c3_147 = arith.constant 3 : index
    %c7_148 = arith.constant 7 : index
    %217 = memref.load %arg1[%c3_147, %c7_148] : memref<8x8xi32, #tpu.memory_space<smem>>
    %c31_i32 = arith.constant 31 : i32
    %c31_i32_149 = arith.constant 31 : i32
    %c0_i32_150 = arith.constant 0 : i32
    %218 = tpu.memref_slice %arg2[%217, %c0_i32_150] : memref<1024x128xf32, #tpu.memory_space<any>> -> memref<1x128xf32, #tpu.memory_space<any>>
    %219 = tpu.memref_squeeze %218 : memref<1x128xf32, #tpu.memory_space<any>> -> memref<128xf32, #tpu.memory_space<any>>
    %c0_i32_151 = arith.constant 0 : i32
    %220 = tpu.memref_slice %arg4[%c31_i32, %c0_i32_151] : memref<64x128xf32, #tpu.memory_space<vmem>> -> memref<1x128xf32, #tpu.memory_space<vmem>>
    %221 = tpu.memref_squeeze %220 : memref<1x128xf32, #tpu.memory_space<vmem>> -> memref<128xf32, #tpu.memory_space<vmem>>
    %222 = tpu.memref_slice %arg5[%c31_i32_149] : memref<64x!tpu.dma_semaphore, #tpu.memory_space<semaphore_mem>> -> memref<1x!tpu.dma_semaphore, #tpu.memory_space<semaphore_mem>>
    %223 = tpu.memref_squeeze %222 : memref<1x!tpu.dma_semaphore, #tpu.memory_space<semaphore_mem>> -> memref<!tpu.dma_semaphore, #tpu.memory_space<semaphore_mem>>
    tpu.enqueue_dma source(%219 : memref<128xf32, #tpu.memory_space<any>>) target(%221 : memref<128xf32, #tpu.memory_space<vmem>>) target_semaphore(%223 : memref<!tpu.dma_semaphore, #tpu.memory_space<semaphore_mem>>)
    %c4_152 = arith.constant 4 : index
    %c0_153 = arith.constant 0 : index
    %224 = memref.load %arg1[%c4_152, %c0_153] : memref<8x8xi32, #tpu.memory_space<smem>>
    %c32_i32 = arith.constant 32 : i32
    %c32_i32_154 = arith.constant 32 : i32
    %c0_i32_155 = arith.constant 0 : i32
    %225 = tpu.memref_slice %arg2[%224, %c0_i32_155] : memref<1024x128xf32, #tpu.memory_space<any>> -> memref<1x128xf32, #tpu.memory_space<any>>
    %226 = tpu.memref_squeeze %225 : memref<1x128xf32, #tpu.memory_space<any>> -> memref<128xf32, #tpu.memory_space<any>>
    %c0_i32_156 = arith.constant 0 : i32
    %227 = tpu.memref_slice %arg4[%c32_i32, %c0_i32_156] : memref<64x128xf32, #tpu.memory_space<vmem>> -> memref<1x128xf32, #tpu.memory_space<vmem>>
    %228 = tpu.memref_squeeze %227 : memref<1x128xf32, #tpu.memory_space<vmem>> -> memref<128xf32, #tpu.memory_space<vmem>>
    %229 = tpu.memref_slice %arg5[%c32_i32_154] : memref<64x!tpu.dma_semaphore, #tpu.memory_space<semaphore_mem>> -> memref<1x!tpu.dma_semaphore, #tpu.memory_space<semaphore_mem>>
    %230 = tpu.memref_squeeze %229 : memref<1x!tpu.dma_semaphore, #tpu.memory_space<semaphore_mem>> -> memref<!tpu.dma_semaphore, #tpu.memory_space<semaphore_mem>>
    tpu.enqueue_dma source(%226 : memref<128xf32, #tpu.memory_space<any>>) target(%228 : memref<128xf32, #tpu.memory_space<vmem>>) target_semaphore(%230 : memref<!tpu.dma_semaphore, #tpu.memory_space<semaphore_mem>>)
    %c4_157 = arith.constant 4 : index
    %c1_158 = arith.constant 1 : index
    %231 = memref.load %arg1[%c4_157, %c1_158] : memref<8x8xi32, #tpu.memory_space<smem>>
    %c33_i32 = arith.constant 33 : i32
    %c33_i32_159 = arith.constant 33 : i32
    %c0_i32_160 = arith.constant 0 : i32
    %232 = tpu.memref_slice %arg2[%231, %c0_i32_160] : memref<1024x128xf32, #tpu.memory_space<any>> -> memref<1x128xf32, #tpu.memory_space<any>>
    %233 = tpu.memref_squeeze %232 : memref<1x128xf32, #tpu.memory_space<any>> -> memref<128xf32, #tpu.memory_space<any>>
    %c0_i32_161 = arith.constant 0 : i32
    %234 = tpu.memref_slice %arg4[%c33_i32, %c0_i32_161] : memref<64x128xf32, #tpu.memory_space<vmem>> -> memref<1x128xf32, #tpu.memory_space<vmem>>
    %235 = tpu.memref_squeeze %234 : memref<1x128xf32, #tpu.memory_space<vmem>> -> memref<128xf32, #tpu.memory_space<vmem>>
    %236 = tpu.memref_slice %arg5[%c33_i32_159] : memref<64x!tpu.dma_semaphore, #tpu.memory_space<semaphore_mem>> -> memref<1x!tpu.dma_semaphore, #tpu.memory_space<semaphore_mem>>
    %237 = tpu.memref_squeeze %236 : memref<1x!tpu.dma_semaphore, #tpu.memory_space<semaphore_mem>> -> memref<!tpu.dma_semaphore, #tpu.memory_space<semaphore_mem>>
    tpu.enqueue_dma source(%233 : memref<128xf32, #tpu.memory_space<any>>) target(%235 : memref<128xf32, #tpu.memory_space<vmem>>) target_semaphore(%237 : memref<!tpu.dma_semaphore, #tpu.memory_space<semaphore_mem>>)
    %c4_162 = arith.constant 4 : index
    %c2_163 = arith.constant 2 : index
    %238 = memref.load %arg1[%c4_162, %c2_163] : memref<8x8xi32, #tpu.memory_space<smem>>
    %c34_i32 = arith.constant 34 : i32
    %c34_i32_164 = arith.constant 34 : i32
    %c0_i32_165 = arith.constant 0 : i32
    %239 = tpu.memref_slice %arg2[%238, %c0_i32_165] : memref<1024x128xf32, #tpu.memory_space<any>> -> memref<1x128xf32, #tpu.memory_space<any>>
    %240 = tpu.memref_squeeze %239 : memref<1x128xf32, #tpu.memory_space<any>> -> memref<128xf32, #tpu.memory_space<any>>
    %c0_i32_166 = arith.constant 0 : i32
    %241 = tpu.memref_slice %arg4[%c34_i32, %c0_i32_166] : memref<64x128xf32, #tpu.memory_space<vmem>> -> memref<1x128xf32, #tpu.memory_space<vmem>>
    %242 = tpu.memref_squeeze %241 : memref<1x128xf32, #tpu.memory_space<vmem>> -> memref<128xf32, #tpu.memory_space<vmem>>
    %243 = tpu.memref_slice %arg5[%c34_i32_164] : memref<64x!tpu.dma_semaphore, #tpu.memory_space<semaphore_mem>> -> memref<1x!tpu.dma_semaphore, #tpu.memory_space<semaphore_mem>>
    %244 = tpu.memref_squeeze %243 : memref<1x!tpu.dma_semaphore, #tpu.memory_space<semaphore_mem>> -> memref<!tpu.dma_semaphore, #tpu.memory_space<semaphore_mem>>
    tpu.enqueue_dma source(%240 : memref<128xf32, #tpu.memory_space<any>>) target(%242 : memref<128xf32, #tpu.memory_space<vmem>>) target_semaphore(%244 : memref<!tpu.dma_semaphore, #tpu.memory_space<semaphore_mem>>)
    %c4_167 = arith.constant 4 : index
    %c3_168 = arith.constant 3 : index
    %245 = memref.load %arg1[%c4_167, %c3_168] : memref<8x8xi32, #tpu.memory_space<smem>>
    %c35_i32 = arith.constant 35 : i32
    %c35_i32_169 = arith.constant 35 : i32
    %c0_i32_170 = arith.constant 0 : i32
    %246 = tpu.memref_slice %arg2[%245, %c0_i32_170] : memref<1024x128xf32, #tpu.memory_space<any>> -> memref<1x128xf32, #tpu.memory_space<any>>
    %247 = tpu.memref_squeeze %246 : memref<1x128xf32, #tpu.memory_space<any>> -> memref<128xf32, #tpu.memory_space<any>>
    %c0_i32_171 = arith.constant 0 : i32
    %248 = tpu.memref_slice %arg4[%c35_i32, %c0_i32_171] : memref<64x128xf32, #tpu.memory_space<vmem>> -> memref<1x128xf32, #tpu.memory_space<vmem>>
    %249 = tpu.memref_squeeze %248 : memref<1x128xf32, #tpu.memory_space<vmem>> -> memref<128xf32, #tpu.memory_space<vmem>>
    %250 = tpu.memref_slice %arg5[%c35_i32_169] : memref<64x!tpu.dma_semaphore, #tpu.memory_space<semaphore_mem>> -> memref<1x!tpu.dma_semaphore, #tpu.memory_space<semaphore_mem>>
    %251 = tpu.memref_squeeze %250 : memref<1x!tpu.dma_semaphore, #tpu.memory_space<semaphore_mem>> -> memref<!tpu.dma_semaphore, #tpu.memory_space<semaphore_mem>>
    tpu.enqueue_dma source(%247 : memref<128xf32, #tpu.memory_space<any>>) target(%249 : memref<128xf32, #tpu.memory_space<vmem>>) target_semaphore(%251 : memref<!tpu.dma_semaphore, #tpu.memory_space<semaphore_mem>>)
    %c4_172 = arith.constant 4 : index
    %c4_173 = arith.constant 4 : index
    %252 = memref.load %arg1[%c4_172, %c4_173] : memref<8x8xi32, #tpu.memory_space<smem>>
    %c36_i32 = arith.constant 36 : i32
    %c36_i32_174 = arith.constant 36 : i32
    %c0_i32_175 = arith.constant 0 : i32
    %253 = tpu.memref_slice %arg2[%252, %c0_i32_175] : memref<1024x128xf32, #tpu.memory_space<any>> -> memref<1x128xf32, #tpu.memory_space<any>>
    %254 = tpu.memref_squeeze %253 : memref<1x128xf32, #tpu.memory_space<any>> -> memref<128xf32, #tpu.memory_space<any>>
    %c0_i32_176 = arith.constant 0 : i32
    %255 = tpu.memref_slice %arg4[%c36_i32, %c0_i32_176] : memref<64x128xf32, #tpu.memory_space<vmem>> -> memref<1x128xf32, #tpu.memory_space<vmem>>
    %256 = tpu.memref_squeeze %255 : memref<1x128xf32, #tpu.memory_space<vmem>> -> memref<128xf32, #tpu.memory_space<vmem>>
    %257 = tpu.memref_slice %arg5[%c36_i32_174] : memref<64x!tpu.dma_semaphore, #tpu.memory_space<semaphore_mem>> -> memref<1x!tpu.dma_semaphore, #tpu.memory_space<semaphore_mem>>
    %258 = tpu.memref_squeeze %257 : memref<1x!tpu.dma_semaphore, #tpu.memory_space<semaphore_mem>> -> memref<!tpu.dma_semaphore, #tpu.memory_space<semaphore_mem>>
    tpu.enqueue_dma source(%254 : memref<128xf32, #tpu.memory_space<any>>) target(%256 : memref<128xf32, #tpu.memory_space<vmem>>) target_semaphore(%258 : memref<!tpu.dma_semaphore, #tpu.memory_space<semaphore_mem>>)
    %c4_177 = arith.constant 4 : index
    %c5_178 = arith.constant 5 : index
    %259 = memref.load %arg1[%c4_177, %c5_178] : memref<8x8xi32, #tpu.memory_space<smem>>
    %c37_i32 = arith.constant 37 : i32
    %c37_i32_179 = arith.constant 37 : i32
    %c0_i32_180 = arith.constant 0 : i32
    %260 = tpu.memref_slice %arg2[%259, %c0_i32_180] : memref<1024x128xf32, #tpu.memory_space<any>> -> memref<1x128xf32, #tpu.memory_space<any>>
    %261 = tpu.memref_squeeze %260 : memref<1x128xf32, #tpu.memory_space<any>> -> memref<128xf32, #tpu.memory_space<any>>
    %c0_i32_181 = arith.constant 0 : i32
    %262 = tpu.memref_slice %arg4[%c37_i32, %c0_i32_181] : memref<64x128xf32, #tpu.memory_space<vmem>> -> memref<1x128xf32, #tpu.memory_space<vmem>>
    %263 = tpu.memref_squeeze %262 : memref<1x128xf32, #tpu.memory_space<vmem>> -> memref<128xf32, #tpu.memory_space<vmem>>
    %264 = tpu.memref_slice %arg5[%c37_i32_179] : memref<64x!tpu.dma_semaphore, #tpu.memory_space<semaphore_mem>> -> memref<1x!tpu.dma_semaphore, #tpu.memory_space<semaphore_mem>>
    %265 = tpu.memref_squeeze %264 : memref<1x!tpu.dma_semaphore, #tpu.memory_space<semaphore_mem>> -> memref<!tpu.dma_semaphore, #tpu.memory_space<semaphore_mem>>
    tpu.enqueue_dma source(%261 : memref<128xf32, #tpu.memory_space<any>>) target(%263 : memref<128xf32, #tpu.memory_space<vmem>>) target_semaphore(%265 : memref<!tpu.dma_semaphore, #tpu.memory_space<semaphore_mem>>)
    %c4_182 = arith.constant 4 : index
    %c6_183 = arith.constant 6 : index
    %266 = memref.load %arg1[%c4_182, %c6_183] : memref<8x8xi32, #tpu.memory_space<smem>>
    %c38_i32 = arith.constant 38 : i32
    %c38_i32_184 = arith.constant 38 : i32
    %c0_i32_185 = arith.constant 0 : i32
    %267 = tpu.memref_slice %arg2[%266, %c0_i32_185] : memref<1024x128xf32, #tpu.memory_space<any>> -> memref<1x128xf32, #tpu.memory_space<any>>
    %268 = tpu.memref_squeeze %267 : memref<1x128xf32, #tpu.memory_space<any>> -> memref<128xf32, #tpu.memory_space<any>>
    %c0_i32_186 = arith.constant 0 : i32
    %269 = tpu.memref_slice %arg4[%c38_i32, %c0_i32_186] : memref<64x128xf32, #tpu.memory_space<vmem>> -> memref<1x128xf32, #tpu.memory_space<vmem>>
    %270 = tpu.memref_squeeze %269 : memref<1x128xf32, #tpu.memory_space<vmem>> -> memref<128xf32, #tpu.memory_space<vmem>>
    %271 = tpu.memref_slice %arg5[%c38_i32_184] : memref<64x!tpu.dma_semaphore, #tpu.memory_space<semaphore_mem>> -> memref<1x!tpu.dma_semaphore, #tpu.memory_space<semaphore_mem>>
    %272 = tpu.memref_squeeze %271 : memref<1x!tpu.dma_semaphore, #tpu.memory_space<semaphore_mem>> -> memref<!tpu.dma_semaphore, #tpu.memory_space<semaphore_mem>>
    tpu.enqueue_dma source(%268 : memref<128xf32, #tpu.memory_space<any>>) target(%270 : memref<128xf32, #tpu.memory_space<vmem>>) target_semaphore(%272 : memref<!tpu.dma_semaphore, #tpu.memory_space<semaphore_mem>>)
    %c4_187 = arith.constant 4 : index
    %c7_188 = arith.constant 7 : index
    %273 = memref.load %arg1[%c4_187, %c7_188] : memref<8x8xi32, #tpu.memory_space<smem>>
    %c39_i32 = arith.constant 39 : i32
    %c39_i32_189 = arith.constant 39 : i32
    %c0_i32_190 = arith.constant 0 : i32
    %274 = tpu.memref_slice %arg2[%273, %c0_i32_190] : memref<1024x128xf32, #tpu.memory_space<any>> -> memref<1x128xf32, #tpu.memory_space<any>>
    %275 = tpu.memref_squeeze %274 : memref<1x128xf32, #tpu.memory_space<any>> -> memref<128xf32, #tpu.memory_space<any>>
    %c0_i32_191 = arith.constant 0 : i32
    %276 = tpu.memref_slice %arg4[%c39_i32, %c0_i32_191] : memref<64x128xf32, #tpu.memory_space<vmem>> -> memref<1x128xf32, #tpu.memory_space<vmem>>
    %277 = tpu.memref_squeeze %276 : memref<1x128xf32, #tpu.memory_space<vmem>> -> memref<128xf32, #tpu.memory_space<vmem>>
    %278 = tpu.memref_slice %arg5[%c39_i32_189] : memref<64x!tpu.dma_semaphore, #tpu.memory_space<semaphore_mem>> -> memref<1x!tpu.dma_semaphore, #tpu.memory_space<semaphore_mem>>
    %279 = tpu.memref_squeeze %278 : memref<1x!tpu.dma_semaphore, #tpu.memory_space<semaphore_mem>> -> memref<!tpu.dma_semaphore, #tpu.memory_space<semaphore_mem>>
    tpu.enqueue_dma source(%275 : memref<128xf32, #tpu.memory_space<any>>) target(%277 : memref<128xf32, #tpu.memory_space<vmem>>) target_semaphore(%279 : memref<!tpu.dma_semaphore, #tpu.memory_space<semaphore_mem>>)
    %c5_192 = arith.constant 5 : index
    %c0_193 = arith.constant 0 : index
    %280 = memref.load %arg1[%c5_192, %c0_193] : memref<8x8xi32, #tpu.memory_space<smem>>
    %c40_i32 = arith.constant 40 : i32
    %c40_i32_194 = arith.constant 40 : i32
    %c0_i32_195 = arith.constant 0 : i32
    %281 = tpu.memref_slice %arg2[%280, %c0_i32_195] : memref<1024x128xf32, #tpu.memory_space<any>> -> memref<1x128xf32, #tpu.memory_space<any>>
    %282 = tpu.memref_squeeze %281 : memref<1x128xf32, #tpu.memory_space<any>> -> memref<128xf32, #tpu.memory_space<any>>
    %c0_i32_196 = arith.constant 0 : i32
    %283 = tpu.memref_slice %arg4[%c40_i32, %c0_i32_196] : memref<64x128xf32, #tpu.memory_space<vmem>> -> memref<1x128xf32, #tpu.memory_space<vmem>>
    %284 = tpu.memref_squeeze %283 : memref<1x128xf32, #tpu.memory_space<vmem>> -> memref<128xf32, #tpu.memory_space<vmem>>
    %285 = tpu.memref_slice %arg5[%c40_i32_194] : memref<64x!tpu.dma_semaphore, #tpu.memory_space<semaphore_mem>> -> memref<1x!tpu.dma_semaphore, #tpu.memory_space<semaphore_mem>>
    %286 = tpu.memref_squeeze %285 : memref<1x!tpu.dma_semaphore, #tpu.memory_space<semaphore_mem>> -> memref<!tpu.dma_semaphore, #tpu.memory_space<semaphore_mem>>
    tpu.enqueue_dma source(%282 : memref<128xf32, #tpu.memory_space<any>>) target(%284 : memref<128xf32, #tpu.memory_space<vmem>>) target_semaphore(%286 : memref<!tpu.dma_semaphore, #tpu.memory_space<semaphore_mem>>)
    %c5_197 = arith.constant 5 : index
    %c1_198 = arith.constant 1 : index
    %287 = memref.load %arg1[%c5_197, %c1_198] : memref<8x8xi32, #tpu.memory_space<smem>>
    %c41_i32 = arith.constant 41 : i32
    %c41_i32_199 = arith.constant 41 : i32
    %c0_i32_200 = arith.constant 0 : i32
    %288 = tpu.memref_slice %arg2[%287, %c0_i32_200] : memref<1024x128xf32, #tpu.memory_space<any>> -> memref<1x128xf32, #tpu.memory_space<any>>
    %289 = tpu.memref_squeeze %288 : memref<1x128xf32, #tpu.memory_space<any>> -> memref<128xf32, #tpu.memory_space<any>>
    %c0_i32_201 = arith.constant 0 : i32
    %290 = tpu.memref_slice %arg4[%c41_i32, %c0_i32_201] : memref<64x128xf32, #tpu.memory_space<vmem>> -> memref<1x128xf32, #tpu.memory_space<vmem>>
    %291 = tpu.memref_squeeze %290 : memref<1x128xf32, #tpu.memory_space<vmem>> -> memref<128xf32, #tpu.memory_space<vmem>>
    %292 = tpu.memref_slice %arg5[%c41_i32_199] : memref<64x!tpu.dma_semaphore, #tpu.memory_space<semaphore_mem>> -> memref<1x!tpu.dma_semaphore, #tpu.memory_space<semaphore_mem>>
    %293 = tpu.memref_squeeze %292 : memref<1x!tpu.dma_semaphore, #tpu.memory_space<semaphore_mem>> -> memref<!tpu.dma_semaphore, #tpu.memory_space<semaphore_mem>>
    tpu.enqueue_dma source(%289 : memref<128xf32, #tpu.memory_space<any>>) target(%291 : memref<128xf32, #tpu.memory_space<vmem>>) target_semaphore(%293 : memref<!tpu.dma_semaphore, #tpu.memory_space<semaphore_mem>>)
    %c5_202 = arith.constant 5 : index
    %c2_203 = arith.constant 2 : index
    %294 = memref.load %arg1[%c5_202, %c2_203] : memref<8x8xi32, #tpu.memory_space<smem>>
    %c42_i32 = arith.constant 42 : i32
    %c42_i32_204 = arith.constant 42 : i32
    %c0_i32_205 = arith.constant 0 : i32
    %295 = tpu.memref_slice %arg2[%294, %c0_i32_205] : memref<1024x128xf32, #tpu.memory_space<any>> -> memref<1x128xf32, #tpu.memory_space<any>>
    %296 = tpu.memref_squeeze %295 : memref<1x128xf32, #tpu.memory_space<any>> -> memref<128xf32, #tpu.memory_space<any>>
    %c0_i32_206 = arith.constant 0 : i32
    %297 = tpu.memref_slice %arg4[%c42_i32, %c0_i32_206] : memref<64x128xf32, #tpu.memory_space<vmem>> -> memref<1x128xf32, #tpu.memory_space<vmem>>
    %298 = tpu.memref_squeeze %297 : memref<1x128xf32, #tpu.memory_space<vmem>> -> memref<128xf32, #tpu.memory_space<vmem>>
    %299 = tpu.memref_slice %arg5[%c42_i32_204] : memref<64x!tpu.dma_semaphore, #tpu.memory_space<semaphore_mem>> -> memref<1x!tpu.dma_semaphore, #tpu.memory_space<semaphore_mem>>
    %300 = tpu.memref_squeeze %299 : memref<1x!tpu.dma_semaphore, #tpu.memory_space<semaphore_mem>> -> memref<!tpu.dma_semaphore, #tpu.memory_space<semaphore_mem>>
    tpu.enqueue_dma source(%296 : memref<128xf32, #tpu.memory_space<any>>) target(%298 : memref<128xf32, #tpu.memory_space<vmem>>) target_semaphore(%300 : memref<!tpu.dma_semaphore, #tpu.memory_space<semaphore_mem>>)
    %c5_207 = arith.constant 5 : index
    %c3_208 = arith.constant 3 : index
    %301 = memref.load %arg1[%c5_207, %c3_208] : memref<8x8xi32, #tpu.memory_space<smem>>
    %c43_i32 = arith.constant 43 : i32
    %c43_i32_209 = arith.constant 43 : i32
    %c0_i32_210 = arith.constant 0 : i32
    %302 = tpu.memref_slice %arg2[%301, %c0_i32_210] : memref<1024x128xf32, #tpu.memory_space<any>> -> memref<1x128xf32, #tpu.memory_space<any>>
    %303 = tpu.memref_squeeze %302 : memref<1x128xf32, #tpu.memory_space<any>> -> memref<128xf32, #tpu.memory_space<any>>
    %c0_i32_211 = arith.constant 0 : i32
    %304 = tpu.memref_slice %arg4[%c43_i32, %c0_i32_211] : memref<64x128xf32, #tpu.memory_space<vmem>> -> memref<1x128xf32, #tpu.memory_space<vmem>>
    %305 = tpu.memref_squeeze %304 : memref<1x128xf32, #tpu.memory_space<vmem>> -> memref<128xf32, #tpu.memory_space<vmem>>
    %306 = tpu.memref_slice %arg5[%c43_i32_209] : memref<64x!tpu.dma_semaphore, #tpu.memory_space<semaphore_mem>> -> memref<1x!tpu.dma_semaphore, #tpu.memory_space<semaphore_mem>>
    %307 = tpu.memref_squeeze %306 : memref<1x!tpu.dma_semaphore, #tpu.memory_space<semaphore_mem>> -> memref<!tpu.dma_semaphore, #tpu.memory_space<semaphore_mem>>
    tpu.enqueue_dma source(%303 : memref<128xf32, #tpu.memory_space<any>>) target(%305 : memref<128xf32, #tpu.memory_space<vmem>>) target_semaphore(%307 : memref<!tpu.dma_semaphore, #tpu.memory_space<semaphore_mem>>)
    %c5_212 = arith.constant 5 : index
    %c4_213 = arith.constant 4 : index
    %308 = memref.load %arg1[%c5_212, %c4_213] : memref<8x8xi32, #tpu.memory_space<smem>>
    %c44_i32 = arith.constant 44 : i32
    %c44_i32_214 = arith.constant 44 : i32
    %c0_i32_215 = arith.constant 0 : i32
    %309 = tpu.memref_slice %arg2[%308, %c0_i32_215] : memref<1024x128xf32, #tpu.memory_space<any>> -> memref<1x128xf32, #tpu.memory_space<any>>
    %310 = tpu.memref_squeeze %309 : memref<1x128xf32, #tpu.memory_space<any>> -> memref<128xf32, #tpu.memory_space<any>>
    %c0_i32_216 = arith.constant 0 : i32
    %311 = tpu.memref_slice %arg4[%c44_i32, %c0_i32_216] : memref<64x128xf32, #tpu.memory_space<vmem>> -> memref<1x128xf32, #tpu.memory_space<vmem>>
    %312 = tpu.memref_squeeze %311 : memref<1x128xf32, #tpu.memory_space<vmem>> -> memref<128xf32, #tpu.memory_space<vmem>>
    %313 = tpu.memref_slice %arg5[%c44_i32_214] : memref<64x!tpu.dma_semaphore, #tpu.memory_space<semaphore_mem>> -> memref<1x!tpu.dma_semaphore, #tpu.memory_space<semaphore_mem>>
    %314 = tpu.memref_squeeze %313 : memref<1x!tpu.dma_semaphore, #tpu.memory_space<semaphore_mem>> -> memref<!tpu.dma_semaphore, #tpu.memory_space<semaphore_mem>>
    tpu.enqueue_dma source(%310 : memref<128xf32, #tpu.memory_space<any>>) target(%312 : memref<128xf32, #tpu.memory_space<vmem>>) target_semaphore(%314 : memref<!tpu.dma_semaphore, #tpu.memory_space<semaphore_mem>>)
    %c5_217 = arith.constant 5 : index
    %c5_218 = arith.constant 5 : index
    %315 = memref.load %arg1[%c5_217, %c5_218] : memref<8x8xi32, #tpu.memory_space<smem>>
    %c45_i32 = arith.constant 45 : i32
    %c45_i32_219 = arith.constant 45 : i32
    %c0_i32_220 = arith.constant 0 : i32
    %316 = tpu.memref_slice %arg2[%315, %c0_i32_220] : memref<1024x128xf32, #tpu.memory_space<any>> -> memref<1x128xf32, #tpu.memory_space<any>>
    %317 = tpu.memref_squeeze %316 : memref<1x128xf32, #tpu.memory_space<any>> -> memref<128xf32, #tpu.memory_space<any>>
    %c0_i32_221 = arith.constant 0 : i32
    %318 = tpu.memref_slice %arg4[%c45_i32, %c0_i32_221] : memref<64x128xf32, #tpu.memory_space<vmem>> -> memref<1x128xf32, #tpu.memory_space<vmem>>
    %319 = tpu.memref_squeeze %318 : memref<1x128xf32, #tpu.memory_space<vmem>> -> memref<128xf32, #tpu.memory_space<vmem>>
    %320 = tpu.memref_slice %arg5[%c45_i32_219] : memref<64x!tpu.dma_semaphore, #tpu.memory_space<semaphore_mem>> -> memref<1x!tpu.dma_semaphore, #tpu.memory_space<semaphore_mem>>
    %321 = tpu.memref_squeeze %320 : memref<1x!tpu.dma_semaphore, #tpu.memory_space<semaphore_mem>> -> memref<!tpu.dma_semaphore, #tpu.memory_space<semaphore_mem>>
    tpu.enqueue_dma source(%317 : memref<128xf32, #tpu.memory_space<any>>) target(%319 : memref<128xf32, #tpu.memory_space<vmem>>) target_semaphore(%321 : memref<!tpu.dma_semaphore, #tpu.memory_space<semaphore_mem>>)
    %c5_222 = arith.constant 5 : index
    %c6_223 = arith.constant 6 : index
    %322 = memref.load %arg1[%c5_222, %c6_223] : memref<8x8xi32, #tpu.memory_space<smem>>
    %c46_i32 = arith.constant 46 : i32
    %c46_i32_224 = arith.constant 46 : i32
    %c0_i32_225 = arith.constant 0 : i32
    %323 = tpu.memref_slice %arg2[%322, %c0_i32_225] : memref<1024x128xf32, #tpu.memory_space<any>> -> memref<1x128xf32, #tpu.memory_space<any>>
    %324 = tpu.memref_squeeze %323 : memref<1x128xf32, #tpu.memory_space<any>> -> memref<128xf32, #tpu.memory_space<any>>
    %c0_i32_226 = arith.constant 0 : i32
    %325 = tpu.memref_slice %arg4[%c46_i32, %c0_i32_226] : memref<64x128xf32, #tpu.memory_space<vmem>> -> memref<1x128xf32, #tpu.memory_space<vmem>>
    %326 = tpu.memref_squeeze %325 : memref<1x128xf32, #tpu.memory_space<vmem>> -> memref<128xf32, #tpu.memory_space<vmem>>
    %327 = tpu.memref_slice %arg5[%c46_i32_224] : memref<64x!tpu.dma_semaphore, #tpu.memory_space<semaphore_mem>> -> memref<1x!tpu.dma_semaphore, #tpu.memory_space<semaphore_mem>>
    %328 = tpu.memref_squeeze %327 : memref<1x!tpu.dma_semaphore, #tpu.memory_space<semaphore_mem>> -> memref<!tpu.dma_semaphore, #tpu.memory_space<semaphore_mem>>
    tpu.enqueue_dma source(%324 : memref<128xf32, #tpu.memory_space<any>>) target(%326 : memref<128xf32, #tpu.memory_space<vmem>>) target_semaphore(%328 : memref<!tpu.dma_semaphore, #tpu.memory_space<semaphore_mem>>)
    %c5_227 = arith.constant 5 : index
    %c7_228 = arith.constant 7 : index
    %329 = memref.load %arg1[%c5_227, %c7_228] : memref<8x8xi32, #tpu.memory_space<smem>>
    %c47_i32 = arith.constant 47 : i32
    %c47_i32_229 = arith.constant 47 : i32
    %c0_i32_230 = arith.constant 0 : i32
    %330 = tpu.memref_slice %arg2[%329, %c0_i32_230] : memref<1024x128xf32, #tpu.memory_space<any>> -> memref<1x128xf32, #tpu.memory_space<any>>
    %331 = tpu.memref_squeeze %330 : memref<1x128xf32, #tpu.memory_space<any>> -> memref<128xf32, #tpu.memory_space<any>>
    %c0_i32_231 = arith.constant 0 : i32
    %332 = tpu.memref_slice %arg4[%c47_i32, %c0_i32_231] : memref<64x128xf32, #tpu.memory_space<vmem>> -> memref<1x128xf32, #tpu.memory_space<vmem>>
    %333 = tpu.memref_squeeze %332 : memref<1x128xf32, #tpu.memory_space<vmem>> -> memref<128xf32, #tpu.memory_space<vmem>>
    %334 = tpu.memref_slice %arg5[%c47_i32_229] : memref<64x!tpu.dma_semaphore, #tpu.memory_space<semaphore_mem>> -> memref<1x!tpu.dma_semaphore, #tpu.memory_space<semaphore_mem>>
    %335 = tpu.memref_squeeze %334 : memref<1x!tpu.dma_semaphore, #tpu.memory_space<semaphore_mem>> -> memref<!tpu.dma_semaphore, #tpu.memory_space<semaphore_mem>>
    tpu.enqueue_dma source(%331 : memref<128xf32, #tpu.memory_space<any>>) target(%333 : memref<128xf32, #tpu.memory_space<vmem>>) target_semaphore(%335 : memref<!tpu.dma_semaphore, #tpu.memory_space<semaphore_mem>>)
    %c6_232 = arith.constant 6 : index
    %c0_233 = arith.constant 0 : index
    %336 = memref.load %arg1[%c6_232, %c0_233] : memref<8x8xi32, #tpu.memory_space<smem>>
    %c48_i32 = arith.constant 48 : i32
    %c48_i32_234 = arith.constant 48 : i32
    %c0_i32_235 = arith.constant 0 : i32
    %337 = tpu.memref_slice %arg2[%336, %c0_i32_235] : memref<1024x128xf32, #tpu.memory_space<any>> -> memref<1x128xf32, #tpu.memory_space<any>>
    %338 = tpu.memref_squeeze %337 : memref<1x128xf32, #tpu.memory_space<any>> -> memref<128xf32, #tpu.memory_space<any>>
    %c0_i32_236 = arith.constant 0 : i32
    %339 = tpu.memref_slice %arg4[%c48_i32, %c0_i32_236] : memref<64x128xf32, #tpu.memory_space<vmem>> -> memref<1x128xf32, #tpu.memory_space<vmem>>
    %340 = tpu.memref_squeeze %339 : memref<1x128xf32, #tpu.memory_space<vmem>> -> memref<128xf32, #tpu.memory_space<vmem>>
    %341 = tpu.memref_slice %arg5[%c48_i32_234] : memref<64x!tpu.dma_semaphore, #tpu.memory_space<semaphore_mem>> -> memref<1x!tpu.dma_semaphore, #tpu.memory_space<semaphore_mem>>
    %342 = tpu.memref_squeeze %341 : memref<1x!tpu.dma_semaphore, #tpu.memory_space<semaphore_mem>> -> memref<!tpu.dma_semaphore, #tpu.memory_space<semaphore_mem>>
    tpu.enqueue_dma source(%338 : memref<128xf32, #tpu.memory_space<any>>) target(%340 : memref<128xf32, #tpu.memory_space<vmem>>) target_semaphore(%342 : memref<!tpu.dma_semaphore, #tpu.memory_space<semaphore_mem>>)
    %c6_237 = arith.constant 6 : index
    %c1_238 = arith.constant 1 : index
    %343 = memref.load %arg1[%c6_237, %c1_238] : memref<8x8xi32, #tpu.memory_space<smem>>
    %c49_i32 = arith.constant 49 : i32
    %c49_i32_239 = arith.constant 49 : i32
    %c0_i32_240 = arith.constant 0 : i32
    %344 = tpu.memref_slice %arg2[%343, %c0_i32_240] : memref<1024x128xf32, #tpu.memory_space<any>> -> memref<1x128xf32, #tpu.memory_space<any>>
    %345 = tpu.memref_squeeze %344 : memref<1x128xf32, #tpu.memory_space<any>> -> memref<128xf32, #tpu.memory_space<any>>
    %c0_i32_241 = arith.constant 0 : i32
    %346 = tpu.memref_slice %arg4[%c49_i32, %c0_i32_241] : memref<64x128xf32, #tpu.memory_space<vmem>> -> memref<1x128xf32, #tpu.memory_space<vmem>>
    %347 = tpu.memref_squeeze %346 : memref<1x128xf32, #tpu.memory_space<vmem>> -> memref<128xf32, #tpu.memory_space<vmem>>
    %348 = tpu.memref_slice %arg5[%c49_i32_239] : memref<64x!tpu.dma_semaphore, #tpu.memory_space<semaphore_mem>> -> memref<1x!tpu.dma_semaphore, #tpu.memory_space<semaphore_mem>>
    %349 = tpu.memref_squeeze %348 : memref<1x!tpu.dma_semaphore, #tpu.memory_space<semaphore_mem>> -> memref<!tpu.dma_semaphore, #tpu.memory_space<semaphore_mem>>
    tpu.enqueue_dma source(%345 : memref<128xf32, #tpu.memory_space<any>>) target(%347 : memref<128xf32, #tpu.memory_space<vmem>>) target_semaphore(%349 : memref<!tpu.dma_semaphore, #tpu.memory_space<semaphore_mem>>)
    %c6_242 = arith.constant 6 : index
    %c2_243 = arith.constant 2 : index
    %350 = memref.load %arg1[%c6_242, %c2_243] : memref<8x8xi32, #tpu.memory_space<smem>>
    %c50_i32 = arith.constant 50 : i32
    %c50_i32_244 = arith.constant 50 : i32
    %c0_i32_245 = arith.constant 0 : i32
    %351 = tpu.memref_slice %arg2[%350, %c0_i32_245] : memref<1024x128xf32, #tpu.memory_space<any>> -> memref<1x128xf32, #tpu.memory_space<any>>
    %352 = tpu.memref_squeeze %351 : memref<1x128xf32, #tpu.memory_space<any>> -> memref<128xf32, #tpu.memory_space<any>>
    %c0_i32_246 = arith.constant 0 : i32
    %353 = tpu.memref_slice %arg4[%c50_i32, %c0_i32_246] : memref<64x128xf32, #tpu.memory_space<vmem>> -> memref<1x128xf32, #tpu.memory_space<vmem>>
    %354 = tpu.memref_squeeze %353 : memref<1x128xf32, #tpu.memory_space<vmem>> -> memref<128xf32, #tpu.memory_space<vmem>>
    %355 = tpu.memref_slice %arg5[%c50_i32_244] : memref<64x!tpu.dma_semaphore, #tpu.memory_space<semaphore_mem>> -> memref<1x!tpu.dma_semaphore, #tpu.memory_space<semaphore_mem>>
    %356 = tpu.memref_squeeze %355 : memref<1x!tpu.dma_semaphore, #tpu.memory_space<semaphore_mem>> -> memref<!tpu.dma_semaphore, #tpu.memory_space<semaphore_mem>>
    tpu.enqueue_dma source(%352 : memref<128xf32, #tpu.memory_space<any>>) target(%354 : memref<128xf32, #tpu.memory_space<vmem>>) target_semaphore(%356 : memref<!tpu.dma_semaphore, #tpu.memory_space<semaphore_mem>>)
    %c6_247 = arith.constant 6 : index
    %c3_248 = arith.constant 3 : index
    %357 = memref.load %arg1[%c6_247, %c3_248] : memref<8x8xi32, #tpu.memory_space<smem>>
    %c51_i32 = arith.constant 51 : i32
    %c51_i32_249 = arith.constant 51 : i32
    %c0_i32_250 = arith.constant 0 : i32
    %358 = tpu.memref_slice %arg2[%357, %c0_i32_250] : memref<1024x128xf32, #tpu.memory_space<any>> -> memref<1x128xf32, #tpu.memory_space<any>>
    %359 = tpu.memref_squeeze %358 : memref<1x128xf32, #tpu.memory_space<any>> -> memref<128xf32, #tpu.memory_space<any>>
    %c0_i32_251 = arith.constant 0 : i32
    %360 = tpu.memref_slice %arg4[%c51_i32, %c0_i32_251] : memref<64x128xf32, #tpu.memory_space<vmem>> -> memref<1x128xf32, #tpu.memory_space<vmem>>
    %361 = tpu.memref_squeeze %360 : memref<1x128xf32, #tpu.memory_space<vmem>> -> memref<128xf32, #tpu.memory_space<vmem>>
    %362 = tpu.memref_slice %arg5[%c51_i32_249] : memref<64x!tpu.dma_semaphore, #tpu.memory_space<semaphore_mem>> -> memref<1x!tpu.dma_semaphore, #tpu.memory_space<semaphore_mem>>
    %363 = tpu.memref_squeeze %362 : memref<1x!tpu.dma_semaphore, #tpu.memory_space<semaphore_mem>> -> memref<!tpu.dma_semaphore, #tpu.memory_space<semaphore_mem>>
    tpu.enqueue_dma source(%359 : memref<128xf32, #tpu.memory_space<any>>) target(%361 : memref<128xf32, #tpu.memory_space<vmem>>) target_semaphore(%363 : memref<!tpu.dma_semaphore, #tpu.memory_space<semaphore_mem>>)
    %c6_252 = arith.constant 6 : index
    %c4_253 = arith.constant 4 : index
    %364 = memref.load %arg1[%c6_252, %c4_253] : memref<8x8xi32, #tpu.memory_space<smem>>
    %c52_i32 = arith.constant 52 : i32
    %c52_i32_254 = arith.constant 52 : i32
    %c0_i32_255 = arith.constant 0 : i32
    %365 = tpu.memref_slice %arg2[%364, %c0_i32_255] : memref<1024x128xf32, #tpu.memory_space<any>> -> memref<1x128xf32, #tpu.memory_space<any>>
    %366 = tpu.memref_squeeze %365 : memref<1x128xf32, #tpu.memory_space<any>> -> memref<128xf32, #tpu.memory_space<any>>
    %c0_i32_256 = arith.constant 0 : i32
    %367 = tpu.memref_slice %arg4[%c52_i32, %c0_i32_256] : memref<64x128xf32, #tpu.memory_space<vmem>> -> memref<1x128xf32, #tpu.memory_space<vmem>>
    %368 = tpu.memref_squeeze %367 : memref<1x128xf32, #tpu.memory_space<vmem>> -> memref<128xf32, #tpu.memory_space<vmem>>
    %369 = tpu.memref_slice %arg5[%c52_i32_254] : memref<64x!tpu.dma_semaphore, #tpu.memory_space<semaphore_mem>> -> memref<1x!tpu.dma_semaphore, #tpu.memory_space<semaphore_mem>>
    %370 = tpu.memref_squeeze %369 : memref<1x!tpu.dma_semaphore, #tpu.memory_space<semaphore_mem>> -> memref<!tpu.dma_semaphore, #tpu.memory_space<semaphore_mem>>
    tpu.enqueue_dma source(%366 : memref<128xf32, #tpu.memory_space<any>>) target(%368 : memref<128xf32, #tpu.memory_space<vmem>>) target_semaphore(%370 : memref<!tpu.dma_semaphore, #tpu.memory_space<semaphore_mem>>)
    %c6_257 = arith.constant 6 : index
    %c5_258 = arith.constant 5 : index
    %371 = memref.load %arg1[%c6_257, %c5_258] : memref<8x8xi32, #tpu.memory_space<smem>>
    %c53_i32 = arith.constant 53 : i32
    %c53_i32_259 = arith.constant 53 : i32
    %c0_i32_260 = arith.constant 0 : i32
    %372 = tpu.memref_slice %arg2[%371, %c0_i32_260] : memref<1024x128xf32, #tpu.memory_space<any>> -> memref<1x128xf32, #tpu.memory_space<any>>
    %373 = tpu.memref_squeeze %372 : memref<1x128xf32, #tpu.memory_space<any>> -> memref<128xf32, #tpu.memory_space<any>>
    %c0_i32_261 = arith.constant 0 : i32
    %374 = tpu.memref_slice %arg4[%c53_i32, %c0_i32_261] : memref<64x128xf32, #tpu.memory_space<vmem>> -> memref<1x128xf32, #tpu.memory_space<vmem>>
    %375 = tpu.memref_squeeze %374 : memref<1x128xf32, #tpu.memory_space<vmem>> -> memref<128xf32, #tpu.memory_space<vmem>>
    %376 = tpu.memref_slice %arg5[%c53_i32_259] : memref<64x!tpu.dma_semaphore, #tpu.memory_space<semaphore_mem>> -> memref<1x!tpu.dma_semaphore, #tpu.memory_space<semaphore_mem>>
    %377 = tpu.memref_squeeze %376 : memref<1x!tpu.dma_semaphore, #tpu.memory_space<semaphore_mem>> -> memref<!tpu.dma_semaphore, #tpu.memory_space<semaphore_mem>>
    tpu.enqueue_dma source(%373 : memref<128xf32, #tpu.memory_space<any>>) target(%375 : memref<128xf32, #tpu.memory_space<vmem>>) target_semaphore(%377 : memref<!tpu.dma_semaphore, #tpu.memory_space<semaphore_mem>>)
    %c6_262 = arith.constant 6 : index
    %c6_263 = arith.constant 6 : index
    %378 = memref.load %arg1[%c6_262, %c6_263] : memref<8x8xi32, #tpu.memory_space<smem>>
    %c54_i32 = arith.constant 54 : i32
    %c54_i32_264 = arith.constant 54 : i32
    %c0_i32_265 = arith.constant 0 : i32
    %379 = tpu.memref_slice %arg2[%378, %c0_i32_265] : memref<1024x128xf32, #tpu.memory_space<any>> -> memref<1x128xf32, #tpu.memory_space<any>>
    %380 = tpu.memref_squeeze %379 : memref<1x128xf32, #tpu.memory_space<any>> -> memref<128xf32, #tpu.memory_space<any>>
    %c0_i32_266 = arith.constant 0 : i32
    %381 = tpu.memref_slice %arg4[%c54_i32, %c0_i32_266] : memref<64x128xf32, #tpu.memory_space<vmem>> -> memref<1x128xf32, #tpu.memory_space<vmem>>
    %382 = tpu.memref_squeeze %381 : memref<1x128xf32, #tpu.memory_space<vmem>> -> memref<128xf32, #tpu.memory_space<vmem>>
    %383 = tpu.memref_slice %arg5[%c54_i32_264] : memref<64x!tpu.dma_semaphore, #tpu.memory_space<semaphore_mem>> -> memref<1x!tpu.dma_semaphore, #tpu.memory_space<semaphore_mem>>
    %384 = tpu.memref_squeeze %383 : memref<1x!tpu.dma_semaphore, #tpu.memory_space<semaphore_mem>> -> memref<!tpu.dma_semaphore, #tpu.memory_space<semaphore_mem>>
    tpu.enqueue_dma source(%380 : memref<128xf32, #tpu.memory_space<any>>) target(%382 : memref<128xf32, #tpu.memory_space<vmem>>) target_semaphore(%384 : memref<!tpu.dma_semaphore, #tpu.memory_space<semaphore_mem>>)
    %c6_267 = arith.constant 6 : index
    %c7_268 = arith.constant 7 : index
    %385 = memref.load %arg1[%c6_267, %c7_268] : memref<8x8xi32, #tpu.memory_space<smem>>
    %c55_i32 = arith.constant 55 : i32
    %c55_i32_269 = arith.constant 55 : i32
    %c0_i32_270 = arith.constant 0 : i32
    %386 = tpu.memref_slice %arg2[%385, %c0_i32_270] : memref<1024x128xf32, #tpu.memory_space<any>> -> memref<1x128xf32, #tpu.memory_space<any>>
    %387 = tpu.memref_squeeze %386 : memref<1x128xf32, #tpu.memory_space<any>> -> memref<128xf32, #tpu.memory_space<any>>
    %c0_i32_271 = arith.constant 0 : i32
    %388 = tpu.memref_slice %arg4[%c55_i32, %c0_i32_271] : memref<64x128xf32, #tpu.memory_space<vmem>> -> memref<1x128xf32, #tpu.memory_space<vmem>>
    %389 = tpu.memref_squeeze %388 : memref<1x128xf32, #tpu.memory_space<vmem>> -> memref<128xf32, #tpu.memory_space<vmem>>
    %390 = tpu.memref_slice %arg5[%c55_i32_269] : memref<64x!tpu.dma_semaphore, #tpu.memory_space<semaphore_mem>> -> memref<1x!tpu.dma_semaphore, #tpu.memory_space<semaphore_mem>>
    %391 = tpu.memref_squeeze %390 : memref<1x!tpu.dma_semaphore, #tpu.memory_space<semaphore_mem>> -> memref<!tpu.dma_semaphore, #tpu.memory_space<semaphore_mem>>
    tpu.enqueue_dma source(%387 : memref<128xf32, #tpu.memory_space<any>>) target(%389 : memref<128xf32, #tpu.memory_space<vmem>>) target_semaphore(%391 : memref<!tpu.dma_semaphore, #tpu.memory_space<semaphore_mem>>)
    %c7_272 = arith.constant 7 : index
    %c0_273 = arith.constant 0 : index
    %392 = memref.load %arg1[%c7_272, %c0_273] : memref<8x8xi32, #tpu.memory_space<smem>>
    %c56_i32 = arith.constant 56 : i32
    %c56_i32_274 = arith.constant 56 : i32
    %c0_i32_275 = arith.constant 0 : i32
    %393 = tpu.memref_slice %arg2[%392, %c0_i32_275] : memref<1024x128xf32, #tpu.memory_space<any>> -> memref<1x128xf32, #tpu.memory_space<any>>
    %394 = tpu.memref_squeeze %393 : memref<1x128xf32, #tpu.memory_space<any>> -> memref<128xf32, #tpu.memory_space<any>>
    %c0_i32_276 = arith.constant 0 : i32
    %395 = tpu.memref_slice %arg4[%c56_i32, %c0_i32_276] : memref<64x128xf32, #tpu.memory_space<vmem>> -> memref<1x128xf32, #tpu.memory_space<vmem>>
    %396 = tpu.memref_squeeze %395 : memref<1x128xf32, #tpu.memory_space<vmem>> -> memref<128xf32, #tpu.memory_space<vmem>>
    %397 = tpu.memref_slice %arg5[%c56_i32_274] : memref<64x!tpu.dma_semaphore, #tpu.memory_space<semaphore_mem>> -> memref<1x!tpu.dma_semaphore, #tpu.memory_space<semaphore_mem>>
    %398 = tpu.memref_squeeze %397 : memref<1x!tpu.dma_semaphore, #tpu.memory_space<semaphore_mem>> -> memref<!tpu.dma_semaphore, #tpu.memory_space<semaphore_mem>>
    tpu.enqueue_dma source(%394 : memref<128xf32, #tpu.memory_space<any>>) target(%396 : memref<128xf32, #tpu.memory_space<vmem>>) target_semaphore(%398 : memref<!tpu.dma_semaphore, #tpu.memory_space<semaphore_mem>>)
    %c7_277 = arith.constant 7 : index
    %c1_278 = arith.constant 1 : index
    %399 = memref.load %arg1[%c7_277, %c1_278] : memref<8x8xi32, #tpu.memory_space<smem>>
    %c57_i32 = arith.constant 57 : i32
    %c57_i32_279 = arith.constant 57 : i32
    %c0_i32_280 = arith.constant 0 : i32
    %400 = tpu.memref_slice %arg2[%399, %c0_i32_280] : memref<1024x128xf32, #tpu.memory_space<any>> -> memref<1x128xf32, #tpu.memory_space<any>>
    %401 = tpu.memref_squeeze %400 : memref<1x128xf32, #tpu.memory_space<any>> -> memref<128xf32, #tpu.memory_space<any>>
    %c0_i32_281 = arith.constant 0 : i32
    %402 = tpu.memref_slice %arg4[%c57_i32, %c0_i32_281] : memref<64x128xf32, #tpu.memory_space<vmem>> -> memref<1x128xf32, #tpu.memory_space<vmem>>
    %403 = tpu.memref_squeeze %402 : memref<1x128xf32, #tpu.memory_space<vmem>> -> memref<128xf32, #tpu.memory_space<vmem>>
    %404 = tpu.memref_slice %arg5[%c57_i32_279] : memref<64x!tpu.dma_semaphore, #tpu.memory_space<semaphore_mem>> -> memref<1x!tpu.dma_semaphore, #tpu.memory_space<semaphore_mem>>
    %405 = tpu.memref_squeeze %404 : memref<1x!tpu.dma_semaphore, #tpu.memory_space<semaphore_mem>> -> memref<!tpu.dma_semaphore, #tpu.memory_space<semaphore_mem>>
    tpu.enqueue_dma source(%401 : memref<128xf32, #tpu.memory_space<any>>) target(%403 : memref<128xf32, #tpu.memory_space<vmem>>) target_semaphore(%405 : memref<!tpu.dma_semaphore, #tpu.memory_space<semaphore_mem>>)
    %c7_282 = arith.constant 7 : index
    %c2_283 = arith.constant 2 : index
    %406 = memref.load %arg1[%c7_282, %c2_283] : memref<8x8xi32, #tpu.memory_space<smem>>
    %c58_i32 = arith.constant 58 : i32
    %c58_i32_284 = arith.constant 58 : i32
    %c0_i32_285 = arith.constant 0 : i32
    %407 = tpu.memref_slice %arg2[%406, %c0_i32_285] : memref<1024x128xf32, #tpu.memory_space<any>> -> memref<1x128xf32, #tpu.memory_space<any>>
    %408 = tpu.memref_squeeze %407 : memref<1x128xf32, #tpu.memory_space<any>> -> memref<128xf32, #tpu.memory_space<any>>
    %c0_i32_286 = arith.constant 0 : i32
    %409 = tpu.memref_slice %arg4[%c58_i32, %c0_i32_286] : memref<64x128xf32, #tpu.memory_space<vmem>> -> memref<1x128xf32, #tpu.memory_space<vmem>>
    %410 = tpu.memref_squeeze %409 : memref<1x128xf32, #tpu.memory_space<vmem>> -> memref<128xf32, #tpu.memory_space<vmem>>
    %411 = tpu.memref_slice %arg5[%c58_i32_284] : memref<64x!tpu.dma_semaphore, #tpu.memory_space<semaphore_mem>> -> memref<1x!tpu.dma_semaphore, #tpu.memory_space<semaphore_mem>>
    %412 = tpu.memref_squeeze %411 : memref<1x!tpu.dma_semaphore, #tpu.memory_space<semaphore_mem>> -> memref<!tpu.dma_semaphore, #tpu.memory_space<semaphore_mem>>
    tpu.enqueue_dma source(%408 : memref<128xf32, #tpu.memory_space<any>>) target(%410 : memref<128xf32, #tpu.memory_space<vmem>>) target_semaphore(%412 : memref<!tpu.dma_semaphore, #tpu.memory_space<semaphore_mem>>)
    %c7_287 = arith.constant 7 : index
    %c3_288 = arith.constant 3 : index
    %413 = memref.load %arg1[%c7_287, %c3_288] : memref<8x8xi32, #tpu.memory_space<smem>>
    %c59_i32 = arith.constant 59 : i32
    %c59_i32_289 = arith.constant 59 : i32
    %c0_i32_290 = arith.constant 0 : i32
    %414 = tpu.memref_slice %arg2[%413, %c0_i32_290] : memref<1024x128xf32, #tpu.memory_space<any>> -> memref<1x128xf32, #tpu.memory_space<any>>
    %415 = tpu.memref_squeeze %414 : memref<1x128xf32, #tpu.memory_space<any>> -> memref<128xf32, #tpu.memory_space<any>>
    %c0_i32_291 = arith.constant 0 : i32
    %416 = tpu.memref_slice %arg4[%c59_i32, %c0_i32_291] : memref<64x128xf32, #tpu.memory_space<vmem>> -> memref<1x128xf32, #tpu.memory_space<vmem>>
    %417 = tpu.memref_squeeze %416 : memref<1x128xf32, #tpu.memory_space<vmem>> -> memref<128xf32, #tpu.memory_space<vmem>>
    %418 = tpu.memref_slice %arg5[%c59_i32_289] : memref<64x!tpu.dma_semaphore, #tpu.memory_space<semaphore_mem>> -> memref<1x!tpu.dma_semaphore, #tpu.memory_space<semaphore_mem>>
    %419 = tpu.memref_squeeze %418 : memref<1x!tpu.dma_semaphore, #tpu.memory_space<semaphore_mem>> -> memref<!tpu.dma_semaphore, #tpu.memory_space<semaphore_mem>>
    tpu.enqueue_dma source(%415 : memref<128xf32, #tpu.memory_space<any>>) target(%417 : memref<128xf32, #tpu.memory_space<vmem>>) target_semaphore(%419 : memref<!tpu.dma_semaphore, #tpu.memory_space<semaphore_mem>>)
    %c7_292 = arith.constant 7 : index
    %c4_293 = arith.constant 4 : index
    %420 = memref.load %arg1[%c7_292, %c4_293] : memref<8x8xi32, #tpu.memory_space<smem>>
    %c60_i32 = arith.constant 60 : i32
    %c60_i32_294 = arith.constant 60 : i32
    %c0_i32_295 = arith.constant 0 : i32
    %421 = tpu.memref_slice %arg2[%420, %c0_i32_295] : memref<1024x128xf32, #tpu.memory_space<any>> -> memref<1x128xf32, #tpu.memory_space<any>>
    %422 = tpu.memref_squeeze %421 : memref<1x128xf32, #tpu.memory_space<any>> -> memref<128xf32, #tpu.memory_space<any>>
    %c0_i32_296 = arith.constant 0 : i32
    %423 = tpu.memref_slice %arg4[%c60_i32, %c0_i32_296] : memref<64x128xf32, #tpu.memory_space<vmem>> -> memref<1x128xf32, #tpu.memory_space<vmem>>
    %424 = tpu.memref_squeeze %423 : memref<1x128xf32, #tpu.memory_space<vmem>> -> memref<128xf32, #tpu.memory_space<vmem>>
    %425 = tpu.memref_slice %arg5[%c60_i32_294] : memref<64x!tpu.dma_semaphore, #tpu.memory_space<semaphore_mem>> -> memref<1x!tpu.dma_semaphore, #tpu.memory_space<semaphore_mem>>
    %426 = tpu.memref_squeeze %425 : memref<1x!tpu.dma_semaphore, #tpu.memory_space<semaphore_mem>> -> memref<!tpu.dma_semaphore, #tpu.memory_space<semaphore_mem>>
    tpu.enqueue_dma source(%422 : memref<128xf32, #tpu.memory_space<any>>) target(%424 : memref<128xf32, #tpu.memory_space<vmem>>) target_semaphore(%426 : memref<!tpu.dma_semaphore, #tpu.memory_space<semaphore_mem>>)
    %c7_297 = arith.constant 7 : index
    %c5_298 = arith.constant 5 : index
    %427 = memref.load %arg1[%c7_297, %c5_298] : memref<8x8xi32, #tpu.memory_space<smem>>
    %c61_i32 = arith.constant 61 : i32
    %c61_i32_299 = arith.constant 61 : i32
    %c0_i32_300 = arith.constant 0 : i32
    %428 = tpu.memref_slice %arg2[%427, %c0_i32_300] : memref<1024x128xf32, #tpu.memory_space<any>> -> memref<1x128xf32, #tpu.memory_space<any>>
    %429 = tpu.memref_squeeze %428 : memref<1x128xf32, #tpu.memory_space<any>> -> memref<128xf32, #tpu.memory_space<any>>
    %c0_i32_301 = arith.constant 0 : i32
    %430 = tpu.memref_slice %arg4[%c61_i32, %c0_i32_301] : memref<64x128xf32, #tpu.memory_space<vmem>> -> memref<1x128xf32, #tpu.memory_space<vmem>>
    %431 = tpu.memref_squeeze %430 : memref<1x128xf32, #tpu.memory_space<vmem>> -> memref<128xf32, #tpu.memory_space<vmem>>
    %432 = tpu.memref_slice %arg5[%c61_i32_299] : memref<64x!tpu.dma_semaphore, #tpu.memory_space<semaphore_mem>> -> memref<1x!tpu.dma_semaphore, #tpu.memory_space<semaphore_mem>>
    %433 = tpu.memref_squeeze %432 : memref<1x!tpu.dma_semaphore, #tpu.memory_space<semaphore_mem>> -> memref<!tpu.dma_semaphore, #tpu.memory_space<semaphore_mem>>
    tpu.enqueue_dma source(%429 : memref<128xf32, #tpu.memory_space<any>>) target(%431 : memref<128xf32, #tpu.memory_space<vmem>>) target_semaphore(%433 : memref<!tpu.dma_semaphore, #tpu.memory_space<semaphore_mem>>)
    %c7_302 = arith.constant 7 : index
    %c6_303 = arith.constant 6 : index
    %434 = memref.load %arg1[%c7_302, %c6_303] : memref<8x8xi32, #tpu.memory_space<smem>>
    %c62_i32 = arith.constant 62 : i32
    %c62_i32_304 = arith.constant 62 : i32
    %c0_i32_305 = arith.constant 0 : i32
    %435 = tpu.memref_slice %arg2[%434, %c0_i32_305] : memref<1024x128xf32, #tpu.memory_space<any>> -> memref<1x128xf32, #tpu.memory_space<any>>
    %436 = tpu.memref_squeeze %435 : memref<1x128xf32, #tpu.memory_space<any>> -> memref<128xf32, #tpu.memory_space<any>>
    %c0_i32_306 = arith.constant 0 : i32
    %437 = tpu.memref_slice %arg4[%c62_i32, %c0_i32_306] : memref<64x128xf32, #tpu.memory_space<vmem>> -> memref<1x128xf32, #tpu.memory_space<vmem>>
    %438 = tpu.memref_squeeze %437 : memref<1x128xf32, #tpu.memory_space<vmem>> -> memref<128xf32, #tpu.memory_space<vmem>>
    %439 = tpu.memref_slice %arg5[%c62_i32_304] : memref<64x!tpu.dma_semaphore, #tpu.memory_space<semaphore_mem>> -> memref<1x!tpu.dma_semaphore, #tpu.memory_space<semaphore_mem>>
    %440 = tpu.memref_squeeze %439 : memref<1x!tpu.dma_semaphore, #tpu.memory_space<semaphore_mem>> -> memref<!tpu.dma_semaphore, #tpu.memory_space<semaphore_mem>>
    tpu.enqueue_dma source(%436 : memref<128xf32, #tpu.memory_space<any>>) target(%438 : memref<128xf32, #tpu.memory_space<vmem>>) target_semaphore(%440 : memref<!tpu.dma_semaphore, #tpu.memory_space<semaphore_mem>>)
    %c7_307 = arith.constant 7 : index
    %c7_308 = arith.constant 7 : index
    %441 = memref.load %arg1[%c7_307, %c7_308] : memref<8x8xi32, #tpu.memory_space<smem>>
    %c63_i32 = arith.constant 63 : i32
    %c63_i32_309 = arith.constant 63 : i32
    %c0_i32_310 = arith.constant 0 : i32
    %442 = tpu.memref_slice %arg2[%441, %c0_i32_310] : memref<1024x128xf32, #tpu.memory_space<any>> -> memref<1x128xf32, #tpu.memory_space<any>>
    %443 = tpu.memref_squeeze %442 : memref<1x128xf32, #tpu.memory_space<any>> -> memref<128xf32, #tpu.memory_space<any>>
    %c0_i32_311 = arith.constant 0 : i32
    %444 = tpu.memref_slice %arg4[%c63_i32, %c0_i32_311] : memref<64x128xf32, #tpu.memory_space<vmem>> -> memref<1x128xf32, #tpu.memory_space<vmem>>
    %445 = tpu.memref_squeeze %444 : memref<1x128xf32, #tpu.memory_space<vmem>> -> memref<128xf32, #tpu.memory_space<vmem>>
    %446 = tpu.memref_slice %arg5[%c63_i32_309] : memref<64x!tpu.dma_semaphore, #tpu.memory_space<semaphore_mem>> -> memref<1x!tpu.dma_semaphore, #tpu.memory_space<semaphore_mem>>
    %447 = tpu.memref_squeeze %446 : memref<1x!tpu.dma_semaphore, #tpu.memory_space<semaphore_mem>> -> memref<!tpu.dma_semaphore, #tpu.memory_space<semaphore_mem>>
    tpu.enqueue_dma source(%443 : memref<128xf32, #tpu.memory_space<any>>) target(%445 : memref<128xf32, #tpu.memory_space<vmem>>) target_semaphore(%447 : memref<!tpu.dma_semaphore, #tpu.memory_space<semaphore_mem>>)
    %c0_i32_312 = arith.constant 0 : i32
    %c0_i32_313 = arith.constant 0 : i32
    %c0_i32_314 = arith.constant 0 : i32
    %c0_i32_315 = arith.constant 0 : i32
    %448 = tpu.memref_slice %arg2[%c0_i32_312, %c0_i32_315] : memref<1024x128xf32, #tpu.memory_space<any>> -> memref<1x128xf32, #tpu.memory_space<any>>
    %449 = tpu.memref_squeeze %448 : memref<1x128xf32, #tpu.memory_space<any>> -> memref<128xf32, #tpu.memory_space<any>>
    %c0_i32_316 = arith.constant 0 : i32
    %450 = tpu.memref_slice %arg4[%c0_i32_313, %c0_i32_316] : memref<64x128xf32, #tpu.memory_space<vmem>> -> memref<1x128xf32, #tpu.memory_space<vmem>>
    %451 = tpu.memref_squeeze %450 : memref<1x128xf32, #tpu.memory_space<vmem>> -> memref<128xf32, #tpu.memory_space<vmem>>
    %452 = tpu.memref_slice %arg5[%c0_i32_314] : memref<64x!tpu.dma_semaphore, #tpu.memory_space<semaphore_mem>> -> memref<1x!tpu.dma_semaphore, #tpu.memory_space<semaphore_mem>>
    %453 = tpu.memref_squeeze %452 : memref<1x!tpu.dma_semaphore, #tpu.memory_space<semaphore_mem>> -> memref<!tpu.dma_semaphore, #tpu.memory_space<semaphore_mem>>
    tpu.wait_dma2 semaphore(%453 : memref<!tpu.dma_semaphore, #tpu.memory_space<semaphore_mem>>) src(%449 : memref<128xf32, #tpu.memory_space<any>>) dst(%451 : memref<128xf32, #tpu.memory_space<vmem>>)
    %c0_i32_317 = arith.constant 0 : i32
    %c1_i32_318 = arith.constant 1 : i32
    %c1_i32_319 = arith.constant 1 : i32
    %c0_i32_320 = arith.constant 0 : i32
    %454 = tpu.memref_slice %arg2[%c0_i32_317, %c0_i32_320] : memref<1024x128xf32, #tpu.memory_space<any>> -> memref<1x128xf32, #tpu.memory_space<any>>
    %455 = tpu.memref_squeeze %454 : memref<1x128xf32, #tpu.memory_space<any>> -> memref<128xf32, #tpu.memory_space<any>>
    %c0_i32_321 = arith.constant 0 : i32
    %456 = tpu.memref_slice %arg4[%c1_i32_318, %c0_i32_321] : memref<64x128xf32, #tpu.memory_space<vmem>> -> memref<1x128xf32, #tpu.memory_space<vmem>>
    %457 = tpu.memref_squeeze %456 : memref<1x128xf32, #tpu.memory_space<vmem>> -> memref<128xf32, #tpu.memory_space<vmem>>
    %458 = tpu.memref_slice %arg5[%c1_i32_319] : memref<64x!tpu.dma_semaphore, #tpu.memory_space<semaphore_mem>> -> memref<1x!tpu.dma_semaphore, #tpu.memory_space<semaphore_mem>>
    %459 = tpu.memref_squeeze %458 : memref<1x!tpu.dma_semaphore, #tpu.memory_space<semaphore_mem>> -> memref<!tpu.dma_semaphore, #tpu.memory_space<semaphore_mem>>
    tpu.wait_dma2 semaphore(%459 : memref<!tpu.dma_semaphore, #tpu.memory_space<semaphore_mem>>) src(%455 : memref<128xf32, #tpu.memory_space<any>>) dst(%457 : memref<128xf32, #tpu.memory_space<vmem>>)
    %c0_i32_322 = arith.constant 0 : i32
    %c2_i32_323 = arith.constant 2 : i32
    %c2_i32_324 = arith.constant 2 : i32
    %c0_i32_325 = arith.constant 0 : i32
    %460 = tpu.memref_slice %arg2[%c0_i32_322, %c0_i32_325] : memref<1024x128xf32, #tpu.memory_space<any>> -> memref<1x128xf32, #tpu.memory_space<any>>
    %461 = tpu.memref_squeeze %460 : memref<1x128xf32, #tpu.memory_space<any>> -> memref<128xf32, #tpu.memory_space<any>>
    %c0_i32_326 = arith.constant 0 : i32
    %462 = tpu.memref_slice %arg4[%c2_i32_323, %c0_i32_326] : memref<64x128xf32, #tpu.memory_space<vmem>> -> memref<1x128xf32, #tpu.memory_space<vmem>>
    %463 = tpu.memref_squeeze %462 : memref<1x128xf32, #tpu.memory_space<vmem>> -> memref<128xf32, #tpu.memory_space<vmem>>
    %464 = tpu.memref_slice %arg5[%c2_i32_324] : memref<64x!tpu.dma_semaphore, #tpu.memory_space<semaphore_mem>> -> memref<1x!tpu.dma_semaphore, #tpu.memory_space<semaphore_mem>>
    %465 = tpu.memref_squeeze %464 : memref<1x!tpu.dma_semaphore, #tpu.memory_space<semaphore_mem>> -> memref<!tpu.dma_semaphore, #tpu.memory_space<semaphore_mem>>
    tpu.wait_dma2 semaphore(%465 : memref<!tpu.dma_semaphore, #tpu.memory_space<semaphore_mem>>) src(%461 : memref<128xf32, #tpu.memory_space<any>>) dst(%463 : memref<128xf32, #tpu.memory_space<vmem>>)
    %c0_i32_327 = arith.constant 0 : i32
    %c3_i32_328 = arith.constant 3 : i32
    %c3_i32_329 = arith.constant 3 : i32
    %c0_i32_330 = arith.constant 0 : i32
    %466 = tpu.memref_slice %arg2[%c0_i32_327, %c0_i32_330] : memref<1024x128xf32, #tpu.memory_space<any>> -> memref<1x128xf32, #tpu.memory_space<any>>
    %467 = tpu.memref_squeeze %466 : memref<1x128xf32, #tpu.memory_space<any>> -> memref<128xf32, #tpu.memory_space<any>>
    %c0_i32_331 = arith.constant 0 : i32
    %468 = tpu.memref_slice %arg4[%c3_i32_328, %c0_i32_331] : memref<64x128xf32, #tpu.memory_space<vmem>> -> memref<1x128xf32, #tpu.memory_space<vmem>>
    %469 = tpu.memref_squeeze %468 : memref<1x128xf32, #tpu.memory_space<vmem>> -> memref<128xf32, #tpu.memory_space<vmem>>
    %470 = tpu.memref_slice %arg5[%c3_i32_329] : memref<64x!tpu.dma_semaphore, #tpu.memory_space<semaphore_mem>> -> memref<1x!tpu.dma_semaphore, #tpu.memory_space<semaphore_mem>>
    %471 = tpu.memref_squeeze %470 : memref<1x!tpu.dma_semaphore, #tpu.memory_space<semaphore_mem>> -> memref<!tpu.dma_semaphore, #tpu.memory_space<semaphore_mem>>
    tpu.wait_dma2 semaphore(%471 : memref<!tpu.dma_semaphore, #tpu.memory_space<semaphore_mem>>) src(%467 : memref<128xf32, #tpu.memory_space<any>>) dst(%469 : memref<128xf32, #tpu.memory_space<vmem>>)
    %c0_i32_332 = arith.constant 0 : i32
    %c4_i32_333 = arith.constant 4 : i32
    %c4_i32_334 = arith.constant 4 : i32
    %c0_i32_335 = arith.constant 0 : i32
    %472 = tpu.memref_slice %arg2[%c0_i32_332, %c0_i32_335] : memref<1024x128xf32, #tpu.memory_space<any>> -> memref<1x128xf32, #tpu.memory_space<any>>
    %473 = tpu.memref_squeeze %472 : memref<1x128xf32, #tpu.memory_space<any>> -> memref<128xf32, #tpu.memory_space<any>>
    %c0_i32_336 = arith.constant 0 : i32
    %474 = tpu.memref_slice %arg4[%c4_i32_333, %c0_i32_336] : memref<64x128xf32, #tpu.memory_space<vmem>> -> memref<1x128xf32, #tpu.memory_space<vmem>>
    %475 = tpu.memref_squeeze %474 : memref<1x128xf32, #tpu.memory_space<vmem>> -> memref<128xf32, #tpu.memory_space<vmem>>
    %476 = tpu.memref_slice %arg5[%c4_i32_334] : memref<64x!tpu.dma_semaphore, #tpu.memory_space<semaphore_mem>> -> memref<1x!tpu.dma_semaphore, #tpu.memory_space<semaphore_mem>>
    %477 = tpu.memref_squeeze %476 : memref<1x!tpu.dma_semaphore, #tpu.memory_space<semaphore_mem>> -> memref<!tpu.dma_semaphore, #tpu.memory_space<semaphore_mem>>
    tpu.wait_dma2 semaphore(%477 : memref<!tpu.dma_semaphore, #tpu.memory_space<semaphore_mem>>) src(%473 : memref<128xf32, #tpu.memory_space<any>>) dst(%475 : memref<128xf32, #tpu.memory_space<vmem>>)
    %c0_i32_337 = arith.constant 0 : i32
    %c5_i32_338 = arith.constant 5 : i32
    %c5_i32_339 = arith.constant 5 : i32
    %c0_i32_340 = arith.constant 0 : i32
    %478 = tpu.memref_slice %arg2[%c0_i32_337, %c0_i32_340] : memref<1024x128xf32, #tpu.memory_space<any>> -> memref<1x128xf32, #tpu.memory_space<any>>
    %479 = tpu.memref_squeeze %478 : memref<1x128xf32, #tpu.memory_space<any>> -> memref<128xf32, #tpu.memory_space<any>>
    %c0_i32_341 = arith.constant 0 : i32
    %480 = tpu.memref_slice %arg4[%c5_i32_338, %c0_i32_341] : memref<64x128xf32, #tpu.memory_space<vmem>> -> memref<1x128xf32, #tpu.memory_space<vmem>>
    %481 = tpu.memref_squeeze %480 : memref<1x128xf32, #tpu.memory_space<vmem>> -> memref<128xf32, #tpu.memory_space<vmem>>
    %482 = tpu.memref_slice %arg5[%c5_i32_339] : memref<64x!tpu.dma_semaphore, #tpu.memory_space<semaphore_mem>> -> memref<1x!tpu.dma_semaphore, #tpu.memory_space<semaphore_mem>>
    %483 = tpu.memref_squeeze %482 : memref<1x!tpu.dma_semaphore, #tpu.memory_space<semaphore_mem>> -> memref<!tpu.dma_semaphore, #tpu.memory_space<semaphore_mem>>
    tpu.wait_dma2 semaphore(%483 : memref<!tpu.dma_semaphore, #tpu.memory_space<semaphore_mem>>) src(%479 : memref<128xf32, #tpu.memory_space<any>>) dst(%481 : memref<128xf32, #tpu.memory_space<vmem>>)
    %c0_i32_342 = arith.constant 0 : i32
    %c6_i32_343 = arith.constant 6 : i32
    %c6_i32_344 = arith.constant 6 : i32
    %c0_i32_345 = arith.constant 0 : i32
    %484 = tpu.memref_slice %arg2[%c0_i32_342, %c0_i32_345] : memref<1024x128xf32, #tpu.memory_space<any>> -> memref<1x128xf32, #tpu.memory_space<any>>
    %485 = tpu.memref_squeeze %484 : memref<1x128xf32, #tpu.memory_space<any>> -> memref<128xf32, #tpu.memory_space<any>>
    %c0_i32_346 = arith.constant 0 : i32
    %486 = tpu.memref_slice %arg4[%c6_i32_343, %c0_i32_346] : memref<64x128xf32, #tpu.memory_space<vmem>> -> memref<1x128xf32, #tpu.memory_space<vmem>>
    %487 = tpu.memref_squeeze %486 : memref<1x128xf32, #tpu.memory_space<vmem>> -> memref<128xf32, #tpu.memory_space<vmem>>
    %488 = tpu.memref_slice %arg5[%c6_i32_344] : memref<64x!tpu.dma_semaphore, #tpu.memory_space<semaphore_mem>> -> memref<1x!tpu.dma_semaphore, #tpu.memory_space<semaphore_mem>>
    %489 = tpu.memref_squeeze %488 : memref<1x!tpu.dma_semaphore, #tpu.memory_space<semaphore_mem>> -> memref<!tpu.dma_semaphore, #tpu.memory_space<semaphore_mem>>
    tpu.wait_dma2 semaphore(%489 : memref<!tpu.dma_semaphore, #tpu.memory_space<semaphore_mem>>) src(%485 : memref<128xf32, #tpu.memory_space<any>>) dst(%487 : memref<128xf32, #tpu.memory_space<vmem>>)
    %c0_i32_347 = arith.constant 0 : i32
    %c7_i32_348 = arith.constant 7 : i32
    %c7_i32_349 = arith.constant 7 : i32
    %c0_i32_350 = arith.constant 0 : i32
    %490 = tpu.memref_slice %arg2[%c0_i32_347, %c0_i32_350] : memref<1024x128xf32, #tpu.memory_space<any>> -> memref<1x128xf32, #tpu.memory_space<any>>
    %491 = tpu.memref_squeeze %490 : memref<1x128xf32, #tpu.memory_space<any>> -> memref<128xf32, #tpu.memory_space<any>>
    %c0_i32_351 = arith.constant 0 : i32
    %492 = tpu.memref_slice %arg4[%c7_i32_348, %c0_i32_351] : memref<64x128xf32, #tpu.memory_space<vmem>> -> memref<1x128xf32, #tpu.memory_space<vmem>>
    %493 = tpu.memref_squeeze %492 : memref<1x128xf32, #tpu.memory_space<vmem>> -> memref<128xf32, #tpu.memory_space<vmem>>
    %494 = tpu.memref_slice %arg5[%c7_i32_349] : memref<64x!tpu.dma_semaphore, #tpu.memory_space<semaphore_mem>> -> memref<1x!tpu.dma_semaphore, #tpu.memory_space<semaphore_mem>>
    %495 = tpu.memref_squeeze %494 : memref<1x!tpu.dma_semaphore, #tpu.memory_space<semaphore_mem>> -> memref<!tpu.dma_semaphore, #tpu.memory_space<semaphore_mem>>
    tpu.wait_dma2 semaphore(%495 : memref<!tpu.dma_semaphore, #tpu.memory_space<semaphore_mem>>) src(%491 : memref<128xf32, #tpu.memory_space<any>>) dst(%493 : memref<128xf32, #tpu.memory_space<vmem>>)
    %c0_i32_352 = arith.constant 0 : i32
    %c8_i32_353 = arith.constant 8 : i32
    %c8_i32_354 = arith.constant 8 : i32
    %c0_i32_355 = arith.constant 0 : i32
    %496 = tpu.memref_slice %arg2[%c0_i32_352, %c0_i32_355] : memref<1024x128xf32, #tpu.memory_space<any>> -> memref<1x128xf32, #tpu.memory_space<any>>
    %497 = tpu.memref_squeeze %496 : memref<1x128xf32, #tpu.memory_space<any>> -> memref<128xf32, #tpu.memory_space<any>>
    %c0_i32_356 = arith.constant 0 : i32
    %498 = tpu.memref_slice %arg4[%c8_i32_353, %c0_i32_356] : memref<64x128xf32, #tpu.memory_space<vmem>> -> memref<1x128xf32, #tpu.memory_space<vmem>>
    %499 = tpu.memref_squeeze %498 : memref<1x128xf32, #tpu.memory_space<vmem>> -> memref<128xf32, #tpu.memory_space<vmem>>
    %500 = tpu.memref_slice %arg5[%c8_i32_354] : memref<64x!tpu.dma_semaphore, #tpu.memory_space<semaphore_mem>> -> memref<1x!tpu.dma_semaphore, #tpu.memory_space<semaphore_mem>>
    %501 = tpu.memref_squeeze %500 : memref<1x!tpu.dma_semaphore, #tpu.memory_space<semaphore_mem>> -> memref<!tpu.dma_semaphore, #tpu.memory_space<semaphore_mem>>
    tpu.wait_dma2 semaphore(%501 : memref<!tpu.dma_semaphore, #tpu.memory_space<semaphore_mem>>) src(%497 : memref<128xf32, #tpu.memory_space<any>>) dst(%499 : memref<128xf32, #tpu.memory_space<vmem>>)
    %c0_i32_357 = arith.constant 0 : i32
    %c9_i32_358 = arith.constant 9 : i32
    %c9_i32_359 = arith.constant 9 : i32
    %c0_i32_360 = arith.constant 0 : i32
    %502 = tpu.memref_slice %arg2[%c0_i32_357, %c0_i32_360] : memref<1024x128xf32, #tpu.memory_space<any>> -> memref<1x128xf32, #tpu.memory_space<any>>
    %503 = tpu.memref_squeeze %502 : memref<1x128xf32, #tpu.memory_space<any>> -> memref<128xf32, #tpu.memory_space<any>>
    %c0_i32_361 = arith.constant 0 : i32
    %504 = tpu.memref_slice %arg4[%c9_i32_358, %c0_i32_361] : memref<64x128xf32, #tpu.memory_space<vmem>> -> memref<1x128xf32, #tpu.memory_space<vmem>>
    %505 = tpu.memref_squeeze %504 : memref<1x128xf32, #tpu.memory_space<vmem>> -> memref<128xf32, #tpu.memory_space<vmem>>
    %506 = tpu.memref_slice %arg5[%c9_i32_359] : memref<64x!tpu.dma_semaphore, #tpu.memory_space<semaphore_mem>> -> memref<1x!tpu.dma_semaphore, #tpu.memory_space<semaphore_mem>>
    %507 = tpu.memref_squeeze %506 : memref<1x!tpu.dma_semaphore, #tpu.memory_space<semaphore_mem>> -> memref<!tpu.dma_semaphore, #tpu.memory_space<semaphore_mem>>
    tpu.wait_dma2 semaphore(%507 : memref<!tpu.dma_semaphore, #tpu.memory_space<semaphore_mem>>) src(%503 : memref<128xf32, #tpu.memory_space<any>>) dst(%505 : memref<128xf32, #tpu.memory_space<vmem>>)
    %c0_i32_362 = arith.constant 0 : i32
    %c10_i32_363 = arith.constant 10 : i32
    %c10_i32_364 = arith.constant 10 : i32
    %c0_i32_365 = arith.constant 0 : i32
    %508 = tpu.memref_slice %arg2[%c0_i32_362, %c0_i32_365] : memref<1024x128xf32, #tpu.memory_space<any>> -> memref<1x128xf32, #tpu.memory_space<any>>
    %509 = tpu.memref_squeeze %508 : memref<1x128xf32, #tpu.memory_space<any>> -> memref<128xf32, #tpu.memory_space<any>>
    %c0_i32_366 = arith.constant 0 : i32
    %510 = tpu.memref_slice %arg4[%c10_i32_363, %c0_i32_366] : memref<64x128xf32, #tpu.memory_space<vmem>> -> memref<1x128xf32, #tpu.memory_space<vmem>>
    %511 = tpu.memref_squeeze %510 : memref<1x128xf32, #tpu.memory_space<vmem>> -> memref<128xf32, #tpu.memory_space<vmem>>
    %512 = tpu.memref_slice %arg5[%c10_i32_364] : memref<64x!tpu.dma_semaphore, #tpu.memory_space<semaphore_mem>> -> memref<1x!tpu.dma_semaphore, #tpu.memory_space<semaphore_mem>>
    %513 = tpu.memref_squeeze %512 : memref<1x!tpu.dma_semaphore, #tpu.memory_space<semaphore_mem>> -> memref<!tpu.dma_semaphore, #tpu.memory_space<semaphore_mem>>
    tpu.wait_dma2 semaphore(%513 : memref<!tpu.dma_semaphore, #tpu.memory_space<semaphore_mem>>) src(%509 : memref<128xf32, #tpu.memory_space<any>>) dst(%511 : memref<128xf32, #tpu.memory_space<vmem>>)
    %c0_i32_367 = arith.constant 0 : i32
    %c11_i32_368 = arith.constant 11 : i32
    %c11_i32_369 = arith.constant 11 : i32
    %c0_i32_370 = arith.constant 0 : i32
    %514 = tpu.memref_slice %arg2[%c0_i32_367, %c0_i32_370] : memref<1024x128xf32, #tpu.memory_space<any>> -> memref<1x128xf32, #tpu.memory_space<any>>
    %515 = tpu.memref_squeeze %514 : memref<1x128xf32, #tpu.memory_space<any>> -> memref<128xf32, #tpu.memory_space<any>>
    %c0_i32_371 = arith.constant 0 : i32
    %516 = tpu.memref_slice %arg4[%c11_i32_368, %c0_i32_371] : memref<64x128xf32, #tpu.memory_space<vmem>> -> memref<1x128xf32, #tpu.memory_space<vmem>>
    %517 = tpu.memref_squeeze %516 : memref<1x128xf32, #tpu.memory_space<vmem>> -> memref<128xf32, #tpu.memory_space<vmem>>
    %518 = tpu.memref_slice %arg5[%c11_i32_369] : memref<64x!tpu.dma_semaphore, #tpu.memory_space<semaphore_mem>> -> memref<1x!tpu.dma_semaphore, #tpu.memory_space<semaphore_mem>>
    %519 = tpu.memref_squeeze %518 : memref<1x!tpu.dma_semaphore, #tpu.memory_space<semaphore_mem>> -> memref<!tpu.dma_semaphore, #tpu.memory_space<semaphore_mem>>
    tpu.wait_dma2 semaphore(%519 : memref<!tpu.dma_semaphore, #tpu.memory_space<semaphore_mem>>) src(%515 : memref<128xf32, #tpu.memory_space<any>>) dst(%517 : memref<128xf32, #tpu.memory_space<vmem>>)
    %c0_i32_372 = arith.constant 0 : i32
    %c12_i32_373 = arith.constant 12 : i32
    %c12_i32_374 = arith.constant 12 : i32
    %c0_i32_375 = arith.constant 0 : i32
    %520 = tpu.memref_slice %arg2[%c0_i32_372, %c0_i32_375] : memref<1024x128xf32, #tpu.memory_space<any>> -> memref<1x128xf32, #tpu.memory_space<any>>
    %521 = tpu.memref_squeeze %520 : memref<1x128xf32, #tpu.memory_space<any>> -> memref<128xf32, #tpu.memory_space<any>>
    %c0_i32_376 = arith.constant 0 : i32
    %522 = tpu.memref_slice %arg4[%c12_i32_373, %c0_i32_376] : memref<64x128xf32, #tpu.memory_space<vmem>> -> memref<1x128xf32, #tpu.memory_space<vmem>>
    %523 = tpu.memref_squeeze %522 : memref<1x128xf32, #tpu.memory_space<vmem>> -> memref<128xf32, #tpu.memory_space<vmem>>
    %524 = tpu.memref_slice %arg5[%c12_i32_374] : memref<64x!tpu.dma_semaphore, #tpu.memory_space<semaphore_mem>> -> memref<1x!tpu.dma_semaphore, #tpu.memory_space<semaphore_mem>>
    %525 = tpu.memref_squeeze %524 : memref<1x!tpu.dma_semaphore, #tpu.memory_space<semaphore_mem>> -> memref<!tpu.dma_semaphore, #tpu.memory_space<semaphore_mem>>
    tpu.wait_dma2 semaphore(%525 : memref<!tpu.dma_semaphore, #tpu.memory_space<semaphore_mem>>) src(%521 : memref<128xf32, #tpu.memory_space<any>>) dst(%523 : memref<128xf32, #tpu.memory_space<vmem>>)
    %c0_i32_377 = arith.constant 0 : i32
    %c13_i32_378 = arith.constant 13 : i32
    %c13_i32_379 = arith.constant 13 : i32
    %c0_i32_380 = arith.constant 0 : i32
    %526 = tpu.memref_slice %arg2[%c0_i32_377, %c0_i32_380] : memref<1024x128xf32, #tpu.memory_space<any>> -> memref<1x128xf32, #tpu.memory_space<any>>
    %527 = tpu.memref_squeeze %526 : memref<1x128xf32, #tpu.memory_space<any>> -> memref<128xf32, #tpu.memory_space<any>>
    %c0_i32_381 = arith.constant 0 : i32
    %528 = tpu.memref_slice %arg4[%c13_i32_378, %c0_i32_381] : memref<64x128xf32, #tpu.memory_space<vmem>> -> memref<1x128xf32, #tpu.memory_space<vmem>>
    %529 = tpu.memref_squeeze %528 : memref<1x128xf32, #tpu.memory_space<vmem>> -> memref<128xf32, #tpu.memory_space<vmem>>
    %530 = tpu.memref_slice %arg5[%c13_i32_379] : memref<64x!tpu.dma_semaphore, #tpu.memory_space<semaphore_mem>> -> memref<1x!tpu.dma_semaphore, #tpu.memory_space<semaphore_mem>>
    %531 = tpu.memref_squeeze %530 : memref<1x!tpu.dma_semaphore, #tpu.memory_space<semaphore_mem>> -> memref<!tpu.dma_semaphore, #tpu.memory_space<semaphore_mem>>
    tpu.wait_dma2 semaphore(%531 : memref<!tpu.dma_semaphore, #tpu.memory_space<semaphore_mem>>) src(%527 : memref<128xf32, #tpu.memory_space<any>>) dst(%529 : memref<128xf32, #tpu.memory_space<vmem>>)
    %c0_i32_382 = arith.constant 0 : i32
    %c14_i32_383 = arith.constant 14 : i32
    %c14_i32_384 = arith.constant 14 : i32
    %c0_i32_385 = arith.constant 0 : i32
    %532 = tpu.memref_slice %arg2[%c0_i32_382, %c0_i32_385] : memref<1024x128xf32, #tpu.memory_space<any>> -> memref<1x128xf32, #tpu.memory_space<any>>
    %533 = tpu.memref_squeeze %532 : memref<1x128xf32, #tpu.memory_space<any>> -> memref<128xf32, #tpu.memory_space<any>>
    %c0_i32_386 = arith.constant 0 : i32
    %534 = tpu.memref_slice %arg4[%c14_i32_383, %c0_i32_386] : memref<64x128xf32, #tpu.memory_space<vmem>> -> memref<1x128xf32, #tpu.memory_space<vmem>>
    %535 = tpu.memref_squeeze %534 : memref<1x128xf32, #tpu.memory_space<vmem>> -> memref<128xf32, #tpu.memory_space<vmem>>
    %536 = tpu.memref_slice %arg5[%c14_i32_384] : memref<64x!tpu.dma_semaphore, #tpu.memory_space<semaphore_mem>> -> memref<1x!tpu.dma_semaphore, #tpu.memory_space<semaphore_mem>>
    %537 = tpu.memref_squeeze %536 : memref<1x!tpu.dma_semaphore, #tpu.memory_space<semaphore_mem>> -> memref<!tpu.dma_semaphore, #tpu.memory_space<semaphore_mem>>
    tpu.wait_dma2 semaphore(%537 : memref<!tpu.dma_semaphore, #tpu.memory_space<semaphore_mem>>) src(%533 : memref<128xf32, #tpu.memory_space<any>>) dst(%535 : memref<128xf32, #tpu.memory_space<vmem>>)
    %c0_i32_387 = arith.constant 0 : i32
    %c15_i32_388 = arith.constant 15 : i32
    %c15_i32_389 = arith.constant 15 : i32
    %c0_i32_390 = arith.constant 0 : i32
    %538 = tpu.memref_slice %arg2[%c0_i32_387, %c0_i32_390] : memref<1024x128xf32, #tpu.memory_space<any>> -> memref<1x128xf32, #tpu.memory_space<any>>
    %539 = tpu.memref_squeeze %538 : memref<1x128xf32, #tpu.memory_space<any>> -> memref<128xf32, #tpu.memory_space<any>>
    %c0_i32_391 = arith.constant 0 : i32
    %540 = tpu.memref_slice %arg4[%c15_i32_388, %c0_i32_391] : memref<64x128xf32, #tpu.memory_space<vmem>> -> memref<1x128xf32, #tpu.memory_space<vmem>>
    %541 = tpu.memref_squeeze %540 : memref<1x128xf32, #tpu.memory_space<vmem>> -> memref<128xf32, #tpu.memory_space<vmem>>
    %542 = tpu.memref_slice %arg5[%c15_i32_389] : memref<64x!tpu.dma_semaphore, #tpu.memory_space<semaphore_mem>> -> memref<1x!tpu.dma_semaphore, #tpu.memory_space<semaphore_mem>>
    %543 = tpu.memref_squeeze %542 : memref<1x!tpu.dma_semaphore, #tpu.memory_space<semaphore_mem>> -> memref<!tpu.dma_semaphore, #tpu.memory_space<semaphore_mem>>
    tpu.wait_dma2 semaphore(%543 : memref<!tpu.dma_semaphore, #tpu.memory_space<semaphore_mem>>) src(%539 : memref<128xf32, #tpu.memory_space<any>>) dst(%541 : memref<128xf32, #tpu.memory_space<vmem>>)
    %c0_i32_392 = arith.constant 0 : i32
    %c16_i32_393 = arith.constant 16 : i32
    %c16_i32_394 = arith.constant 16 : i32
    %c0_i32_395 = arith.constant 0 : i32
    %544 = tpu.memref_slice %arg2[%c0_i32_392, %c0_i32_395] : memref<1024x128xf32, #tpu.memory_space<any>> -> memref<1x128xf32, #tpu.memory_space<any>>
    %545 = tpu.memref_squeeze %544 : memref<1x128xf32, #tpu.memory_space<any>> -> memref<128xf32, #tpu.memory_space<any>>
    %c0_i32_396 = arith.constant 0 : i32
    %546 = tpu.memref_slice %arg4[%c16_i32_393, %c0_i32_396] : memref<64x128xf32, #tpu.memory_space<vmem>> -> memref<1x128xf32, #tpu.memory_space<vmem>>
    %547 = tpu.memref_squeeze %546 : memref<1x128xf32, #tpu.memory_space<vmem>> -> memref<128xf32, #tpu.memory_space<vmem>>
    %548 = tpu.memref_slice %arg5[%c16_i32_394] : memref<64x!tpu.dma_semaphore, #tpu.memory_space<semaphore_mem>> -> memref<1x!tpu.dma_semaphore, #tpu.memory_space<semaphore_mem>>
    %549 = tpu.memref_squeeze %548 : memref<1x!tpu.dma_semaphore, #tpu.memory_space<semaphore_mem>> -> memref<!tpu.dma_semaphore, #tpu.memory_space<semaphore_mem>>
    tpu.wait_dma2 semaphore(%549 : memref<!tpu.dma_semaphore, #tpu.memory_space<semaphore_mem>>) src(%545 : memref<128xf32, #tpu.memory_space<any>>) dst(%547 : memref<128xf32, #tpu.memory_space<vmem>>)
    %c0_i32_397 = arith.constant 0 : i32
    %c17_i32_398 = arith.constant 17 : i32
    %c17_i32_399 = arith.constant 17 : i32
    %c0_i32_400 = arith.constant 0 : i32
    %550 = tpu.memref_slice %arg2[%c0_i32_397, %c0_i32_400] : memref<1024x128xf32, #tpu.memory_space<any>> -> memref<1x128xf32, #tpu.memory_space<any>>
    %551 = tpu.memref_squeeze %550 : memref<1x128xf32, #tpu.memory_space<any>> -> memref<128xf32, #tpu.memory_space<any>>
    %c0_i32_401 = arith.constant 0 : i32
    %552 = tpu.memref_slice %arg4[%c17_i32_398, %c0_i32_401] : memref<64x128xf32, #tpu.memory_space<vmem>> -> memref<1x128xf32, #tpu.memory_space<vmem>>
    %553 = tpu.memref_squeeze %552 : memref<1x128xf32, #tpu.memory_space<vmem>> -> memref<128xf32, #tpu.memory_space<vmem>>
    %554 = tpu.memref_slice %arg5[%c17_i32_399] : memref<64x!tpu.dma_semaphore, #tpu.memory_space<semaphore_mem>> -> memref<1x!tpu.dma_semaphore, #tpu.memory_space<semaphore_mem>>
    %555 = tpu.memref_squeeze %554 : memref<1x!tpu.dma_semaphore, #tpu.memory_space<semaphore_mem>> -> memref<!tpu.dma_semaphore, #tpu.memory_space<semaphore_mem>>
    tpu.wait_dma2 semaphore(%555 : memref<!tpu.dma_semaphore, #tpu.memory_space<semaphore_mem>>) src(%551 : memref<128xf32, #tpu.memory_space<any>>) dst(%553 : memref<128xf32, #tpu.memory_space<vmem>>)
    %c0_i32_402 = arith.constant 0 : i32
    %c18_i32_403 = arith.constant 18 : i32
    %c18_i32_404 = arith.constant 18 : i32
    %c0_i32_405 = arith.constant 0 : i32
    %556 = tpu.memref_slice %arg2[%c0_i32_402, %c0_i32_405] : memref<1024x128xf32, #tpu.memory_space<any>> -> memref<1x128xf32, #tpu.memory_space<any>>
    %557 = tpu.memref_squeeze %556 : memref<1x128xf32, #tpu.memory_space<any>> -> memref<128xf32, #tpu.memory_space<any>>
    %c0_i32_406 = arith.constant 0 : i32
    %558 = tpu.memref_slice %arg4[%c18_i32_403, %c0_i32_406] : memref<64x128xf32, #tpu.memory_space<vmem>> -> memref<1x128xf32, #tpu.memory_space<vmem>>
    %559 = tpu.memref_squeeze %558 : memref<1x128xf32, #tpu.memory_space<vmem>> -> memref<128xf32, #tpu.memory_space<vmem>>
    %560 = tpu.memref_slice %arg5[%c18_i32_404] : memref<64x!tpu.dma_semaphore, #tpu.memory_space<semaphore_mem>> -> memref<1x!tpu.dma_semaphore, #tpu.memory_space<semaphore_mem>>
    %561 = tpu.memref_squeeze %560 : memref<1x!tpu.dma_semaphore, #tpu.memory_space<semaphore_mem>> -> memref<!tpu.dma_semaphore, #tpu.memory_space<semaphore_mem>>
    tpu.wait_dma2 semaphore(%561 : memref<!tpu.dma_semaphore, #tpu.memory_space<semaphore_mem>>) src(%557 : memref<128xf32, #tpu.memory_space<any>>) dst(%559 : memref<128xf32, #tpu.memory_space<vmem>>)
    %c0_i32_407 = arith.constant 0 : i32
    %c19_i32_408 = arith.constant 19 : i32
    %c19_i32_409 = arith.constant 19 : i32
    %c0_i32_410 = arith.constant 0 : i32
    %562 = tpu.memref_slice %arg2[%c0_i32_407, %c0_i32_410] : memref<1024x128xf32, #tpu.memory_space<any>> -> memref<1x128xf32, #tpu.memory_space<any>>
    %563 = tpu.memref_squeeze %562 : memref<1x128xf32, #tpu.memory_space<any>> -> memref<128xf32, #tpu.memory_space<any>>
    %c0_i32_411 = arith.constant 0 : i32
    %564 = tpu.memref_slice %arg4[%c19_i32_408, %c0_i32_411] : memref<64x128xf32, #tpu.memory_space<vmem>> -> memref<1x128xf32, #tpu.memory_space<vmem>>
    %565 = tpu.memref_squeeze %564 : memref<1x128xf32, #tpu.memory_space<vmem>> -> memref<128xf32, #tpu.memory_space<vmem>>
    %566 = tpu.memref_slice %arg5[%c19_i32_409] : memref<64x!tpu.dma_semaphore, #tpu.memory_space<semaphore_mem>> -> memref<1x!tpu.dma_semaphore, #tpu.memory_space<semaphore_mem>>
    %567 = tpu.memref_squeeze %566 : memref<1x!tpu.dma_semaphore, #tpu.memory_space<semaphore_mem>> -> memref<!tpu.dma_semaphore, #tpu.memory_space<semaphore_mem>>
    tpu.wait_dma2 semaphore(%567 : memref<!tpu.dma_semaphore, #tpu.memory_space<semaphore_mem>>) src(%563 : memref<128xf32, #tpu.memory_space<any>>) dst(%565 : memref<128xf32, #tpu.memory_space<vmem>>)
    %c0_i32_412 = arith.constant 0 : i32
    %c20_i32_413 = arith.constant 20 : i32
    %c20_i32_414 = arith.constant 20 : i32
    %c0_i32_415 = arith.constant 0 : i32
    %568 = tpu.memref_slice %arg2[%c0_i32_412, %c0_i32_415] : memref<1024x128xf32, #tpu.memory_space<any>> -> memref<1x128xf32, #tpu.memory_space<any>>
    %569 = tpu.memref_squeeze %568 : memref<1x128xf32, #tpu.memory_space<any>> -> memref<128xf32, #tpu.memory_space<any>>
    %c0_i32_416 = arith.constant 0 : i32
    %570 = tpu.memref_slice %arg4[%c20_i32_413, %c0_i32_416] : memref<64x128xf32, #tpu.memory_space<vmem>> -> memref<1x128xf32, #tpu.memory_space<vmem>>
    %571 = tpu.memref_squeeze %570 : memref<1x128xf32, #tpu.memory_space<vmem>> -> memref<128xf32, #tpu.memory_space<vmem>>
    %572 = tpu.memref_slice %arg5[%c20_i32_414] : memref<64x!tpu.dma_semaphore, #tpu.memory_space<semaphore_mem>> -> memref<1x!tpu.dma_semaphore, #tpu.memory_space<semaphore_mem>>
    %573 = tpu.memref_squeeze %572 : memref<1x!tpu.dma_semaphore, #tpu.memory_space<semaphore_mem>> -> memref<!tpu.dma_semaphore, #tpu.memory_space<semaphore_mem>>
    tpu.wait_dma2 semaphore(%573 : memref<!tpu.dma_semaphore, #tpu.memory_space<semaphore_mem>>) src(%569 : memref<128xf32, #tpu.memory_space<any>>) dst(%571 : memref<128xf32, #tpu.memory_space<vmem>>)
    %c0_i32_417 = arith.constant 0 : i32
    %c21_i32_418 = arith.constant 21 : i32
    %c21_i32_419 = arith.constant 21 : i32
    %c0_i32_420 = arith.constant 0 : i32
    %574 = tpu.memref_slice %arg2[%c0_i32_417, %c0_i32_420] : memref<1024x128xf32, #tpu.memory_space<any>> -> memref<1x128xf32, #tpu.memory_space<any>>
    %575 = tpu.memref_squeeze %574 : memref<1x128xf32, #tpu.memory_space<any>> -> memref<128xf32, #tpu.memory_space<any>>
    %c0_i32_421 = arith.constant 0 : i32
    %576 = tpu.memref_slice %arg4[%c21_i32_418, %c0_i32_421] : memref<64x128xf32, #tpu.memory_space<vmem>> -> memref<1x128xf32, #tpu.memory_space<vmem>>
    %577 = tpu.memref_squeeze %576 : memref<1x128xf32, #tpu.memory_space<vmem>> -> memref<128xf32, #tpu.memory_space<vmem>>
    %578 = tpu.memref_slice %arg5[%c21_i32_419] : memref<64x!tpu.dma_semaphore, #tpu.memory_space<semaphore_mem>> -> memref<1x!tpu.dma_semaphore, #tpu.memory_space<semaphore_mem>>
    %579 = tpu.memref_squeeze %578 : memref<1x!tpu.dma_semaphore, #tpu.memory_space<semaphore_mem>> -> memref<!tpu.dma_semaphore, #tpu.memory_space<semaphore_mem>>
    tpu.wait_dma2 semaphore(%579 : memref<!tpu.dma_semaphore, #tpu.memory_space<semaphore_mem>>) src(%575 : memref<128xf32, #tpu.memory_space<any>>) dst(%577 : memref<128xf32, #tpu.memory_space<vmem>>)
    %c0_i32_422 = arith.constant 0 : i32
    %c22_i32_423 = arith.constant 22 : i32
    %c22_i32_424 = arith.constant 22 : i32
    %c0_i32_425 = arith.constant 0 : i32
    %580 = tpu.memref_slice %arg2[%c0_i32_422, %c0_i32_425] : memref<1024x128xf32, #tpu.memory_space<any>> -> memref<1x128xf32, #tpu.memory_space<any>>
    %581 = tpu.memref_squeeze %580 : memref<1x128xf32, #tpu.memory_space<any>> -> memref<128xf32, #tpu.memory_space<any>>
    %c0_i32_426 = arith.constant 0 : i32
    %582 = tpu.memref_slice %arg4[%c22_i32_423, %c0_i32_426] : memref<64x128xf32, #tpu.memory_space<vmem>> -> memref<1x128xf32, #tpu.memory_space<vmem>>
    %583 = tpu.memref_squeeze %582 : memref<1x128xf32, #tpu.memory_space<vmem>> -> memref<128xf32, #tpu.memory_space<vmem>>
    %584 = tpu.memref_slice %arg5[%c22_i32_424] : memref<64x!tpu.dma_semaphore, #tpu.memory_space<semaphore_mem>> -> memref<1x!tpu.dma_semaphore, #tpu.memory_space<semaphore_mem>>
    %585 = tpu.memref_squeeze %584 : memref<1x!tpu.dma_semaphore, #tpu.memory_space<semaphore_mem>> -> memref<!tpu.dma_semaphore, #tpu.memory_space<semaphore_mem>>
    tpu.wait_dma2 semaphore(%585 : memref<!tpu.dma_semaphore, #tpu.memory_space<semaphore_mem>>) src(%581 : memref<128xf32, #tpu.memory_space<any>>) dst(%583 : memref<128xf32, #tpu.memory_space<vmem>>)
    %c0_i32_427 = arith.constant 0 : i32
    %c23_i32_428 = arith.constant 23 : i32
    %c23_i32_429 = arith.constant 23 : i32
    %c0_i32_430 = arith.constant 0 : i32
    %586 = tpu.memref_slice %arg2[%c0_i32_427, %c0_i32_430] : memref<1024x128xf32, #tpu.memory_space<any>> -> memref<1x128xf32, #tpu.memory_space<any>>
    %587 = tpu.memref_squeeze %586 : memref<1x128xf32, #tpu.memory_space<any>> -> memref<128xf32, #tpu.memory_space<any>>
    %c0_i32_431 = arith.constant 0 : i32
    %588 = tpu.memref_slice %arg4[%c23_i32_428, %c0_i32_431] : memref<64x128xf32, #tpu.memory_space<vmem>> -> memref<1x128xf32, #tpu.memory_space<vmem>>
    %589 = tpu.memref_squeeze %588 : memref<1x128xf32, #tpu.memory_space<vmem>> -> memref<128xf32, #tpu.memory_space<vmem>>
    %590 = tpu.memref_slice %arg5[%c23_i32_429] : memref<64x!tpu.dma_semaphore, #tpu.memory_space<semaphore_mem>> -> memref<1x!tpu.dma_semaphore, #tpu.memory_space<semaphore_mem>>
    %591 = tpu.memref_squeeze %590 : memref<1x!tpu.dma_semaphore, #tpu.memory_space<semaphore_mem>> -> memref<!tpu.dma_semaphore, #tpu.memory_space<semaphore_mem>>
    tpu.wait_dma2 semaphore(%591 : memref<!tpu.dma_semaphore, #tpu.memory_space<semaphore_mem>>) src(%587 : memref<128xf32, #tpu.memory_space<any>>) dst(%589 : memref<128xf32, #tpu.memory_space<vmem>>)
    %c0_i32_432 = arith.constant 0 : i32
    %c24_i32_433 = arith.constant 24 : i32
    %c24_i32_434 = arith.constant 24 : i32
    %c0_i32_435 = arith.constant 0 : i32
    %592 = tpu.memref_slice %arg2[%c0_i32_432, %c0_i32_435] : memref<1024x128xf32, #tpu.memory_space<any>> -> memref<1x128xf32, #tpu.memory_space<any>>
    %593 = tpu.memref_squeeze %592 : memref<1x128xf32, #tpu.memory_space<any>> -> memref<128xf32, #tpu.memory_space<any>>
    %c0_i32_436 = arith.constant 0 : i32
    %594 = tpu.memref_slice %arg4[%c24_i32_433, %c0_i32_436] : memref<64x128xf32, #tpu.memory_space<vmem>> -> memref<1x128xf32, #tpu.memory_space<vmem>>
    %595 = tpu.memref_squeeze %594 : memref<1x128xf32, #tpu.memory_space<vmem>> -> memref<128xf32, #tpu.memory_space<vmem>>
    %596 = tpu.memref_slice %arg5[%c24_i32_434] : memref<64x!tpu.dma_semaphore, #tpu.memory_space<semaphore_mem>> -> memref<1x!tpu.dma_semaphore, #tpu.memory_space<semaphore_mem>>
    %597 = tpu.memref_squeeze %596 : memref<1x!tpu.dma_semaphore, #tpu.memory_space<semaphore_mem>> -> memref<!tpu.dma_semaphore, #tpu.memory_space<semaphore_mem>>
    tpu.wait_dma2 semaphore(%597 : memref<!tpu.dma_semaphore, #tpu.memory_space<semaphore_mem>>) src(%593 : memref<128xf32, #tpu.memory_space<any>>) dst(%595 : memref<128xf32, #tpu.memory_space<vmem>>)
    %c0_i32_437 = arith.constant 0 : i32
    %c25_i32_438 = arith.constant 25 : i32
    %c25_i32_439 = arith.constant 25 : i32
    %c0_i32_440 = arith.constant 0 : i32
    %598 = tpu.memref_slice %arg2[%c0_i32_437, %c0_i32_440] : memref<1024x128xf32, #tpu.memory_space<any>> -> memref<1x128xf32, #tpu.memory_space<any>>
    %599 = tpu.memref_squeeze %598 : memref<1x128xf32, #tpu.memory_space<any>> -> memref<128xf32, #tpu.memory_space<any>>
    %c0_i32_441 = arith.constant 0 : i32
    %600 = tpu.memref_slice %arg4[%c25_i32_438, %c0_i32_441] : memref<64x128xf32, #tpu.memory_space<vmem>> -> memref<1x128xf32, #tpu.memory_space<vmem>>
    %601 = tpu.memref_squeeze %600 : memref<1x128xf32, #tpu.memory_space<vmem>> -> memref<128xf32, #tpu.memory_space<vmem>>
    %602 = tpu.memref_slice %arg5[%c25_i32_439] : memref<64x!tpu.dma_semaphore, #tpu.memory_space<semaphore_mem>> -> memref<1x!tpu.dma_semaphore, #tpu.memory_space<semaphore_mem>>
    %603 = tpu.memref_squeeze %602 : memref<1x!tpu.dma_semaphore, #tpu.memory_space<semaphore_mem>> -> memref<!tpu.dma_semaphore, #tpu.memory_space<semaphore_mem>>
    tpu.wait_dma2 semaphore(%603 : memref<!tpu.dma_semaphore, #tpu.memory_space<semaphore_mem>>) src(%599 : memref<128xf32, #tpu.memory_space<any>>) dst(%601 : memref<128xf32, #tpu.memory_space<vmem>>)
    %c0_i32_442 = arith.constant 0 : i32
    %c26_i32_443 = arith.constant 26 : i32
    %c26_i32_444 = arith.constant 26 : i32
    %c0_i32_445 = arith.constant 0 : i32
    %604 = tpu.memref_slice %arg2[%c0_i32_442, %c0_i32_445] : memref<1024x128xf32, #tpu.memory_space<any>> -> memref<1x128xf32, #tpu.memory_space<any>>
    %605 = tpu.memref_squeeze %604 : memref<1x128xf32, #tpu.memory_space<any>> -> memref<128xf32, #tpu.memory_space<any>>
    %c0_i32_446 = arith.constant 0 : i32
    %606 = tpu.memref_slice %arg4[%c26_i32_443, %c0_i32_446] : memref<64x128xf32, #tpu.memory_space<vmem>> -> memref<1x128xf32, #tpu.memory_space<vmem>>
    %607 = tpu.memref_squeeze %606 : memref<1x128xf32, #tpu.memory_space<vmem>> -> memref<128xf32, #tpu.memory_space<vmem>>
    %608 = tpu.memref_slice %arg5[%c26_i32_444] : memref<64x!tpu.dma_semaphore, #tpu.memory_space<semaphore_mem>> -> memref<1x!tpu.dma_semaphore, #tpu.memory_space<semaphore_mem>>
    %609 = tpu.memref_squeeze %608 : memref<1x!tpu.dma_semaphore, #tpu.memory_space<semaphore_mem>> -> memref<!tpu.dma_semaphore, #tpu.memory_space<semaphore_mem>>
    tpu.wait_dma2 semaphore(%609 : memref<!tpu.dma_semaphore, #tpu.memory_space<semaphore_mem>>) src(%605 : memref<128xf32, #tpu.memory_space<any>>) dst(%607 : memref<128xf32, #tpu.memory_space<vmem>>)
    %c0_i32_447 = arith.constant 0 : i32
    %c27_i32_448 = arith.constant 27 : i32
    %c27_i32_449 = arith.constant 27 : i32
    %c0_i32_450 = arith.constant 0 : i32
    %610 = tpu.memref_slice %arg2[%c0_i32_447, %c0_i32_450] : memref<1024x128xf32, #tpu.memory_space<any>> -> memref<1x128xf32, #tpu.memory_space<any>>
    %611 = tpu.memref_squeeze %610 : memref<1x128xf32, #tpu.memory_space<any>> -> memref<128xf32, #tpu.memory_space<any>>
    %c0_i32_451 = arith.constant 0 : i32
    %612 = tpu.memref_slice %arg4[%c27_i32_448, %c0_i32_451] : memref<64x128xf32, #tpu.memory_space<vmem>> -> memref<1x128xf32, #tpu.memory_space<vmem>>
    %613 = tpu.memref_squeeze %612 : memref<1x128xf32, #tpu.memory_space<vmem>> -> memref<128xf32, #tpu.memory_space<vmem>>
    %614 = tpu.memref_slice %arg5[%c27_i32_449] : memref<64x!tpu.dma_semaphore, #tpu.memory_space<semaphore_mem>> -> memref<1x!tpu.dma_semaphore, #tpu.memory_space<semaphore_mem>>
    %615 = tpu.memref_squeeze %614 : memref<1x!tpu.dma_semaphore, #tpu.memory_space<semaphore_mem>> -> memref<!tpu.dma_semaphore, #tpu.memory_space<semaphore_mem>>
    tpu.wait_dma2 semaphore(%615 : memref<!tpu.dma_semaphore, #tpu.memory_space<semaphore_mem>>) src(%611 : memref<128xf32, #tpu.memory_space<any>>) dst(%613 : memref<128xf32, #tpu.memory_space<vmem>>)
    %c0_i32_452 = arith.constant 0 : i32
    %c28_i32_453 = arith.constant 28 : i32
    %c28_i32_454 = arith.constant 28 : i32
    %c0_i32_455 = arith.constant 0 : i32
    %616 = tpu.memref_slice %arg2[%c0_i32_452, %c0_i32_455] : memref<1024x128xf32, #tpu.memory_space<any>> -> memref<1x128xf32, #tpu.memory_space<any>>
    %617 = tpu.memref_squeeze %616 : memref<1x128xf32, #tpu.memory_space<any>> -> memref<128xf32, #tpu.memory_space<any>>
    %c0_i32_456 = arith.constant 0 : i32
    %618 = tpu.memref_slice %arg4[%c28_i32_453, %c0_i32_456] : memref<64x128xf32, #tpu.memory_space<vmem>> -> memref<1x128xf32, #tpu.memory_space<vmem>>
    %619 = tpu.memref_squeeze %618 : memref<1x128xf32, #tpu.memory_space<vmem>> -> memref<128xf32, #tpu.memory_space<vmem>>
    %620 = tpu.memref_slice %arg5[%c28_i32_454] : memref<64x!tpu.dma_semaphore, #tpu.memory_space<semaphore_mem>> -> memref<1x!tpu.dma_semaphore, #tpu.memory_space<semaphore_mem>>
    %621 = tpu.memref_squeeze %620 : memref<1x!tpu.dma_semaphore, #tpu.memory_space<semaphore_mem>> -> memref<!tpu.dma_semaphore, #tpu.memory_space<semaphore_mem>>
    tpu.wait_dma2 semaphore(%621 : memref<!tpu.dma_semaphore, #tpu.memory_space<semaphore_mem>>) src(%617 : memref<128xf32, #tpu.memory_space<any>>) dst(%619 : memref<128xf32, #tpu.memory_space<vmem>>)
    %c0_i32_457 = arith.constant 0 : i32
    %c29_i32_458 = arith.constant 29 : i32
    %c29_i32_459 = arith.constant 29 : i32
    %c0_i32_460 = arith.constant 0 : i32
    %622 = tpu.memref_slice %arg2[%c0_i32_457, %c0_i32_460] : memref<1024x128xf32, #tpu.memory_space<any>> -> memref<1x128xf32, #tpu.memory_space<any>>
    %623 = tpu.memref_squeeze %622 : memref<1x128xf32, #tpu.memory_space<any>> -> memref<128xf32, #tpu.memory_space<any>>
    %c0_i32_461 = arith.constant 0 : i32
    %624 = tpu.memref_slice %arg4[%c29_i32_458, %c0_i32_461] : memref<64x128xf32, #tpu.memory_space<vmem>> -> memref<1x128xf32, #tpu.memory_space<vmem>>
    %625 = tpu.memref_squeeze %624 : memref<1x128xf32, #tpu.memory_space<vmem>> -> memref<128xf32, #tpu.memory_space<vmem>>
    %626 = tpu.memref_slice %arg5[%c29_i32_459] : memref<64x!tpu.dma_semaphore, #tpu.memory_space<semaphore_mem>> -> memref<1x!tpu.dma_semaphore, #tpu.memory_space<semaphore_mem>>
    %627 = tpu.memref_squeeze %626 : memref<1x!tpu.dma_semaphore, #tpu.memory_space<semaphore_mem>> -> memref<!tpu.dma_semaphore, #tpu.memory_space<semaphore_mem>>
    tpu.wait_dma2 semaphore(%627 : memref<!tpu.dma_semaphore, #tpu.memory_space<semaphore_mem>>) src(%623 : memref<128xf32, #tpu.memory_space<any>>) dst(%625 : memref<128xf32, #tpu.memory_space<vmem>>)
    %c0_i32_462 = arith.constant 0 : i32
    %c30_i32_463 = arith.constant 30 : i32
    %c30_i32_464 = arith.constant 30 : i32
    %c0_i32_465 = arith.constant 0 : i32
    %628 = tpu.memref_slice %arg2[%c0_i32_462, %c0_i32_465] : memref<1024x128xf32, #tpu.memory_space<any>> -> memref<1x128xf32, #tpu.memory_space<any>>
    %629 = tpu.memref_squeeze %628 : memref<1x128xf32, #tpu.memory_space<any>> -> memref<128xf32, #tpu.memory_space<any>>
    %c0_i32_466 = arith.constant 0 : i32
    %630 = tpu.memref_slice %arg4[%c30_i32_463, %c0_i32_466] : memref<64x128xf32, #tpu.memory_space<vmem>> -> memref<1x128xf32, #tpu.memory_space<vmem>>
    %631 = tpu.memref_squeeze %630 : memref<1x128xf32, #tpu.memory_space<vmem>> -> memref<128xf32, #tpu.memory_space<vmem>>
    %632 = tpu.memref_slice %arg5[%c30_i32_464] : memref<64x!tpu.dma_semaphore, #tpu.memory_space<semaphore_mem>> -> memref<1x!tpu.dma_semaphore, #tpu.memory_space<semaphore_mem>>
    %633 = tpu.memref_squeeze %632 : memref<1x!tpu.dma_semaphore, #tpu.memory_space<semaphore_mem>> -> memref<!tpu.dma_semaphore, #tpu.memory_space<semaphore_mem>>
    tpu.wait_dma2 semaphore(%633 : memref<!tpu.dma_semaphore, #tpu.memory_space<semaphore_mem>>) src(%629 : memref<128xf32, #tpu.memory_space<any>>) dst(%631 : memref<128xf32, #tpu.memory_space<vmem>>)
    %c0_i32_467 = arith.constant 0 : i32
    %c31_i32_468 = arith.constant 31 : i32
    %c31_i32_469 = arith.constant 31 : i32
    %c0_i32_470 = arith.constant 0 : i32
    %634 = tpu.memref_slice %arg2[%c0_i32_467, %c0_i32_470] : memref<1024x128xf32, #tpu.memory_space<any>> -> memref<1x128xf32, #tpu.memory_space<any>>
    %635 = tpu.memref_squeeze %634 : memref<1x128xf32, #tpu.memory_space<any>> -> memref<128xf32, #tpu.memory_space<any>>
    %c0_i32_471 = arith.constant 0 : i32
    %636 = tpu.memref_slice %arg4[%c31_i32_468, %c0_i32_471] : memref<64x128xf32, #tpu.memory_space<vmem>> -> memref<1x128xf32, #tpu.memory_space<vmem>>
    %637 = tpu.memref_squeeze %636 : memref<1x128xf32, #tpu.memory_space<vmem>> -> memref<128xf32, #tpu.memory_space<vmem>>
    %638 = tpu.memref_slice %arg5[%c31_i32_469] : memref<64x!tpu.dma_semaphore, #tpu.memory_space<semaphore_mem>> -> memref<1x!tpu.dma_semaphore, #tpu.memory_space<semaphore_mem>>
    %639 = tpu.memref_squeeze %638 : memref<1x!tpu.dma_semaphore, #tpu.memory_space<semaphore_mem>> -> memref<!tpu.dma_semaphore, #tpu.memory_space<semaphore_mem>>
    tpu.wait_dma2 semaphore(%639 : memref<!tpu.dma_semaphore, #tpu.memory_space<semaphore_mem>>) src(%635 : memref<128xf32, #tpu.memory_space<any>>) dst(%637 : memref<128xf32, #tpu.memory_space<vmem>>)
    %c0_i32_472 = arith.constant 0 : i32
    %c32_i32_473 = arith.constant 32 : i32
    %c32_i32_474 = arith.constant 32 : i32
    %c0_i32_475 = arith.constant 0 : i32
    %640 = tpu.memref_slice %arg2[%c0_i32_472, %c0_i32_475] : memref<1024x128xf32, #tpu.memory_space<any>> -> memref<1x128xf32, #tpu.memory_space<any>>
    %641 = tpu.memref_squeeze %640 : memref<1x128xf32, #tpu.memory_space<any>> -> memref<128xf32, #tpu.memory_space<any>>
    %c0_i32_476 = arith.constant 0 : i32
    %642 = tpu.memref_slice %arg4[%c32_i32_473, %c0_i32_476] : memref<64x128xf32, #tpu.memory_space<vmem>> -> memref<1x128xf32, #tpu.memory_space<vmem>>
    %643 = tpu.memref_squeeze %642 : memref<1x128xf32, #tpu.memory_space<vmem>> -> memref<128xf32, #tpu.memory_space<vmem>>
    %644 = tpu.memref_slice %arg5[%c32_i32_474] : memref<64x!tpu.dma_semaphore, #tpu.memory_space<semaphore_mem>> -> memref<1x!tpu.dma_semaphore, #tpu.memory_space<semaphore_mem>>
    %645 = tpu.memref_squeeze %644 : memref<1x!tpu.dma_semaphore, #tpu.memory_space<semaphore_mem>> -> memref<!tpu.dma_semaphore, #tpu.memory_space<semaphore_mem>>
    tpu.wait_dma2 semaphore(%645 : memref<!tpu.dma_semaphore, #tpu.memory_space<semaphore_mem>>) src(%641 : memref<128xf32, #tpu.memory_space<any>>) dst(%643 : memref<128xf32, #tpu.memory_space<vmem>>)
    %c0_i32_477 = arith.constant 0 : i32
    %c33_i32_478 = arith.constant 33 : i32
    %c33_i32_479 = arith.constant 33 : i32
    %c0_i32_480 = arith.constant 0 : i32
    %646 = tpu.memref_slice %arg2[%c0_i32_477, %c0_i32_480] : memref<1024x128xf32, #tpu.memory_space<any>> -> memref<1x128xf32, #tpu.memory_space<any>>
    %647 = tpu.memref_squeeze %646 : memref<1x128xf32, #tpu.memory_space<any>> -> memref<128xf32, #tpu.memory_space<any>>
    %c0_i32_481 = arith.constant 0 : i32
    %648 = tpu.memref_slice %arg4[%c33_i32_478, %c0_i32_481] : memref<64x128xf32, #tpu.memory_space<vmem>> -> memref<1x128xf32, #tpu.memory_space<vmem>>
    %649 = tpu.memref_squeeze %648 : memref<1x128xf32, #tpu.memory_space<vmem>> -> memref<128xf32, #tpu.memory_space<vmem>>
    %650 = tpu.memref_slice %arg5[%c33_i32_479] : memref<64x!tpu.dma_semaphore, #tpu.memory_space<semaphore_mem>> -> memref<1x!tpu.dma_semaphore, #tpu.memory_space<semaphore_mem>>
    %651 = tpu.memref_squeeze %650 : memref<1x!tpu.dma_semaphore, #tpu.memory_space<semaphore_mem>> -> memref<!tpu.dma_semaphore, #tpu.memory_space<semaphore_mem>>
    tpu.wait_dma2 semaphore(%651 : memref<!tpu.dma_semaphore, #tpu.memory_space<semaphore_mem>>) src(%647 : memref<128xf32, #tpu.memory_space<any>>) dst(%649 : memref<128xf32, #tpu.memory_space<vmem>>)
    %c0_i32_482 = arith.constant 0 : i32
    %c34_i32_483 = arith.constant 34 : i32
    %c34_i32_484 = arith.constant 34 : i32
    %c0_i32_485 = arith.constant 0 : i32
    %652 = tpu.memref_slice %arg2[%c0_i32_482, %c0_i32_485] : memref<1024x128xf32, #tpu.memory_space<any>> -> memref<1x128xf32, #tpu.memory_space<any>>
    %653 = tpu.memref_squeeze %652 : memref<1x128xf32, #tpu.memory_space<any>> -> memref<128xf32, #tpu.memory_space<any>>
    %c0_i32_486 = arith.constant 0 : i32
    %654 = tpu.memref_slice %arg4[%c34_i32_483, %c0_i32_486] : memref<64x128xf32, #tpu.memory_space<vmem>> -> memref<1x128xf32, #tpu.memory_space<vmem>>
    %655 = tpu.memref_squeeze %654 : memref<1x128xf32, #tpu.memory_space<vmem>> -> memref<128xf32, #tpu.memory_space<vmem>>
    %656 = tpu.memref_slice %arg5[%c34_i32_484] : memref<64x!tpu.dma_semaphore, #tpu.memory_space<semaphore_mem>> -> memref<1x!tpu.dma_semaphore, #tpu.memory_space<semaphore_mem>>
    %657 = tpu.memref_squeeze %656 : memref<1x!tpu.dma_semaphore, #tpu.memory_space<semaphore_mem>> -> memref<!tpu.dma_semaphore, #tpu.memory_space<semaphore_mem>>
    tpu.wait_dma2 semaphore(%657 : memref<!tpu.dma_semaphore, #tpu.memory_space<semaphore_mem>>) src(%653 : memref<128xf32, #tpu.memory_space<any>>) dst(%655 : memref<128xf32, #tpu.memory_space<vmem>>)
    %c0_i32_487 = arith.constant 0 : i32
    %c35_i32_488 = arith.constant 35 : i32
    %c35_i32_489 = arith.constant 35 : i32
    %c0_i32_490 = arith.constant 0 : i32
    %658 = tpu.memref_slice %arg2[%c0_i32_487, %c0_i32_490] : memref<1024x128xf32, #tpu.memory_space<any>> -> memref<1x128xf32, #tpu.memory_space<any>>
    %659 = tpu.memref_squeeze %658 : memref<1x128xf32, #tpu.memory_space<any>> -> memref<128xf32, #tpu.memory_space<any>>
    %c0_i32_491 = arith.constant 0 : i32
    %660 = tpu.memref_slice %arg4[%c35_i32_488, %c0_i32_491] : memref<64x128xf32, #tpu.memory_space<vmem>> -> memref<1x128xf32, #tpu.memory_space<vmem>>
    %661 = tpu.memref_squeeze %660 : memref<1x128xf32, #tpu.memory_space<vmem>> -> memref<128xf32, #tpu.memory_space<vmem>>
    %662 = tpu.memref_slice %arg5[%c35_i32_489] : memref<64x!tpu.dma_semaphore, #tpu.memory_space<semaphore_mem>> -> memref<1x!tpu.dma_semaphore, #tpu.memory_space<semaphore_mem>>
    %663 = tpu.memref_squeeze %662 : memref<1x!tpu.dma_semaphore, #tpu.memory_space<semaphore_mem>> -> memref<!tpu.dma_semaphore, #tpu.memory_space<semaphore_mem>>
    tpu.wait_dma2 semaphore(%663 : memref<!tpu.dma_semaphore, #tpu.memory_space<semaphore_mem>>) src(%659 : memref<128xf32, #tpu.memory_space<any>>) dst(%661 : memref<128xf32, #tpu.memory_space<vmem>>)
    %c0_i32_492 = arith.constant 0 : i32
    %c36_i32_493 = arith.constant 36 : i32
    %c36_i32_494 = arith.constant 36 : i32
    %c0_i32_495 = arith.constant 0 : i32
    %664 = tpu.memref_slice %arg2[%c0_i32_492, %c0_i32_495] : memref<1024x128xf32, #tpu.memory_space<any>> -> memref<1x128xf32, #tpu.memory_space<any>>
    %665 = tpu.memref_squeeze %664 : memref<1x128xf32, #tpu.memory_space<any>> -> memref<128xf32, #tpu.memory_space<any>>
    %c0_i32_496 = arith.constant 0 : i32
    %666 = tpu.memref_slice %arg4[%c36_i32_493, %c0_i32_496] : memref<64x128xf32, #tpu.memory_space<vmem>> -> memref<1x128xf32, #tpu.memory_space<vmem>>
    %667 = tpu.memref_squeeze %666 : memref<1x128xf32, #tpu.memory_space<vmem>> -> memref<128xf32, #tpu.memory_space<vmem>>
    %668 = tpu.memref_slice %arg5[%c36_i32_494] : memref<64x!tpu.dma_semaphore, #tpu.memory_space<semaphore_mem>> -> memref<1x!tpu.dma_semaphore, #tpu.memory_space<semaphore_mem>>
    %669 = tpu.memref_squeeze %668 : memref<1x!tpu.dma_semaphore, #tpu.memory_space<semaphore_mem>> -> memref<!tpu.dma_semaphore, #tpu.memory_space<semaphore_mem>>
    tpu.wait_dma2 semaphore(%669 : memref<!tpu.dma_semaphore, #tpu.memory_space<semaphore_mem>>) src(%665 : memref<128xf32, #tpu.memory_space<any>>) dst(%667 : memref<128xf32, #tpu.memory_space<vmem>>)
    %c0_i32_497 = arith.constant 0 : i32
    %c37_i32_498 = arith.constant 37 : i32
    %c37_i32_499 = arith.constant 37 : i32
    %c0_i32_500 = arith.constant 0 : i32
    %670 = tpu.memref_slice %arg2[%c0_i32_497, %c0_i32_500] : memref<1024x128xf32, #tpu.memory_space<any>> -> memref<1x128xf32, #tpu.memory_space<any>>
    %671 = tpu.memref_squeeze %670 : memref<1x128xf32, #tpu.memory_space<any>> -> memref<128xf32, #tpu.memory_space<any>>
    %c0_i32_501 = arith.constant 0 : i32
    %672 = tpu.memref_slice %arg4[%c37_i32_498, %c0_i32_501] : memref<64x128xf32, #tpu.memory_space<vmem>> -> memref<1x128xf32, #tpu.memory_space<vmem>>
    %673 = tpu.memref_squeeze %672 : memref<1x128xf32, #tpu.memory_space<vmem>> -> memref<128xf32, #tpu.memory_space<vmem>>
    %674 = tpu.memref_slice %arg5[%c37_i32_499] : memref<64x!tpu.dma_semaphore, #tpu.memory_space<semaphore_mem>> -> memref<1x!tpu.dma_semaphore, #tpu.memory_space<semaphore_mem>>
    %675 = tpu.memref_squeeze %674 : memref<1x!tpu.dma_semaphore, #tpu.memory_space<semaphore_mem>> -> memref<!tpu.dma_semaphore, #tpu.memory_space<semaphore_mem>>
    tpu.wait_dma2 semaphore(%675 : memref<!tpu.dma_semaphore, #tpu.memory_space<semaphore_mem>>) src(%671 : memref<128xf32, #tpu.memory_space<any>>) dst(%673 : memref<128xf32, #tpu.memory_space<vmem>>)
    %c0_i32_502 = arith.constant 0 : i32
    %c38_i32_503 = arith.constant 38 : i32
    %c38_i32_504 = arith.constant 38 : i32
    %c0_i32_505 = arith.constant 0 : i32
    %676 = tpu.memref_slice %arg2[%c0_i32_502, %c0_i32_505] : memref<1024x128xf32, #tpu.memory_space<any>> -> memref<1x128xf32, #tpu.memory_space<any>>
    %677 = tpu.memref_squeeze %676 : memref<1x128xf32, #tpu.memory_space<any>> -> memref<128xf32, #tpu.memory_space<any>>
    %c0_i32_506 = arith.constant 0 : i32
    %678 = tpu.memref_slice %arg4[%c38_i32_503, %c0_i32_506] : memref<64x128xf32, #tpu.memory_space<vmem>> -> memref<1x128xf32, #tpu.memory_space<vmem>>
    %679 = tpu.memref_squeeze %678 : memref<1x128xf32, #tpu.memory_space<vmem>> -> memref<128xf32, #tpu.memory_space<vmem>>
    %680 = tpu.memref_slice %arg5[%c38_i32_504] : memref<64x!tpu.dma_semaphore, #tpu.memory_space<semaphore_mem>> -> memref<1x!tpu.dma_semaphore, #tpu.memory_space<semaphore_mem>>
    %681 = tpu.memref_squeeze %680 : memref<1x!tpu.dma_semaphore, #tpu.memory_space<semaphore_mem>> -> memref<!tpu.dma_semaphore, #tpu.memory_space<semaphore_mem>>
    tpu.wait_dma2 semaphore(%681 : memref<!tpu.dma_semaphore, #tpu.memory_space<semaphore_mem>>) src(%677 : memref<128xf32, #tpu.memory_space<any>>) dst(%679 : memref<128xf32, #tpu.memory_space<vmem>>)
    %c0_i32_507 = arith.constant 0 : i32
    %c39_i32_508 = arith.constant 39 : i32
    %c39_i32_509 = arith.constant 39 : i32
    %c0_i32_510 = arith.constant 0 : i32
    %682 = tpu.memref_slice %arg2[%c0_i32_507, %c0_i32_510] : memref<1024x128xf32, #tpu.memory_space<any>> -> memref<1x128xf32, #tpu.memory_space<any>>
    %683 = tpu.memref_squeeze %682 : memref<1x128xf32, #tpu.memory_space<any>> -> memref<128xf32, #tpu.memory_space<any>>
    %c0_i32_511 = arith.constant 0 : i32
    %684 = tpu.memref_slice %arg4[%c39_i32_508, %c0_i32_511] : memref<64x128xf32, #tpu.memory_space<vmem>> -> memref<1x128xf32, #tpu.memory_space<vmem>>
    %685 = tpu.memref_squeeze %684 : memref<1x128xf32, #tpu.memory_space<vmem>> -> memref<128xf32, #tpu.memory_space<vmem>>
    %686 = tpu.memref_slice %arg5[%c39_i32_509] : memref<64x!tpu.dma_semaphore, #tpu.memory_space<semaphore_mem>> -> memref<1x!tpu.dma_semaphore, #tpu.memory_space<semaphore_mem>>
    %687 = tpu.memref_squeeze %686 : memref<1x!tpu.dma_semaphore, #tpu.memory_space<semaphore_mem>> -> memref<!tpu.dma_semaphore, #tpu.memory_space<semaphore_mem>>
    tpu.wait_dma2 semaphore(%687 : memref<!tpu.dma_semaphore, #tpu.memory_space<semaphore_mem>>) src(%683 : memref<128xf32, #tpu.memory_space<any>>) dst(%685 : memref<128xf32, #tpu.memory_space<vmem>>)
    %c0_i32_512 = arith.constant 0 : i32
    %c40_i32_513 = arith.constant 40 : i32
    %c40_i32_514 = arith.constant 40 : i32
    %c0_i32_515 = arith.constant 0 : i32
    %688 = tpu.memref_slice %arg2[%c0_i32_512, %c0_i32_515] : memref<1024x128xf32, #tpu.memory_space<any>> -> memref<1x128xf32, #tpu.memory_space<any>>
    %689 = tpu.memref_squeeze %688 : memref<1x128xf32, #tpu.memory_space<any>> -> memref<128xf32, #tpu.memory_space<any>>
    %c0_i32_516 = arith.constant 0 : i32
    %690 = tpu.memref_slice %arg4[%c40_i32_513, %c0_i32_516] : memref<64x128xf32, #tpu.memory_space<vmem>> -> memref<1x128xf32, #tpu.memory_space<vmem>>
    %691 = tpu.memref_squeeze %690 : memref<1x128xf32, #tpu.memory_space<vmem>> -> memref<128xf32, #tpu.memory_space<vmem>>
    %692 = tpu.memref_slice %arg5[%c40_i32_514] : memref<64x!tpu.dma_semaphore, #tpu.memory_space<semaphore_mem>> -> memref<1x!tpu.dma_semaphore, #tpu.memory_space<semaphore_mem>>
    %693 = tpu.memref_squeeze %692 : memref<1x!tpu.dma_semaphore, #tpu.memory_space<semaphore_mem>> -> memref<!tpu.dma_semaphore, #tpu.memory_space<semaphore_mem>>
    tpu.wait_dma2 semaphore(%693 : memref<!tpu.dma_semaphore, #tpu.memory_space<semaphore_mem>>) src(%689 : memref<128xf32, #tpu.memory_space<any>>) dst(%691 : memref<128xf32, #tpu.memory_space<vmem>>)
    %c0_i32_517 = arith.constant 0 : i32
    %c41_i32_518 = arith.constant 41 : i32
    %c41_i32_519 = arith.constant 41 : i32
    %c0_i32_520 = arith.constant 0 : i32
    %694 = tpu.memref_slice %arg2[%c0_i32_517, %c0_i32_520] : memref<1024x128xf32, #tpu.memory_space<any>> -> memref<1x128xf32, #tpu.memory_space<any>>
    %695 = tpu.memref_squeeze %694 : memref<1x128xf32, #tpu.memory_space<any>> -> memref<128xf32, #tpu.memory_space<any>>
    %c0_i32_521 = arith.constant 0 : i32
    %696 = tpu.memref_slice %arg4[%c41_i32_518, %c0_i32_521] : memref<64x128xf32, #tpu.memory_space<vmem>> -> memref<1x128xf32, #tpu.memory_space<vmem>>
    %697 = tpu.memref_squeeze %696 : memref<1x128xf32, #tpu.memory_space<vmem>> -> memref<128xf32, #tpu.memory_space<vmem>>
    %698 = tpu.memref_slice %arg5[%c41_i32_519] : memref<64x!tpu.dma_semaphore, #tpu.memory_space<semaphore_mem>> -> memref<1x!tpu.dma_semaphore, #tpu.memory_space<semaphore_mem>>
    %699 = tpu.memref_squeeze %698 : memref<1x!tpu.dma_semaphore, #tpu.memory_space<semaphore_mem>> -> memref<!tpu.dma_semaphore, #tpu.memory_space<semaphore_mem>>
    tpu.wait_dma2 semaphore(%699 : memref<!tpu.dma_semaphore, #tpu.memory_space<semaphore_mem>>) src(%695 : memref<128xf32, #tpu.memory_space<any>>) dst(%697 : memref<128xf32, #tpu.memory_space<vmem>>)
    %c0_i32_522 = arith.constant 0 : i32
    %c42_i32_523 = arith.constant 42 : i32
    %c42_i32_524 = arith.constant 42 : i32
    %c0_i32_525 = arith.constant 0 : i32
    %700 = tpu.memref_slice %arg2[%c0_i32_522, %c0_i32_525] : memref<1024x128xf32, #tpu.memory_space<any>> -> memref<1x128xf32, #tpu.memory_space<any>>
    %701 = tpu.memref_squeeze %700 : memref<1x128xf32, #tpu.memory_space<any>> -> memref<128xf32, #tpu.memory_space<any>>
    %c0_i32_526 = arith.constant 0 : i32
    %702 = tpu.memref_slice %arg4[%c42_i32_523, %c0_i32_526] : memref<64x128xf32, #tpu.memory_space<vmem>> -> memref<1x128xf32, #tpu.memory_space<vmem>>
    %703 = tpu.memref_squeeze %702 : memref<1x128xf32, #tpu.memory_space<vmem>> -> memref<128xf32, #tpu.memory_space<vmem>>
    %704 = tpu.memref_slice %arg5[%c42_i32_524] : memref<64x!tpu.dma_semaphore, #tpu.memory_space<semaphore_mem>> -> memref<1x!tpu.dma_semaphore, #tpu.memory_space<semaphore_mem>>
    %705 = tpu.memref_squeeze %704 : memref<1x!tpu.dma_semaphore, #tpu.memory_space<semaphore_mem>> -> memref<!tpu.dma_semaphore, #tpu.memory_space<semaphore_mem>>
    tpu.wait_dma2 semaphore(%705 : memref<!tpu.dma_semaphore, #tpu.memory_space<semaphore_mem>>) src(%701 : memref<128xf32, #tpu.memory_space<any>>) dst(%703 : memref<128xf32, #tpu.memory_space<vmem>>)
    %c0_i32_527 = arith.constant 0 : i32
    %c43_i32_528 = arith.constant 43 : i32
    %c43_i32_529 = arith.constant 43 : i32
    %c0_i32_530 = arith.constant 0 : i32
    %706 = tpu.memref_slice %arg2[%c0_i32_527, %c0_i32_530] : memref<1024x128xf32, #tpu.memory_space<any>> -> memref<1x128xf32, #tpu.memory_space<any>>
    %707 = tpu.memref_squeeze %706 : memref<1x128xf32, #tpu.memory_space<any>> -> memref<128xf32, #tpu.memory_space<any>>
    %c0_i32_531 = arith.constant 0 : i32
    %708 = tpu.memref_slice %arg4[%c43_i32_528, %c0_i32_531] : memref<64x128xf32, #tpu.memory_space<vmem>> -> memref<1x128xf32, #tpu.memory_space<vmem>>
    %709 = tpu.memref_squeeze %708 : memref<1x128xf32, #tpu.memory_space<vmem>> -> memref<128xf32, #tpu.memory_space<vmem>>
    %710 = tpu.memref_slice %arg5[%c43_i32_529] : memref<64x!tpu.dma_semaphore, #tpu.memory_space<semaphore_mem>> -> memref<1x!tpu.dma_semaphore, #tpu.memory_space<semaphore_mem>>
    %711 = tpu.memref_squeeze %710 : memref<1x!tpu.dma_semaphore, #tpu.memory_space<semaphore_mem>> -> memref<!tpu.dma_semaphore, #tpu.memory_space<semaphore_mem>>
    tpu.wait_dma2 semaphore(%711 : memref<!tpu.dma_semaphore, #tpu.memory_space<semaphore_mem>>) src(%707 : memref<128xf32, #tpu.memory_space<any>>) dst(%709 : memref<128xf32, #tpu.memory_space<vmem>>)
    %c0_i32_532 = arith.constant 0 : i32
    %c44_i32_533 = arith.constant 44 : i32
    %c44_i32_534 = arith.constant 44 : i32
    %c0_i32_535 = arith.constant 0 : i32
    %712 = tpu.memref_slice %arg2[%c0_i32_532, %c0_i32_535] : memref<1024x128xf32, #tpu.memory_space<any>> -> memref<1x128xf32, #tpu.memory_space<any>>
    %713 = tpu.memref_squeeze %712 : memref<1x128xf32, #tpu.memory_space<any>> -> memref<128xf32, #tpu.memory_space<any>>
    %c0_i32_536 = arith.constant 0 : i32
    %714 = tpu.memref_slice %arg4[%c44_i32_533, %c0_i32_536] : memref<64x128xf32, #tpu.memory_space<vmem>> -> memref<1x128xf32, #tpu.memory_space<vmem>>
    %715 = tpu.memref_squeeze %714 : memref<1x128xf32, #tpu.memory_space<vmem>> -> memref<128xf32, #tpu.memory_space<vmem>>
    %716 = tpu.memref_slice %arg5[%c44_i32_534] : memref<64x!tpu.dma_semaphore, #tpu.memory_space<semaphore_mem>> -> memref<1x!tpu.dma_semaphore, #tpu.memory_space<semaphore_mem>>
    %717 = tpu.memref_squeeze %716 : memref<1x!tpu.dma_semaphore, #tpu.memory_space<semaphore_mem>> -> memref<!tpu.dma_semaphore, #tpu.memory_space<semaphore_mem>>
    tpu.wait_dma2 semaphore(%717 : memref<!tpu.dma_semaphore, #tpu.memory_space<semaphore_mem>>) src(%713 : memref<128xf32, #tpu.memory_space<any>>) dst(%715 : memref<128xf32, #tpu.memory_space<vmem>>)
    %c0_i32_537 = arith.constant 0 : i32
    %c45_i32_538 = arith.constant 45 : i32
    %c45_i32_539 = arith.constant 45 : i32
    %c0_i32_540 = arith.constant 0 : i32
    %718 = tpu.memref_slice %arg2[%c0_i32_537, %c0_i32_540] : memref<1024x128xf32, #tpu.memory_space<any>> -> memref<1x128xf32, #tpu.memory_space<any>>
    %719 = tpu.memref_squeeze %718 : memref<1x128xf32, #tpu.memory_space<any>> -> memref<128xf32, #tpu.memory_space<any>>
    %c0_i32_541 = arith.constant 0 : i32
    %720 = tpu.memref_slice %arg4[%c45_i32_538, %c0_i32_541] : memref<64x128xf32, #tpu.memory_space<vmem>> -> memref<1x128xf32, #tpu.memory_space<vmem>>
    %721 = tpu.memref_squeeze %720 : memref<1x128xf32, #tpu.memory_space<vmem>> -> memref<128xf32, #tpu.memory_space<vmem>>
    %722 = tpu.memref_slice %arg5[%c45_i32_539] : memref<64x!tpu.dma_semaphore, #tpu.memory_space<semaphore_mem>> -> memref<1x!tpu.dma_semaphore, #tpu.memory_space<semaphore_mem>>
    %723 = tpu.memref_squeeze %722 : memref<1x!tpu.dma_semaphore, #tpu.memory_space<semaphore_mem>> -> memref<!tpu.dma_semaphore, #tpu.memory_space<semaphore_mem>>
    tpu.wait_dma2 semaphore(%723 : memref<!tpu.dma_semaphore, #tpu.memory_space<semaphore_mem>>) src(%719 : memref<128xf32, #tpu.memory_space<any>>) dst(%721 : memref<128xf32, #tpu.memory_space<vmem>>)
    %c0_i32_542 = arith.constant 0 : i32
    %c46_i32_543 = arith.constant 46 : i32
    %c46_i32_544 = arith.constant 46 : i32
    %c0_i32_545 = arith.constant 0 : i32
    %724 = tpu.memref_slice %arg2[%c0_i32_542, %c0_i32_545] : memref<1024x128xf32, #tpu.memory_space<any>> -> memref<1x128xf32, #tpu.memory_space<any>>
    %725 = tpu.memref_squeeze %724 : memref<1x128xf32, #tpu.memory_space<any>> -> memref<128xf32, #tpu.memory_space<any>>
    %c0_i32_546 = arith.constant 0 : i32
    %726 = tpu.memref_slice %arg4[%c46_i32_543, %c0_i32_546] : memref<64x128xf32, #tpu.memory_space<vmem>> -> memref<1x128xf32, #tpu.memory_space<vmem>>
    %727 = tpu.memref_squeeze %726 : memref<1x128xf32, #tpu.memory_space<vmem>> -> memref<128xf32, #tpu.memory_space<vmem>>
    %728 = tpu.memref_slice %arg5[%c46_i32_544] : memref<64x!tpu.dma_semaphore, #tpu.memory_space<semaphore_mem>> -> memref<1x!tpu.dma_semaphore, #tpu.memory_space<semaphore_mem>>
    %729 = tpu.memref_squeeze %728 : memref<1x!tpu.dma_semaphore, #tpu.memory_space<semaphore_mem>> -> memref<!tpu.dma_semaphore, #tpu.memory_space<semaphore_mem>>
    tpu.wait_dma2 semaphore(%729 : memref<!tpu.dma_semaphore, #tpu.memory_space<semaphore_mem>>) src(%725 : memref<128xf32, #tpu.memory_space<any>>) dst(%727 : memref<128xf32, #tpu.memory_space<vmem>>)
    %c0_i32_547 = arith.constant 0 : i32
    %c47_i32_548 = arith.constant 47 : i32
    %c47_i32_549 = arith.constant 47 : i32
    %c0_i32_550 = arith.constant 0 : i32
    %730 = tpu.memref_slice %arg2[%c0_i32_547, %c0_i32_550] : memref<1024x128xf32, #tpu.memory_space<any>> -> memref<1x128xf32, #tpu.memory_space<any>>
    %731 = tpu.memref_squeeze %730 : memref<1x128xf32, #tpu.memory_space<any>> -> memref<128xf32, #tpu.memory_space<any>>
    %c0_i32_551 = arith.constant 0 : i32
    %732 = tpu.memref_slice %arg4[%c47_i32_548, %c0_i32_551] : memref<64x128xf32, #tpu.memory_space<vmem>> -> memref<1x128xf32, #tpu.memory_space<vmem>>
    %733 = tpu.memref_squeeze %732 : memref<1x128xf32, #tpu.memory_space<vmem>> -> memref<128xf32, #tpu.memory_space<vmem>>
    %734 = tpu.memref_slice %arg5[%c47_i32_549] : memref<64x!tpu.dma_semaphore, #tpu.memory_space<semaphore_mem>> -> memref<1x!tpu.dma_semaphore, #tpu.memory_space<semaphore_mem>>
    %735 = tpu.memref_squeeze %734 : memref<1x!tpu.dma_semaphore, #tpu.memory_space<semaphore_mem>> -> memref<!tpu.dma_semaphore, #tpu.memory_space<semaphore_mem>>
    tpu.wait_dma2 semaphore(%735 : memref<!tpu.dma_semaphore, #tpu.memory_space<semaphore_mem>>) src(%731 : memref<128xf32, #tpu.memory_space<any>>) dst(%733 : memref<128xf32, #tpu.memory_space<vmem>>)
    %c0_i32_552 = arith.constant 0 : i32
    %c48_i32_553 = arith.constant 48 : i32
    %c48_i32_554 = arith.constant 48 : i32
    %c0_i32_555 = arith.constant 0 : i32
    %736 = tpu.memref_slice %arg2[%c0_i32_552, %c0_i32_555] : memref<1024x128xf32, #tpu.memory_space<any>> -> memref<1x128xf32, #tpu.memory_space<any>>
    %737 = tpu.memref_squeeze %736 : memref<1x128xf32, #tpu.memory_space<any>> -> memref<128xf32, #tpu.memory_space<any>>
    %c0_i32_556 = arith.constant 0 : i32
    %738 = tpu.memref_slice %arg4[%c48_i32_553, %c0_i32_556] : memref<64x128xf32, #tpu.memory_space<vmem>> -> memref<1x128xf32, #tpu.memory_space<vmem>>
    %739 = tpu.memref_squeeze %738 : memref<1x128xf32, #tpu.memory_space<vmem>> -> memref<128xf32, #tpu.memory_space<vmem>>
    %740 = tpu.memref_slice %arg5[%c48_i32_554] : memref<64x!tpu.dma_semaphore, #tpu.memory_space<semaphore_mem>> -> memref<1x!tpu.dma_semaphore, #tpu.memory_space<semaphore_mem>>
    %741 = tpu.memref_squeeze %740 : memref<1x!tpu.dma_semaphore, #tpu.memory_space<semaphore_mem>> -> memref<!tpu.dma_semaphore, #tpu.memory_space<semaphore_mem>>
    tpu.wait_dma2 semaphore(%741 : memref<!tpu.dma_semaphore, #tpu.memory_space<semaphore_mem>>) src(%737 : memref<128xf32, #tpu.memory_space<any>>) dst(%739 : memref<128xf32, #tpu.memory_space<vmem>>)
    %c0_i32_557 = arith.constant 0 : i32
    %c49_i32_558 = arith.constant 49 : i32
    %c49_i32_559 = arith.constant 49 : i32
    %c0_i32_560 = arith.constant 0 : i32
    %742 = tpu.memref_slice %arg2[%c0_i32_557, %c0_i32_560] : memref<1024x128xf32, #tpu.memory_space<any>> -> memref<1x128xf32, #tpu.memory_space<any>>
    %743 = tpu.memref_squeeze %742 : memref<1x128xf32, #tpu.memory_space<any>> -> memref<128xf32, #tpu.memory_space<any>>
    %c0_i32_561 = arith.constant 0 : i32
    %744 = tpu.memref_slice %arg4[%c49_i32_558, %c0_i32_561] : memref<64x128xf32, #tpu.memory_space<vmem>> -> memref<1x128xf32, #tpu.memory_space<vmem>>
    %745 = tpu.memref_squeeze %744 : memref<1x128xf32, #tpu.memory_space<vmem>> -> memref<128xf32, #tpu.memory_space<vmem>>
    %746 = tpu.memref_slice %arg5[%c49_i32_559] : memref<64x!tpu.dma_semaphore, #tpu.memory_space<semaphore_mem>> -> memref<1x!tpu.dma_semaphore, #tpu.memory_space<semaphore_mem>>
    %747 = tpu.memref_squeeze %746 : memref<1x!tpu.dma_semaphore, #tpu.memory_space<semaphore_mem>> -> memref<!tpu.dma_semaphore, #tpu.memory_space<semaphore_mem>>
    tpu.wait_dma2 semaphore(%747 : memref<!tpu.dma_semaphore, #tpu.memory_space<semaphore_mem>>) src(%743 : memref<128xf32, #tpu.memory_space<any>>) dst(%745 : memref<128xf32, #tpu.memory_space<vmem>>)
    %c0_i32_562 = arith.constant 0 : i32
    %c50_i32_563 = arith.constant 50 : i32
    %c50_i32_564 = arith.constant 50 : i32
    %c0_i32_565 = arith.constant 0 : i32
    %748 = tpu.memref_slice %arg2[%c0_i32_562, %c0_i32_565] : memref<1024x128xf32, #tpu.memory_space<any>> -> memref<1x128xf32, #tpu.memory_space<any>>
    %749 = tpu.memref_squeeze %748 : memref<1x128xf32, #tpu.memory_space<any>> -> memref<128xf32, #tpu.memory_space<any>>
    %c0_i32_566 = arith.constant 0 : i32
    %750 = tpu.memref_slice %arg4[%c50_i32_563, %c0_i32_566] : memref<64x128xf32, #tpu.memory_space<vmem>> -> memref<1x128xf32, #tpu.memory_space<vmem>>
    %751 = tpu.memref_squeeze %750 : memref<1x128xf32, #tpu.memory_space<vmem>> -> memref<128xf32, #tpu.memory_space<vmem>>
    %752 = tpu.memref_slice %arg5[%c50_i32_564] : memref<64x!tpu.dma_semaphore, #tpu.memory_space<semaphore_mem>> -> memref<1x!tpu.dma_semaphore, #tpu.memory_space<semaphore_mem>>
    %753 = tpu.memref_squeeze %752 : memref<1x!tpu.dma_semaphore, #tpu.memory_space<semaphore_mem>> -> memref<!tpu.dma_semaphore, #tpu.memory_space<semaphore_mem>>
    tpu.wait_dma2 semaphore(%753 : memref<!tpu.dma_semaphore, #tpu.memory_space<semaphore_mem>>) src(%749 : memref<128xf32, #tpu.memory_space<any>>) dst(%751 : memref<128xf32, #tpu.memory_space<vmem>>)
    %c0_i32_567 = arith.constant 0 : i32
    %c51_i32_568 = arith.constant 51 : i32
    %c51_i32_569 = arith.constant 51 : i32
    %c0_i32_570 = arith.constant 0 : i32
    %754 = tpu.memref_slice %arg2[%c0_i32_567, %c0_i32_570] : memref<1024x128xf32, #tpu.memory_space<any>> -> memref<1x128xf32, #tpu.memory_space<any>>
    %755 = tpu.memref_squeeze %754 : memref<1x128xf32, #tpu.memory_space<any>> -> memref<128xf32, #tpu.memory_space<any>>
    %c0_i32_571 = arith.constant 0 : i32
    %756 = tpu.memref_slice %arg4[%c51_i32_568, %c0_i32_571] : memref<64x128xf32, #tpu.memory_space<vmem>> -> memref<1x128xf32, #tpu.memory_space<vmem>>
    %757 = tpu.memref_squeeze %756 : memref<1x128xf32, #tpu.memory_space<vmem>> -> memref<128xf32, #tpu.memory_space<vmem>>
    %758 = tpu.memref_slice %arg5[%c51_i32_569] : memref<64x!tpu.dma_semaphore, #tpu.memory_space<semaphore_mem>> -> memref<1x!tpu.dma_semaphore, #tpu.memory_space<semaphore_mem>>
    %759 = tpu.memref_squeeze %758 : memref<1x!tpu.dma_semaphore, #tpu.memory_space<semaphore_mem>> -> memref<!tpu.dma_semaphore, #tpu.memory_space<semaphore_mem>>
    tpu.wait_dma2 semaphore(%759 : memref<!tpu.dma_semaphore, #tpu.memory_space<semaphore_mem>>) src(%755 : memref<128xf32, #tpu.memory_space<any>>) dst(%757 : memref<128xf32, #tpu.memory_space<vmem>>)
    %c0_i32_572 = arith.constant 0 : i32
    %c52_i32_573 = arith.constant 52 : i32
    %c52_i32_574 = arith.constant 52 : i32
    %c0_i32_575 = arith.constant 0 : i32
    %760 = tpu.memref_slice %arg2[%c0_i32_572, %c0_i32_575] : memref<1024x128xf32, #tpu.memory_space<any>> -> memref<1x128xf32, #tpu.memory_space<any>>
    %761 = tpu.memref_squeeze %760 : memref<1x128xf32, #tpu.memory_space<any>> -> memref<128xf32, #tpu.memory_space<any>>
    %c0_i32_576 = arith.constant 0 : i32
    %762 = tpu.memref_slice %arg4[%c52_i32_573, %c0_i32_576] : memref<64x128xf32, #tpu.memory_space<vmem>> -> memref<1x128xf32, #tpu.memory_space<vmem>>
    %763 = tpu.memref_squeeze %762 : memref<1x128xf32, #tpu.memory_space<vmem>> -> memref<128xf32, #tpu.memory_space<vmem>>
    %764 = tpu.memref_slice %arg5[%c52_i32_574] : memref<64x!tpu.dma_semaphore, #tpu.memory_space<semaphore_mem>> -> memref<1x!tpu.dma_semaphore, #tpu.memory_space<semaphore_mem>>
    %765 = tpu.memref_squeeze %764 : memref<1x!tpu.dma_semaphore, #tpu.memory_space<semaphore_mem>> -> memref<!tpu.dma_semaphore, #tpu.memory_space<semaphore_mem>>
    tpu.wait_dma2 semaphore(%765 : memref<!tpu.dma_semaphore, #tpu.memory_space<semaphore_mem>>) src(%761 : memref<128xf32, #tpu.memory_space<any>>) dst(%763 : memref<128xf32, #tpu.memory_space<vmem>>)
    %c0_i32_577 = arith.constant 0 : i32
    %c53_i32_578 = arith.constant 53 : i32
    %c53_i32_579 = arith.constant 53 : i32
    %c0_i32_580 = arith.constant 0 : i32
    %766 = tpu.memref_slice %arg2[%c0_i32_577, %c0_i32_580] : memref<1024x128xf32, #tpu.memory_space<any>> -> memref<1x128xf32, #tpu.memory_space<any>>
    %767 = tpu.memref_squeeze %766 : memref<1x128xf32, #tpu.memory_space<any>> -> memref<128xf32, #tpu.memory_space<any>>
    %c0_i32_581 = arith.constant 0 : i32
    %768 = tpu.memref_slice %arg4[%c53_i32_578, %c0_i32_581] : memref<64x128xf32, #tpu.memory_space<vmem>> -> memref<1x128xf32, #tpu.memory_space<vmem>>
    %769 = tpu.memref_squeeze %768 : memref<1x128xf32, #tpu.memory_space<vmem>> -> memref<128xf32, #tpu.memory_space<vmem>>
    %770 = tpu.memref_slice %arg5[%c53_i32_579] : memref<64x!tpu.dma_semaphore, #tpu.memory_space<semaphore_mem>> -> memref<1x!tpu.dma_semaphore, #tpu.memory_space<semaphore_mem>>
    %771 = tpu.memref_squeeze %770 : memref<1x!tpu.dma_semaphore, #tpu.memory_space<semaphore_mem>> -> memref<!tpu.dma_semaphore, #tpu.memory_space<semaphore_mem>>
    tpu.wait_dma2 semaphore(%771 : memref<!tpu.dma_semaphore, #tpu.memory_space<semaphore_mem>>) src(%767 : memref<128xf32, #tpu.memory_space<any>>) dst(%769 : memref<128xf32, #tpu.memory_space<vmem>>)
    %c0_i32_582 = arith.constant 0 : i32
    %c54_i32_583 = arith.constant 54 : i32
    %c54_i32_584 = arith.constant 54 : i32
    %c0_i32_585 = arith.constant 0 : i32
    %772 = tpu.memref_slice %arg2[%c0_i32_582, %c0_i32_585] : memref<1024x128xf32, #tpu.memory_space<any>> -> memref<1x128xf32, #tpu.memory_space<any>>
    %773 = tpu.memref_squeeze %772 : memref<1x128xf32, #tpu.memory_space<any>> -> memref<128xf32, #tpu.memory_space<any>>
    %c0_i32_586 = arith.constant 0 : i32
    %774 = tpu.memref_slice %arg4[%c54_i32_583, %c0_i32_586] : memref<64x128xf32, #tpu.memory_space<vmem>> -> memref<1x128xf32, #tpu.memory_space<vmem>>
    %775 = tpu.memref_squeeze %774 : memref<1x128xf32, #tpu.memory_space<vmem>> -> memref<128xf32, #tpu.memory_space<vmem>>
    %776 = tpu.memref_slice %arg5[%c54_i32_584] : memref<64x!tpu.dma_semaphore, #tpu.memory_space<semaphore_mem>> -> memref<1x!tpu.dma_semaphore, #tpu.memory_space<semaphore_mem>>
    %777 = tpu.memref_squeeze %776 : memref<1x!tpu.dma_semaphore, #tpu.memory_space<semaphore_mem>> -> memref<!tpu.dma_semaphore, #tpu.memory_space<semaphore_mem>>
    tpu.wait_dma2 semaphore(%777 : memref<!tpu.dma_semaphore, #tpu.memory_space<semaphore_mem>>) src(%773 : memref<128xf32, #tpu.memory_space<any>>) dst(%775 : memref<128xf32, #tpu.memory_space<vmem>>)
    %c0_i32_587 = arith.constant 0 : i32
    %c55_i32_588 = arith.constant 55 : i32
    %c55_i32_589 = arith.constant 55 : i32
    %c0_i32_590 = arith.constant 0 : i32
    %778 = tpu.memref_slice %arg2[%c0_i32_587, %c0_i32_590] : memref<1024x128xf32, #tpu.memory_space<any>> -> memref<1x128xf32, #tpu.memory_space<any>>
    %779 = tpu.memref_squeeze %778 : memref<1x128xf32, #tpu.memory_space<any>> -> memref<128xf32, #tpu.memory_space<any>>
    %c0_i32_591 = arith.constant 0 : i32
    %780 = tpu.memref_slice %arg4[%c55_i32_588, %c0_i32_591] : memref<64x128xf32, #tpu.memory_space<vmem>> -> memref<1x128xf32, #tpu.memory_space<vmem>>
    %781 = tpu.memref_squeeze %780 : memref<1x128xf32, #tpu.memory_space<vmem>> -> memref<128xf32, #tpu.memory_space<vmem>>
    %782 = tpu.memref_slice %arg5[%c55_i32_589] : memref<64x!tpu.dma_semaphore, #tpu.memory_space<semaphore_mem>> -> memref<1x!tpu.dma_semaphore, #tpu.memory_space<semaphore_mem>>
    %783 = tpu.memref_squeeze %782 : memref<1x!tpu.dma_semaphore, #tpu.memory_space<semaphore_mem>> -> memref<!tpu.dma_semaphore, #tpu.memory_space<semaphore_mem>>
    tpu.wait_dma2 semaphore(%783 : memref<!tpu.dma_semaphore, #tpu.memory_space<semaphore_mem>>) src(%779 : memref<128xf32, #tpu.memory_space<any>>) dst(%781 : memref<128xf32, #tpu.memory_space<vmem>>)
    %c0_i32_592 = arith.constant 0 : i32
    %c56_i32_593 = arith.constant 56 : i32
    %c56_i32_594 = arith.constant 56 : i32
    %c0_i32_595 = arith.constant 0 : i32
    %784 = tpu.memref_slice %arg2[%c0_i32_592, %c0_i32_595] : memref<1024x128xf32, #tpu.memory_space<any>> -> memref<1x128xf32, #tpu.memory_space<any>>
    %785 = tpu.memref_squeeze %784 : memref<1x128xf32, #tpu.memory_space<any>> -> memref<128xf32, #tpu.memory_space<any>>
    %c0_i32_596 = arith.constant 0 : i32
    %786 = tpu.memref_slice %arg4[%c56_i32_593, %c0_i32_596] : memref<64x128xf32, #tpu.memory_space<vmem>> -> memref<1x128xf32, #tpu.memory_space<vmem>>
    %787 = tpu.memref_squeeze %786 : memref<1x128xf32, #tpu.memory_space<vmem>> -> memref<128xf32, #tpu.memory_space<vmem>>
    %788 = tpu.memref_slice %arg5[%c56_i32_594] : memref<64x!tpu.dma_semaphore, #tpu.memory_space<semaphore_mem>> -> memref<1x!tpu.dma_semaphore, #tpu.memory_space<semaphore_mem>>
    %789 = tpu.memref_squeeze %788 : memref<1x!tpu.dma_semaphore, #tpu.memory_space<semaphore_mem>> -> memref<!tpu.dma_semaphore, #tpu.memory_space<semaphore_mem>>
    tpu.wait_dma2 semaphore(%789 : memref<!tpu.dma_semaphore, #tpu.memory_space<semaphore_mem>>) src(%785 : memref<128xf32, #tpu.memory_space<any>>) dst(%787 : memref<128xf32, #tpu.memory_space<vmem>>)
    %c0_i32_597 = arith.constant 0 : i32
    %c57_i32_598 = arith.constant 57 : i32
    %c57_i32_599 = arith.constant 57 : i32
    %c0_i32_600 = arith.constant 0 : i32
    %790 = tpu.memref_slice %arg2[%c0_i32_597, %c0_i32_600] : memref<1024x128xf32, #tpu.memory_space<any>> -> memref<1x128xf32, #tpu.memory_space<any>>
    %791 = tpu.memref_squeeze %790 : memref<1x128xf32, #tpu.memory_space<any>> -> memref<128xf32, #tpu.memory_space<any>>
    %c0_i32_601 = arith.constant 0 : i32
    %792 = tpu.memref_slice %arg4[%c57_i32_598, %c0_i32_601] : memref<64x128xf32, #tpu.memory_space<vmem>> -> memref<1x128xf32, #tpu.memory_space<vmem>>
    %793 = tpu.memref_squeeze %792 : memref<1x128xf32, #tpu.memory_space<vmem>> -> memref<128xf32, #tpu.memory_space<vmem>>
    %794 = tpu.memref_slice %arg5[%c57_i32_599] : memref<64x!tpu.dma_semaphore, #tpu.memory_space<semaphore_mem>> -> memref<1x!tpu.dma_semaphore, #tpu.memory_space<semaphore_mem>>
    %795 = tpu.memref_squeeze %794 : memref<1x!tpu.dma_semaphore, #tpu.memory_space<semaphore_mem>> -> memref<!tpu.dma_semaphore, #tpu.memory_space<semaphore_mem>>
    tpu.wait_dma2 semaphore(%795 : memref<!tpu.dma_semaphore, #tpu.memory_space<semaphore_mem>>) src(%791 : memref<128xf32, #tpu.memory_space<any>>) dst(%793 : memref<128xf32, #tpu.memory_space<vmem>>)
    %c0_i32_602 = arith.constant 0 : i32
    %c58_i32_603 = arith.constant 58 : i32
    %c58_i32_604 = arith.constant 58 : i32
    %c0_i32_605 = arith.constant 0 : i32
    %796 = tpu.memref_slice %arg2[%c0_i32_602, %c0_i32_605] : memref<1024x128xf32, #tpu.memory_space<any>> -> memref<1x128xf32, #tpu.memory_space<any>>
    %797 = tpu.memref_squeeze %796 : memref<1x128xf32, #tpu.memory_space<any>> -> memref<128xf32, #tpu.memory_space<any>>
    %c0_i32_606 = arith.constant 0 : i32
    %798 = tpu.memref_slice %arg4[%c58_i32_603, %c0_i32_606] : memref<64x128xf32, #tpu.memory_space<vmem>> -> memref<1x128xf32, #tpu.memory_space<vmem>>
    %799 = tpu.memref_squeeze %798 : memref<1x128xf32, #tpu.memory_space<vmem>> -> memref<128xf32, #tpu.memory_space<vmem>>
    %800 = tpu.memref_slice %arg5[%c58_i32_604] : memref<64x!tpu.dma_semaphore, #tpu.memory_space<semaphore_mem>> -> memref<1x!tpu.dma_semaphore, #tpu.memory_space<semaphore_mem>>
    %801 = tpu.memref_squeeze %800 : memref<1x!tpu.dma_semaphore, #tpu.memory_space<semaphore_mem>> -> memref<!tpu.dma_semaphore, #tpu.memory_space<semaphore_mem>>
    tpu.wait_dma2 semaphore(%801 : memref<!tpu.dma_semaphore, #tpu.memory_space<semaphore_mem>>) src(%797 : memref<128xf32, #tpu.memory_space<any>>) dst(%799 : memref<128xf32, #tpu.memory_space<vmem>>)
    %c0_i32_607 = arith.constant 0 : i32
    %c59_i32_608 = arith.constant 59 : i32
    %c59_i32_609 = arith.constant 59 : i32
    %c0_i32_610 = arith.constant 0 : i32
    %802 = tpu.memref_slice %arg2[%c0_i32_607, %c0_i32_610] : memref<1024x128xf32, #tpu.memory_space<any>> -> memref<1x128xf32, #tpu.memory_space<any>>
    %803 = tpu.memref_squeeze %802 : memref<1x128xf32, #tpu.memory_space<any>> -> memref<128xf32, #tpu.memory_space<any>>
    %c0_i32_611 = arith.constant 0 : i32
    %804 = tpu.memref_slice %arg4[%c59_i32_608, %c0_i32_611] : memref<64x128xf32, #tpu.memory_space<vmem>> -> memref<1x128xf32, #tpu.memory_space<vmem>>
    %805 = tpu.memref_squeeze %804 : memref<1x128xf32, #tpu.memory_space<vmem>> -> memref<128xf32, #tpu.memory_space<vmem>>
    %806 = tpu.memref_slice %arg5[%c59_i32_609] : memref<64x!tpu.dma_semaphore, #tpu.memory_space<semaphore_mem>> -> memref<1x!tpu.dma_semaphore, #tpu.memory_space<semaphore_mem>>
    %807 = tpu.memref_squeeze %806 : memref<1x!tpu.dma_semaphore, #tpu.memory_space<semaphore_mem>> -> memref<!tpu.dma_semaphore, #tpu.memory_space<semaphore_mem>>
    tpu.wait_dma2 semaphore(%807 : memref<!tpu.dma_semaphore, #tpu.memory_space<semaphore_mem>>) src(%803 : memref<128xf32, #tpu.memory_space<any>>) dst(%805 : memref<128xf32, #tpu.memory_space<vmem>>)
    %c0_i32_612 = arith.constant 0 : i32
    %c60_i32_613 = arith.constant 60 : i32
    %c60_i32_614 = arith.constant 60 : i32
    %c0_i32_615 = arith.constant 0 : i32
    %808 = tpu.memref_slice %arg2[%c0_i32_612, %c0_i32_615] : memref<1024x128xf32, #tpu.memory_space<any>> -> memref<1x128xf32, #tpu.memory_space<any>>
    %809 = tpu.memref_squeeze %808 : memref<1x128xf32, #tpu.memory_space<any>> -> memref<128xf32, #tpu.memory_space<any>>
    %c0_i32_616 = arith.constant 0 : i32
    %810 = tpu.memref_slice %arg4[%c60_i32_613, %c0_i32_616] : memref<64x128xf32, #tpu.memory_space<vmem>> -> memref<1x128xf32, #tpu.memory_space<vmem>>
    %811 = tpu.memref_squeeze %810 : memref<1x128xf32, #tpu.memory_space<vmem>> -> memref<128xf32, #tpu.memory_space<vmem>>
    %812 = tpu.memref_slice %arg5[%c60_i32_614] : memref<64x!tpu.dma_semaphore, #tpu.memory_space<semaphore_mem>> -> memref<1x!tpu.dma_semaphore, #tpu.memory_space<semaphore_mem>>
    %813 = tpu.memref_squeeze %812 : memref<1x!tpu.dma_semaphore, #tpu.memory_space<semaphore_mem>> -> memref<!tpu.dma_semaphore, #tpu.memory_space<semaphore_mem>>
    tpu.wait_dma2 semaphore(%813 : memref<!tpu.dma_semaphore, #tpu.memory_space<semaphore_mem>>) src(%809 : memref<128xf32, #tpu.memory_space<any>>) dst(%811 : memref<128xf32, #tpu.memory_space<vmem>>)
    %c0_i32_617 = arith.constant 0 : i32
    %c61_i32_618 = arith.constant 61 : i32
    %c61_i32_619 = arith.constant 61 : i32
    %c0_i32_620 = arith.constant 0 : i32
    %814 = tpu.memref_slice %arg2[%c0_i32_617, %c0_i32_620] : memref<1024x128xf32, #tpu.memory_space<any>> -> memref<1x128xf32, #tpu.memory_space<any>>
    %815 = tpu.memref_squeeze %814 : memref<1x128xf32, #tpu.memory_space<any>> -> memref<128xf32, #tpu.memory_space<any>>
    %c0_i32_621 = arith.constant 0 : i32
    %816 = tpu.memref_slice %arg4[%c61_i32_618, %c0_i32_621] : memref<64x128xf32, #tpu.memory_space<vmem>> -> memref<1x128xf32, #tpu.memory_space<vmem>>
    %817 = tpu.memref_squeeze %816 : memref<1x128xf32, #tpu.memory_space<vmem>> -> memref<128xf32, #tpu.memory_space<vmem>>
    %818 = tpu.memref_slice %arg5[%c61_i32_619] : memref<64x!tpu.dma_semaphore, #tpu.memory_space<semaphore_mem>> -> memref<1x!tpu.dma_semaphore, #tpu.memory_space<semaphore_mem>>
    %819 = tpu.memref_squeeze %818 : memref<1x!tpu.dma_semaphore, #tpu.memory_space<semaphore_mem>> -> memref<!tpu.dma_semaphore, #tpu.memory_space<semaphore_mem>>
    tpu.wait_dma2 semaphore(%819 : memref<!tpu.dma_semaphore, #tpu.memory_space<semaphore_mem>>) src(%815 : memref<128xf32, #tpu.memory_space<any>>) dst(%817 : memref<128xf32, #tpu.memory_space<vmem>>)
    %c0_i32_622 = arith.constant 0 : i32
    %c62_i32_623 = arith.constant 62 : i32
    %c62_i32_624 = arith.constant 62 : i32
    %c0_i32_625 = arith.constant 0 : i32
    %820 = tpu.memref_slice %arg2[%c0_i32_622, %c0_i32_625] : memref<1024x128xf32, #tpu.memory_space<any>> -> memref<1x128xf32, #tpu.memory_space<any>>
    %821 = tpu.memref_squeeze %820 : memref<1x128xf32, #tpu.memory_space<any>> -> memref<128xf32, #tpu.memory_space<any>>
    %c0_i32_626 = arith.constant 0 : i32
    %822 = tpu.memref_slice %arg4[%c62_i32_623, %c0_i32_626] : memref<64x128xf32, #tpu.memory_space<vmem>> -> memref<1x128xf32, #tpu.memory_space<vmem>>
    %823 = tpu.memref_squeeze %822 : memref<1x128xf32, #tpu.memory_space<vmem>> -> memref<128xf32, #tpu.memory_space<vmem>>
    %824 = tpu.memref_slice %arg5[%c62_i32_624] : memref<64x!tpu.dma_semaphore, #tpu.memory_space<semaphore_mem>> -> memref<1x!tpu.dma_semaphore, #tpu.memory_space<semaphore_mem>>
    %825 = tpu.memref_squeeze %824 : memref<1x!tpu.dma_semaphore, #tpu.memory_space<semaphore_mem>> -> memref<!tpu.dma_semaphore, #tpu.memory_space<semaphore_mem>>
    tpu.wait_dma2 semaphore(%825 : memref<!tpu.dma_semaphore, #tpu.memory_space<semaphore_mem>>) src(%821 : memref<128xf32, #tpu.memory_space<any>>) dst(%823 : memref<128xf32, #tpu.memory_space<vmem>>)
    %c0_i32_627 = arith.constant 0 : i32
    %c63_i32_628 = arith.constant 63 : i32
    %c63_i32_629 = arith.constant 63 : i32
    %c0_i32_630 = arith.constant 0 : i32
    %826 = tpu.memref_slice %arg2[%c0_i32_627, %c0_i32_630] : memref<1024x128xf32, #tpu.memory_space<any>> -> memref<1x128xf32, #tpu.memory_space<any>>
    %827 = tpu.memref_squeeze %826 : memref<1x128xf32, #tpu.memory_space<any>> -> memref<128xf32, #tpu.memory_space<any>>
    %c0_i32_631 = arith.constant 0 : i32
    %828 = tpu.memref_slice %arg4[%c63_i32_628, %c0_i32_631] : memref<64x128xf32, #tpu.memory_space<vmem>> -> memref<1x128xf32, #tpu.memory_space<vmem>>
    %829 = tpu.memref_squeeze %828 : memref<1x128xf32, #tpu.memory_space<vmem>> -> memref<128xf32, #tpu.memory_space<vmem>>
    %830 = tpu.memref_slice %arg5[%c63_i32_629] : memref<64x!tpu.dma_semaphore, #tpu.memory_space<semaphore_mem>> -> memref<1x!tpu.dma_semaphore, #tpu.memory_space<semaphore_mem>>
    %831 = tpu.memref_squeeze %830 : memref<1x!tpu.dma_semaphore, #tpu.memory_space<semaphore_mem>> -> memref<!tpu.dma_semaphore, #tpu.memory_space<semaphore_mem>>
    tpu.wait_dma2 semaphore(%831 : memref<!tpu.dma_semaphore, #tpu.memory_space<semaphore_mem>>) src(%827 : memref<128xf32, #tpu.memory_space<any>>) dst(%829 : memref<128xf32, #tpu.memory_space<vmem>>)
    %c0_632 = arith.constant 0 : index
    %c0_633 = arith.constant 0 : index
    %832 = vector.load %arg4[%c0_632, %c0_633] : memref<64x128xf32, #tpu.memory_space<vmem>>, vector<64x128xf32>
    %833 = vector.shape_cast %832 : vector<64x128xf32> to vector<8x8x128xf32>
    %cst = arith.constant dense<0.000000e+00> : vector<8x128xf32>
    %834 = vector.multi_reduction <add>, %833, %cst [1] : vector<8x8x128xf32> to vector<8x128xf32>
    %cst_634 = arith.constant 8.000000e+00 : f32
    %835 = vector.broadcast %cst_634 : f32 to vector<8x128xf32>
    %836 = arith.divf %834, %835 : vector<8x128xf32>
    %c0_635 = arith.constant 0 : index
    %c0_636 = arith.constant 0 : index
    %837 = vector.load %arg3[%c0_635, %c0_636] : memref<8x128xf32, #tpu.memory_space<vmem>>, vector<8x128xf32>
    tpu.vector_store %arg3[%c0_635, %c0_636], %836 {strides = array<i32>} : memref<8x128xf32, #tpu.memory_space<vmem>>, vector<8x128xf32>,
    return
  }
  func.func @transform_1(%arg0: i32, %arg1: memref<8x8xi32, #tpu.memory_space<smem>>) -> (i32, i32) {
    %c0_i32 = arith.constant 0 : i32
    %c0_i32_0 = arith.constant 0 : i32
    %c0_i32_1 = arith.constant 0 : i32
    return %c0_i32, %c0_i32_0 : i32, i32
  }
}

</mosaic_0001>

<bundles_post_ra>
// kernel: tpu_custom_call.1
= control target key start
LH: loop header
LB: loop body
LE: loop exit
PB: predicated region body
PF: predicated region fallthrough
CT: control target
= control target key end

     0   :  { %s3752_s12 = smov [#allocation5]   ;;  %s4499_s0 = inlined_call_operand.hbm [shape: s32[8,8], index: 0, kind: input, shape index: {}]   ;;  %s4500_s1 = inlined_call_operand.hbm [shape: f32[1024,128], index: 1, kind: input, shape index: {}]   ;;  %s4501_s2 = inlined_call_operand.hbm [shape: f32[8,128], index: 2, kind: output, shape index: {}]  }
   0x1   :  { %s8_s11 = sshll.u32 %s4499_s0, 4  ;;  %s9_s11 = int_to_ptr.hbm [resolvable:$true] %s8_s11 }
   0x2   :  { %11 = dma.hbm_to_smem %s9_s11, 128, %s3752_s12, [#allocation4] }
   0x3   :  { %3620 = dma.done.wait [#allocation4], 128 }
   0x4   :  { %3621 = vsyncadd [#allocation4], 4294967168 }
   0x5   :  { %14 = sfence }
   0x6   :  { %15 = vsyncpa [#allocation7], 0  ;;  %s16_s13 = sld [smem:[#allocation5]]  ;;  %s3753_s14 = smov [#allocation2]  }
   0x7   :  { %s27_s15 = sshll.u32 %s3753_s14, 4  ;;  %s1852_s16 = sld [smem:[#allocation5 + $0x1]]  ;;  %s28_s15 = int_to_ptr.vmem [resolvable:$true] %s27_s15 }
   0x8   :  { %s3754_s17 = smov [#allocation2 + $0x1]   ;;  %s3839_s19 = sld [smem:[#allocation5 + $0x2]] }
   0x9   :  { %s3837_s18 = sshll.u32 %s3754_s17, 4  ;;  %s3755_s0 = smov [#allocation2 + $0x2]   ;;  %s45_s18 = int_to_ptr.vmem [resolvable:$true] %s3837_s18 }
   0xa   :  { %s3842_s20 = sshll.u32 %s3755_s0, 4  ;;  %s3844_s21 = sld [smem:[#allocation5 + $0x3]]  ;;  %s62_s20 = int_to_ptr.vmem [resolvable:$true] %s3842_s20 }
   0xb   :  { %s3856_s6 = scalar_lea.hbm %s4500_s1, 1024 }
   0xc   :  { %s17_s24 = scalar_lea.hbm %s4500_s1, %s16_s13 }
   0xd   :  { %s25_s25 = sshll.u32 %s17_s24, 4  ;;  %s32_s28 = scalar_lea.hbm %s4500_s1, %s1852_s16  ;;  %s26_s25 = int_to_ptr.hbm [resolvable:$true] %s25_s25 }
   0xe   :  { %s42_s29 = sshll.u32 %s32_s28, 4  ;;  %s2060_s30 = sshra.s32 %s26_s25, 4  ;;  %s2061_s30 = int_to_ptr.hbm [resolvable:$true] %s2060_s30  ;;  %s43_s29 = int_to_ptr.hbm [resolvable:$true] %s42_s29 }
   0xf   :  { %s2062_s3 = scalar_lea.hbm %s2061_s30, 1  ;;  %p2065_p1 = scmp.lt.s32.totalorder %s2061_s30, %s4500_s1 }
  0x10   :  { %p2063_p0 = scmp.ne.s32.totalorder %s2061_s30, %s2062_s3  ;;  %p2066_p2 = scmp.lt.s32.totalorder %s3856_s6, %s2062_s3 }
  0x12   :  { %p2067_p3 = por %p2066_p2, %p2065_p1 }
  0x14   :  { %p2068_p4 = pnand %p2067_p3, %p2063_p0 }
  0x16   :  { %2071 = shalt.err (!%p2068_p4)  }
  0x17   :  { %30 = dma.hbm_to_vmem [thread:$0]  %s26_s25, 16, %s28_s15, [#allocation3] }
  0x18   :  { %s49_s11 = scalar_lea.hbm %s4500_s1, %s3839_s19  ;;  %s2084_s12 = sshra.s32 %s43_s29, 4  ;;  %s2085_s12 = int_to_ptr.hbm [resolvable:$true] %s2084_s12 }
  0x19   :  { %s2086_s13 = scalar_lea.hbm %s2085_s12, 1  ;;  %p2089_p6 = scmp.lt.s32.totalorder %s2085_s12, %s4500_s1 }
  0x1a   :  { %p2087_p5 = scmp.ne.s32.totalorder %s2085_s12, %s2086_s13  ;;  %p2090_p7 = scmp.lt.s32.totalorder %s3856_s6, %s2086_s13 }
  0x1c   :  { %p2091_p8 = por %p2090_p7, %p2089_p6 }
  0x1e   :  { %p2092_p9 = pnand %p2091_p8, %p2087_p5 }
  0x20   :  { %2095 = shalt.err (!%p2092_p9)  }
  0x21   :  { %47 = dma.hbm_to_vmem [thread:$0]  %s43_s29, 16, %s45_s18, [#allocation3 + $0x1] }
  0x22   :  { %s59_s15 = sshll.u32 %s49_s11, 4  ;;  %s66_s0 = scalar_lea.hbm %s4500_s1, %s3844_s21  ;;  %s60_s15 = int_to_ptr.hbm [resolvable:$true] %s59_s15 }
  0x23   :  { %s76_s22 = sshll.u32 %s66_s0, 4  ;;  %s2108_s23 = sshra.s32 %s60_s15, 4  ;;  %s2109_s23 = int_to_ptr.hbm [resolvable:$true] %s2108_s23  ;;  %s77_s22 = int_to_ptr.hbm [resolvable:$true] %s76_s22 }
  0x24   :  { %s2110_s24 = scalar_lea.hbm %s2109_s23, 1  ;;  %p2113_p11 = scmp.lt.s32.totalorder %s2109_s23, %s4500_s1 }
  0x25   :  { %p2111_p10 = scmp.ne.s32.totalorder %s2109_s23, %s2110_s24  ;;  %p2114_p12 = scmp.lt.s32.totalorder %s3856_s6, %s2110_s24 }
  0x27   :  { %p2115_p13 = por %p2114_p12, %p2113_p11 }
  0x29   :  { %p2116_p0 = pnand %p2115_p13, %p2111_p10 }
  0x2b   :  { %2119 = shalt.err (!%p2116_p0)  }
  0x2c   :  { %64 = dma.hbm_to_vmem [thread:$0]  %s60_s15, 16, %s62_s20, [#allocation3 + $0x2] }
  0x2d   :  { %s3756_s18 = smov [#allocation2 + $0x3]   ;;  %s1855_s27 = sld [smem:[#allocation5 + $0x4]] }
  0x2e   :  { %s78_s21 = sshll.u32 %s3756_s18, 4  ;;  %s2132_s28 = sshra.s32 %s77_s22, 4  ;;  %s79_s21 = int_to_ptr.vmem [resolvable:$true] %s78_s21  ;;  %s2133_s28 = int_to_ptr.hbm [resolvable:$true] %s2132_s28 }
  0x2f   :  { %s2134_s29 = scalar_lea.hbm %s2133_s28, 1  ;;  %p2137_p2 = scmp.lt.s32.totalorder %s2133_s28, %s4500_s1 }
  0x30   :  { %p2135_p1 = scmp.ne.s32.totalorder %s2133_s28, %s2134_s29  ;;  %p2138_p3 = scmp.lt.s32.totalorder %s3856_s6, %s2134_s29 }
  0x32   :  { %p2139_p4 = por %p2138_p3, %p2137_p2 }
  0x34   :  { %p2140_p5 = pnand %p2139_p4, %p2135_p1 }
  0x36   :  { %2143 = shalt.err (!%p2140_p5)  }
  0x37   :  { %81 = dma.hbm_to_vmem [thread:$0]  %s77_s22, 16, %s79_s21, [#allocation3 + $0x3] }
  0x38   :  { %s3757_s4 = smov [#allocation2 + $0x4]   ;;  %s1856_s5 = sld [smem:[#allocation5 + $0x5]] }
  0x39   :  { %s95_s20 = sshll.u32 %s3757_s4, 4  ;;  %s3758_s7 = smov [#allocation2 + $0x5]   ;;  %s96_s20 = int_to_ptr.vmem [resolvable:$true] %s95_s20 }
  0x3a   :  { %s3886_s8 = sshll.u32 %s3758_s7, 4  ;;  %s1857_s9 = sld [smem:[#allocation5 + $0x6]]  ;;  %s113_s8 = int_to_ptr.vmem [resolvable:$true] %s3886_s8 }
  0x3b   :  { %s83_s12 = scalar_lea.hbm %s4500_s1, %s1855_s27  ;;  %s3759_s14 = smov [#allocation2 + $0x6]  }
  0x3c   :  { %s93_s13 = sshll.u32 %s83_s12, 4  ;;  %s3892_s16 = sshll.u32 %s3759_s14, 4  ;;  %s94_s13 = int_to_ptr.hbm [resolvable:$true] %s93_s13  ;;  %s130_s16 = int_to_ptr.vmem [resolvable:$true] %s3892_s16 }
  0x3d   :  { %s2156_s15 = sshra.s32 %s94_s13, 4  ;;  %s2157_s15 = int_to_ptr.hbm [resolvable:$true] %s2156_s15 }
  0x3e   :  { %s2158_s17 = scalar_lea.hbm %s2157_s15, 1  ;;  %p2161_p7 = scmp.lt.s32.totalorder %s2157_s15, %s4500_s1 }
  0x3f   :  { %p2159_p6 = scmp.ne.s32.totalorder %s2157_s15, %s2158_s17  ;;  %p2162_p8 = scmp.lt.s32.totalorder %s3856_s6, %s2158_s17 }
  0x41   :  { %p2163_p9 = por %p2162_p8, %p2161_p7 }
  0x43   :  { %p2164_p10 = pnand %p2163_p9, %p2159_p6 }
  0x45   :  { %2167 = shalt.err (!%p2164_p10)  }
  0x46   :  { %98 = dma.hbm_to_vmem [thread:$0]  %s94_s13, 16, %s96_s20, [#allocation3 + $0x4] }
  0x47   :  { %s100_s24 = scalar_lea.hbm %s4500_s1, %s1856_s5  ;;  %s117_s21 = scalar_lea.hbm %s4500_s1, %s1857_s9 }
  0x48   :  { %s110_s25 = sshll.u32 %s100_s24, 4  ;;  %s127_s27 = sshll.u32 %s117_s21, 4  ;;  %s111_s25 = int_to_ptr.hbm [resolvable:$true] %s110_s25  ;;  %s128_s27 = int_to_ptr.hbm [resolvable:$true] %s127_s27 }
  0x49   :  { %s2180_s28 = sshra.s32 %s111_s25, 4  ;;  %s2181_s28 = int_to_ptr.hbm [resolvable:$true] %s2180_s28 }
  0x4a   :  { %s2182_s29 = scalar_lea.hbm %s2181_s28, 1  ;;  %p2185_p12 = scmp.lt.s32.totalorder %s2181_s28, %s4500_s1 }
  0x4b   :  { %p2183_p11 = scmp.ne.s32.totalorder %s2181_s28, %s2182_s29  ;;  %p2186_p13 = scmp.lt.s32.totalorder %s3856_s6, %s2182_s29 }
  0x4d   :  { %p2187_p0 = por %p2186_p13, %p2185_p12 }
  0x4f   :  { %p2188_p1 = pnand %p2187_p0, %p2183_p11 }
  0x51   :  { %2191 = shalt.err (!%p2188_p1)  }
  0x52   :  { %115 = dma.hbm_to_vmem [thread:$0]  %s111_s25, 16, %s113_s8, [#allocation3 + $0x5] }
  0x53   :  { %s1858_s4 = sld [smem:[#allocation5 + $0x7]]  ;;  %s2204_s20 = sshra.s32 %s128_s27, 4  ;;  %s2205_s20 = int_to_ptr.hbm [resolvable:$true] %s2204_s20 }
  0x54   :  { %s2206_s5 = scalar_lea.hbm %s2205_s20, 1  ;;  %p2209_p3 = scmp.lt.s32.totalorder %s2205_s20, %s4500_s1 }
  0x55   :  { %p2207_p2 = scmp.ne.s32.totalorder %s2205_s20, %s2206_s5  ;;  %p2210_p4 = scmp.lt.s32.totalorder %s3856_s6, %s2206_s5 }
  0x57   :  { %p2211_p5 = por %p2210_p4, %p2209_p3 }
  0x59   :  { %p2212_p6 = pnand %p2211_p5, %p2207_p2 }
  0x5b   :  { %2215 = shalt.err (!%p2212_p6)  }
  0x5c   :  { %132 = dma.hbm_to_vmem [thread:$0]  %s128_s27, 16, %s130_s16, [#allocation3 + $0x6] }
  0x5d   :  { %s1859_s10 = sld [smem:[#allocation5 + $0x80]]  ;;  %s3760_s11 = smov [#allocation2 + $0x7]  }
  0x5e   :  { %s146_s12 = sshll.u32 %s3760_s11, 4  ;;  %s3761_s8 = smov [#allocation2 + $0x8]   ;;  %s147_s12 = int_to_ptr.vmem [resolvable:$true] %s146_s12 }
  0x5f   :  { %s3915_s13 = sshll.u32 %s3761_s8, 4  ;;  %s3918_s14 = sld [smem:[#allocation5 + $0x81]]  ;;  %s164_s13 = int_to_ptr.vmem [resolvable:$true] %s3915_s13 }
  0x60   :  { %s134_s19 = scalar_lea.hbm %s4500_s1, %s1858_s4  ;;  %s3762_s22 = smov [#allocation2 + $0x9]  }
  0x61   :  { %s144_s0 = sshll.u32 %s134_s19, 4  ;;  %s3923_s23 = sshll.u32 %s3762_s22, 4  ;;  %s145_s0 = int_to_ptr.hbm [resolvable:$true] %s144_s0  ;;  %s181_s23 = int_to_ptr.vmem [resolvable:$true] %s3923_s23 }
  0x62   :  { %s2228_s26 = sshra.s32 %s145_s0, 4  ;;  %s2229_s26 = int_to_ptr.hbm [resolvable:$true] %s2228_s26 }
  0x63   :  { %s151_s25 = scalar_lea.hbm %s4500_s1, %s1859_s10  ;;  %s2230_s18 = scalar_lea.hbm %s2229_s26, 1 }
  0x64   :  { %p2231_p7 = scmp.ne.s32.totalorder %s2229_s26, %s2230_s18  ;;  %p2233_p8 = scmp.lt.s32.totalorder %s2229_s26, %s4500_s1 }
  0x65   :  { %p2234_p9 = scmp.lt.s32.totalorder %s3856_s6, %s2230_s18 }
  0x67   :  { %p2235_p10 = por %p2234_p9, %p2233_p8 }
  0x69   :  { %p2236_p11 = pnand %p2235_p10, %p2231_p7 }
  0x6b   :  { %2239 = shalt.err (!%p2236_p11)  }
  0x6c   :  { %149 = dma.hbm_to_vmem [thread:$0]  %s145_s0, 16, %s147_s12, [#allocation3 + $0x7] }
  0x6d   :  { %s161_s28 = sshll.u32 %s151_s25, 4  ;;  %s168_s3 = scalar_lea.hbm %s4500_s1, %s3918_s14  ;;  %s162_s28 = int_to_ptr.hbm [resolvable:$true] %s161_s28 }
  0x6e   :  { %s2252_s4 = sshra.s32 %s162_s28, 4  ;;  %s2253_s4 = int_to_ptr.hbm [resolvable:$true] %s2252_s4 }
  0x6f   :  { %s2254_s20 = scalar_lea.hbm %s2253_s4, 1  ;;  %p2257_p13 = scmp.lt.s32.totalorder %s2253_s4, %s4500_s1 }
  0x70   :  { %p2255_p12 = scmp.ne.s32.totalorder %s2253_s4, %s2254_s20  ;;  %p2258_p0 = scmp.lt.s32.totalorder %s3856_s6, %s2254_s20 }
  0x72   :  { %p2259_p1 = por %p2258_p0, %p2257_p13 }
  0x74   :  { %p2260_p2 = pnand %p2259_p1, %p2255_p12 }
  0x76   :  { %2263 = shalt.err (!%p2260_p2)  }
  0x77   :  { %166 = dma.hbm_to_vmem [thread:$0]  %s162_s28, 16, %s164_s13, [#allocation3 + $0x8] }
  0x78   :  { %s178_s9 = sshll.u32 %s168_s3, 4  ;;  %s1861_s10 = sld [smem:[#allocation5 + $0x82]]  ;;  %s179_s9 = int_to_ptr.hbm [resolvable:$true] %s178_s9 }
  0x79   :  { %s2276_s11 = sshra.s32 %s179_s9, 4  ;;  %s2277_s11 = int_to_ptr.hbm [resolvable:$true] %s2276_s11 }
  0x7a   :  { %s2278_s12 = scalar_lea.hbm %s2277_s11, 1  ;;  %p2281_p4 = scmp.lt.s32.totalorder %s2277_s11, %s4500_s1 }
  0x7b   :  { %p2279_p3 = scmp.ne.s32.totalorder %s2277_s11, %s2278_s12  ;;  %p2282_p5 = scmp.lt.s32.totalorder %s3856_s6, %s2278_s12 }
  0x7d   :  { %p2283_p6 = por %p2282_p5, %p2281_p4 }
  0x7f   :  { %p2284_p7 = pnand %p2283_p6, %p2279_p3 }
  0x81   :  { %2287 = shalt.err (!%p2284_p7)  }
  0x82   :  { %183 = dma.hbm_to_vmem [thread:$0]  %s179_s9, 16, %s181_s23, [#allocation3 + $0x9] }
  0x83   :  { %s3763_s15 = smov [#allocation2 + $0xa]   ;;  %s1862_s19 = sld [smem:[#allocation5 + $0x83]] }
  0x84   :  { %s197_s17 = sshll.u32 %s3763_s15, 4  ;;  %s3764_s13 = smov [#allocation2 + $0xb]   ;;  %s198_s17 = int_to_ptr.vmem [resolvable:$true] %s197_s17 }
  0x85   :  { %s3947_s0 = sshll.u32 %s3764_s13, 4  ;;  %s1863_s22 = sld [smem:[#allocation5 + $0x84]]  ;;  %s215_s0 = int_to_ptr.vmem [resolvable:$true] %s3947_s0 }
  0x86   :  { %s185_s25 = scalar_lea.hbm %s4500_s1, %s1861_s10  ;;  %s3765_s18 = smov [#allocation2 + $0xc]  }
  0x87   :  { %s195_s26 = sshll.u32 %s185_s25, 4  ;;  %s3953_s21 = sshll.u32 %s3765_s18, 4  ;;  %s196_s26 = int_to_ptr.hbm [resolvable:$true] %s195_s26  ;;  %s232_s21 = int_to_ptr.vmem [resolvable:$true] %s3953_s21 }
  0x88   :  { %s2300_s23 = sshra.s32 %s196_s26, 4  ;;  %s2301_s23 = int_to_ptr.hbm [resolvable:$true] %s2300_s23 }
  0x89   :  { %s2302_s27 = scalar_lea.hbm %s2301_s23, 1  ;;  %p2305_p9 = scmp.lt.s32.totalorder %s2301_s23, %s4500_s1 }
  0x8a   :  { %p2303_p8 = scmp.ne.s32.totalorder %s2301_s23, %s2302_s27  ;;  %p2306_p10 = scmp.lt.s32.totalorder %s3856_s6, %s2302_s27 }
  0x8c   :  { %p2307_p11 = por %p2306_p10, %p2305_p9 }
  0x8e   :  { %p2308_p12 = pnand %p2307_p11, %p2303_p8 }
  0x90   :  { %2311 = shalt.err (!%p2308_p12)  }
  0x91   :  { %200 = dma.hbm_to_vmem [thread:$0]  %s196_s26, 16, %s198_s17, [#allocation3 + $0xa] }
  0x92   :  { %s202_s4 = scalar_lea.hbm %s4500_s1, %s1862_s19  ;;  %s219_s9 = scalar_lea.hbm %s4500_s1, %s1863_s22 }
  0x93   :  { %s212_s20 = sshll.u32 %s202_s4, 4  ;;  %s229_s10 = sshll.u32 %s219_s9, 4  ;;  %s213_s20 = int_to_ptr.hbm [resolvable:$true] %s212_s20  ;;  %s230_s10 = int_to_ptr.hbm [resolvable:$true] %s229_s10 }
  0x94   :  { %s2324_s11 = sshra.s32 %s213_s20, 4  ;;  %s2325_s11 = int_to_ptr.hbm [resolvable:$true] %s2324_s11 }
  0x95   :  { %s2326_s12 = scalar_lea.hbm %s2325_s11, 1  ;;  %p2329_p0 = scmp.lt.s32.totalorder %s2325_s11, %s4500_s1 }
  0x96   :  { %p2327_p13 = scmp.ne.s32.totalorder %s2325_s11, %s2326_s12  ;;  %p2330_p1 = scmp.lt.s32.totalorder %s3856_s6, %s2326_s12 }
  0x98   :  { %p2331_p2 = por %p2330_p1, %p2329_p0 }
  0x9a   :  { %p2332_p3 = pnand %p2331_p2, %p2327_p13 }
  0x9c   :  { %2335 = shalt.err (!%p2332_p3)  }
  0x9d   :  { %217 = dma.hbm_to_vmem [thread:$0]  %s213_s20, 16, %s215_s0, [#allocation3 + $0xb] }
  0x9e   :  { %s1864_s15 = sld [smem:[#allocation5 + $0x85]]  ;;  %s2348_s17 = sshra.s32 %s230_s10, 4  ;;  %s2349_s17 = int_to_ptr.hbm [resolvable:$true] %s2348_s17 }
  0x9f   :  { %s2350_s19 = scalar_lea.hbm %s2349_s17, 1  ;;  %p2353_p5 = scmp.lt.s32.totalorder %s2349_s17, %s4500_s1 }
  0xa0   :  { %p2351_p4 = scmp.ne.s32.totalorder %s2349_s17, %s2350_s19  ;;  %p2354_p6 = scmp.lt.s32.totalorder %s3856_s6, %s2350_s19 }
  0xa2   :  { %p2355_p7 = por %p2354_p6, %p2353_p5 }
  0xa4   :  { %p2356_p8 = pnand %p2355_p7, %p2351_p4 }
  0xa6   :  { %2359 = shalt.err (!%p2356_p8)  }
  0xa7   :  { %234 = dma.hbm_to_vmem [thread:$0]  %s230_s10, 16, %s232_s21, [#allocation3 + $0xc] }
  0xa8   :  { %s1865_s16 = sld [smem:[#allocation5 + $0x86]]  ;;  %s3766_s24 = smov [#allocation2 + $0xd]  }
  0xa9   :  { %s248_s25 = sshll.u32 %s3766_s24, 4  ;;  %s3767_s0 = smov [#allocation2 + $0xe]   ;;  %s249_s25 = int_to_ptr.vmem [resolvable:$true] %s248_s25 }
  0xaa   :  { %s3976_s26 = sshll.u32 %s3767_s0, 4  ;;  %s3979_s18 = sld [smem:[#allocation5 + $0x87]]  ;;  %s266_s26 = int_to_ptr.vmem [resolvable:$true] %s3976_s26 }
  0xab   :  { %s236_s28 = scalar_lea.hbm %s4500_s1, %s1864_s15  ;;  %s3768_s30 = smov [#allocation2 + $0xf]  }
  0xac   :  { %s246_s29 = sshll.u32 %s236_s28, 4  ;;  %s3984_s3 = sshll.u32 %s3768_s30, 4  ;;  %s247_s29 = int_to_ptr.hbm [resolvable:$true] %s246_s29  ;;  %s283_s3 = int_to_ptr.vmem [resolvable:$true] %s3984_s3 }
  0xad   :  { %s2372_s5 = sshra.s32 %s247_s29, 4  ;;  %s2373_s5 = int_to_ptr.hbm [resolvable:$true] %s2372_s5 }
  0xae   :  { %s253_s20 = scalar_lea.hbm %s4500_s1, %s1865_s16  ;;  %s2374_s7 = scalar_lea.hbm %s2373_s5, 1 }
  0xaf   :  { %p2375_p9 = scmp.ne.s32.totalorder %s2373_s5, %s2374_s7  ;;  %p2377_p10 = scmp.lt.s32.totalorder %s2373_s5, %s4500_s1 }
  0xb0   :  { %p2378_p11 = scmp.lt.s32.totalorder %s3856_s6, %s2374_s7 }
  0xb2   :  { %p2379_p12 = por %p2378_p11, %p2377_p10 }
  0xb4   :  { %p2380_p13 = pnand %p2379_p12, %p2375_p9 }
  0xb6   :  { %2383 = shalt.err (!%p2380_p13)  }
  0xb7   :  { %251 = dma.hbm_to_vmem [thread:$0]  %s247_s29, 16, %s249_s25, [#allocation3 + $0xd] }
  0xb8   :  { %s263_s11 = sshll.u32 %s253_s20, 4  ;;  %s270_s14 = scalar_lea.hbm %s4500_s1, %s3979_s18  ;;  %s264_s11 = int_to_ptr.hbm [resolvable:$true] %s263_s11 }
  0xb9   :  { %s2396_s15 = sshra.s32 %s264_s11, 4  ;;  %s2397_s15 = int_to_ptr.hbm [resolvable:$true] %s2396_s15 }
  0xba   :  { %s2398_s17 = scalar_lea.hbm %s2397_s15, 1  ;;  %p2401_p1 = scmp.lt.s32.totalorder %s2397_s15, %s4500_s1 }
  0xbb   :  { %p2399_p0 = scmp.ne.s32.totalorder %s2397_s15, %s2398_s17  ;;  %p2402_p2 = scmp.lt.s32.totalorder %s3856_s6, %s2398_s17 }
  0xbd   :  { %p2403_p3 = por %p2402_p2, %p2401_p1 }
  0xbf   :  { %p2404_p4 = pnand %p2403_p3, %p2399_p0 }
  0xc1   :  { %2407 = shalt.err (!%p2404_p4)  }
  0xc2   :  { %268 = dma.hbm_to_vmem [thread:$0]  %s264_s11, 16, %s266_s26, [#allocation3 + $0xe] }
  0xc3   :  { %s280_s22 = sshll.u32 %s270_s14, 4  ;;  %s1867_s16 = sld [smem:[#allocation5 + $0x100]]  ;;  %s281_s22 = int_to_ptr.hbm [resolvable:$true] %s280_s22 }
  0xc4   :  { %s2420_s24 = sshra.s32 %s281_s22, 4  ;;  %s2421_s24 = int_to_ptr.hbm [resolvable:$true] %s2420_s24 }
  0xc5   :  { %s2422_s25 = scalar_lea.hbm %s2421_s24, 1  ;;  %p2425_p6 = scmp.lt.s32.totalorder %s2421_s24, %s4500_s1 }
  0xc6   :  { %p2423_p5 = scmp.ne.s32.totalorder %s2421_s24, %s2422_s25  ;;  %p2426_p7 = scmp.lt.s32.totalorder %s3856_s6, %s2422_s25 }
  0xc8   :  { %p2427_p8 = por %p2426_p7, %p2425_p6 }
  0xca   :  { %p2428_p9 = pnand %p2427_p8, %p2423_p5 }
  0xcc   :  { %2431 = shalt.err (!%p2428_p9)  }
  0xcd   :  { %285 = dma.hbm_to_vmem [thread:$0]  %s281_s22, 16, %s283_s3, [#allocation3 + $0xf] }
  0xce   :  { %s3769_s23 = smov [#allocation2 + $0x10]   ;;  %s1868_s28 = sld [smem:[#allocation5 + $0x101]] }
  0xcf   :  { %s299_s27 = sshll.u32 %s3769_s23, 4  ;;  %s3770_s26 = smov [#allocation2 + $0x11]   ;;  %s300_s27 = int_to_ptr.vmem [resolvable:$true] %s299_s27 }
  0xd0   :  { %s4008_s29 = sshll.u32 %s3770_s26, 4  ;;  %s1869_s30 = sld [smem:[#allocation5 + $0x102]]  ;;  %s317_s29 = int_to_ptr.vmem [resolvable:$true] %s4008_s29 }
  0xd1   :  { %s287_s20 = scalar_lea.hbm %s4500_s1, %s1867_s16  ;;  %s3771_s7 = smov [#allocation2 + $0x12]  }
  0xd2   :  { %s297_s5 = sshll.u32 %s287_s20, 4  ;;  %s4014_s9 = sshll.u32 %s3771_s7, 4  ;;  %s298_s5 = int_to_ptr.hbm [resolvable:$true] %s297_s5  ;;  %s334_s9 = int_to_ptr.vmem [resolvable:$true] %s4014_s9 }
  0xd3   :  { %s2444_s3 = sshra.s32 %s298_s5, 4  ;;  %s2445_s3 = int_to_ptr.hbm [resolvable:$true] %s2444_s3 }
  0xd4   :  { %s2446_s10 = scalar_lea.hbm %s2445_s3, 1  ;;  %p2449_p11 = scmp.lt.s32.totalorder %s2445_s3, %s4500_s1 }
  0xd5   :  { %p2447_p10 = scmp.ne.s32.totalorder %s2445_s3, %s2446_s10  ;;  %p2450_p12 = scmp.lt.s32.totalorder %s3856_s6, %s2446_s10 }
  0xd7   :  { %p2451_p13 = por %p2450_p12, %p2449_p11 }
  0xd9   :  { %p2452_p0 = pnand %p2451_p13, %p2447_p10 }
  0xdb   :  { %2455 = shalt.err (!%p2452_p0)  }
  0xdc   :  { %302 = dma.hbm_to_vmem [thread:$0]  %s298_s5, 16, %s300_s27, [#allocation3 + $0x10] }
  0xdd   :  { %s304_s15 = scalar_lea.hbm %s4500_s1, %s1868_s28  ;;  %s321_s22 = scalar_lea.hbm %s4500_s1, %s1869_s30 }
  0xde   :  { %s314_s17 = sshll.u32 %s304_s15, 4  ;;  %s331_s16 = sshll.u32 %s321_s22, 4  ;;  %s315_s17 = int_to_ptr.hbm [resolvable:$true] %s314_s17  ;;  %s332_s16 = int_to_ptr.hbm [resolvable:$true] %s331_s16 }
  0xdf   :  { %s2468_s24 = sshra.s32 %s315_s17, 4  ;;  %s2469_s24 = int_to_ptr.hbm [resolvable:$true] %s2468_s24 }
  0xe0   :  { %s2470_s25 = scalar_lea.hbm %s2469_s24, 1  ;;  %p2473_p2 = scmp.lt.s32.totalorder %s2469_s24, %s4500_s1 }
  0xe1   :  { %p2471_p1 = scmp.ne.s32.totalorder %s2469_s24, %s2470_s25  ;;  %p2474_p3 = scmp.lt.s32.totalorder %s3856_s6, %s2470_s25 }
  0xe3   :  { %p2475_p4 = por %p2474_p3, %p2473_p2 }
  0xe5   :  { %p2476_p5 = pnand %p2475_p4, %p2471_p1 }
  0xe7   :  { %2479 = shalt.err (!%p2476_p5)  }
  0xe8   :  { %319 = dma.hbm_to_vmem [thread:$0]  %s315_s17, 16, %s317_s29, [#allocation3 + $0x11] }
  0xe9   :  { %s1870_s23 = sld [smem:[#allocation5 + $0x103]]  ;;  %s2492_s27 = sshra.s32 %s332_s16, 4  ;;  %s2493_s27 = int_to_ptr.hbm [resolvable:$true] %s2492_s27 }
  0xea   :  { %s2494_s28 = scalar_lea.hbm %s2493_s27, 1  ;;  %p2497_p7 = scmp.lt.s32.totalorder %s2493_s27, %s4500_s1 }
  0xeb   :  { %p2495_p6 = scmp.ne.s32.totalorder %s2493_s27, %s2494_s28  ;;  %p2498_p8 = scmp.lt.s32.totalorder %s3856_s6, %s2494_s28 }
  0xed   :  { %p2499_p9 = por %p2498_p8, %p2497_p7 }
  0xef   :  { %p2500_p10 = pnand %p2499_p9, %p2495_p6 }
  0xf1   :  { %2503 = shalt.err (!%p2500_p10)  }
  0xf2   :  { %336 = dma.hbm_to_vmem [thread:$0]  %s332_s16, 16, %s334_s9, [#allocation3 + $0x12] }
  0xf3   :  { %s1871_s21 = sld [smem:[#allocation5 + $0x104]]  ;;  %s3772_s4 = smov [#allocation2 + $0x13]  }
  0xf4   :  { %s350_s20 = sshll.u32 %s3772_s4, 4  ;;  %s3773_s29 = smov [#allocation2 + $0x14]   ;;  %s351_s20 = int_to_ptr.vmem [resolvable:$true] %s350_s20 }
  0xf5   :  { %s4037_s5 = sshll.u32 %s3773_s29, 4  ;;  %s4040_s7 = sld [smem:[#allocation5 + $0x105]]  ;;  %s368_s5 = int_to_ptr.vmem [resolvable:$true] %s4037_s5 }
  0xf6   :  { %s338_s11 = scalar_lea.hbm %s4500_s1, %s1870_s23  ;;  %s3774_s8 = smov [#allocation2 + $0x15]  }
  0xf7   :  { %s348_s12 = sshll.u32 %s338_s11, 4  ;;  %s4045_s14 = sshll.u32 %s3774_s8, 4  ;;  %s349_s12 = int_to_ptr.hbm [resolvable:$true] %s348_s12  ;;  %s385_s14 = int_to_ptr.vmem [resolvable:$true] %s4045_s14 }
  0xf8   :  { %s2516_s19 = sshra.s32 %s349_s12, 4  ;;  %s2517_s19 = int_to_ptr.hbm [resolvable:$true] %s2516_s19 }
  0xf9   :  { %s355_s17 = scalar_lea.hbm %s4500_s1, %s1871_s21  ;;  %s2518_s13 = scalar_lea.hbm %s2517_s19, 1 }
  0xfa   :  { %p2519_p11 = scmp.ne.s32.totalorder %s2517_s19, %s2518_s13  ;;  %p2521_p12 = scmp.lt.s32.totalorder %s2517_s19, %s4500_s1 }
  0xfb   :  { %p2522_p13 = scmp.lt.s32.totalorder %s3856_s6, %s2518_s13 }
  0xfd   :  { %p2523_p0 = por %p2522_p13, %p2521_p12 }
  0xff   :  { %p2524_p1 = pnand %p2523_p0, %p2519_p11 }
 0x101   :  { %2527 = shalt.err (!%p2524_p1)  }
 0x102   :  { %353 = dma.hbm_to_vmem [thread:$0]  %s349_s12, 16, %s351_s20, [#allocation3 + $0x13] }
 0x103   :  { %s365_s24 = sshll.u32 %s355_s17, 4  ;;  %s372_s18 = scalar_lea.hbm %s4500_s1, %s4040_s7  ;;  %s366_s24 = int_to_ptr.hbm [resolvable:$true] %s365_s24 }
 0x104   :  { %s2540_s23 = sshra.s32 %s366_s24, 4  ;;  %s2541_s23 = int_to_ptr.hbm [resolvable:$true] %s2540_s23 }
 0x105   :  { %s2542_s27 = scalar_lea.hbm %s2541_s23, 1  ;;  %p2545_p3 = scmp.lt.s32.totalorder %s2541_s23, %s4500_s1 }
 0x106   :  { %p2543_p2 = scmp.ne.s32.totalorder %s2541_s23, %s2542_s27  ;;  %p2546_p4 = scmp.lt.s32.totalorder %s3856_s6, %s2542_s27 }
 0x108   :  { %p2547_p5 = por %p2546_p4, %p2545_p3 }
 0x10a   :  { %p2548_p6 = pnand %p2547_p5, %p2543_p2 }
 0x10c   :  { %2551 = shalt.err (!%p2548_p6)  }
 0x10d   :  { %370 = dma.hbm_to_vmem [thread:$0]  %s366_s24, 16, %s368_s5, [#allocation3 + $0x14] }
 0x10e   :  { %s382_s30 = sshll.u32 %s372_s18, 4  ;;  %s1873_s21 = sld [smem:[#allocation5 + $0x106]]  ;;  %s383_s30 = int_to_ptr.hbm [resolvable:$true] %s382_s30 }
 0x10f   :  { %s2564_s4 = sshra.s32 %s383_s30, 4  ;;  %s2565_s4 = int_to_ptr.hbm [resolvable:$true] %s2564_s4 }
 0x110   :  { %s2566_s20 = scalar_lea.hbm %s2565_s4, 1  ;;  %p2569_p8 = scmp.lt.s32.totalorder %s2565_s4, %s4500_s1 }
 0x111   :  { %p2567_p7 = scmp.ne.s32.totalorder %s2565_s4, %s2566_s20  ;;  %p2570_p9 = scmp.lt.s32.totalorder %s3856_s6, %s2566_s20 }
 0x113   :  { %p2571_p10 = por %p2570_p9, %p2569_p8 }
 0x115   :  { %p2572_p11 = pnand %p2571_p10, %p2567_p7 }
 0x117   :  { %2575 = shalt.err (!%p2572_p11)  }
 0x118   :  { %387 = dma.hbm_to_vmem [thread:$0]  %s383_s30, 16, %s385_s14, [#allocation3 + $0x15] }
 0x119   :  { %s3775_s3 = smov [#allocation2 + $0x16]   ;;  %s1874_s11 = sld [smem:[#allocation5 + $0x107]] }
 0x11a   :  { %s401_s10 = sshll.u32 %s3775_s3, 4  ;;  %s3776_s5 = smov [#allocation2 + $0x17]   ;;  %s402_s10 = int_to_ptr.vmem [resolvable:$true] %s401_s10 }
 0x11b   :  { %s4069_s12 = sshll.u32 %s3776_s5, 4  ;;  %s1875_s8 = sld [smem:[#allocation5 + $0x180]]  ;;  %s419_s12 = int_to_ptr.vmem [resolvable:$true] %s4069_s12 }
 0x11c   :  { %s389_s17 = scalar_lea.hbm %s4500_s1, %s1873_s21  ;;  %s3777_s13 = smov [#allocation2 + $0x18]  }
 0x11d   :  { %s399_s19 = sshll.u32 %s389_s17, 4  ;;  %s4075_s22 = sshll.u32 %s3777_s13, 4  ;;  %s400_s19 = int_to_ptr.hbm [resolvable:$true] %s399_s19  ;;  %s436_s22 = int_to_ptr.vmem [resolvable:$true] %s4075_s22 }
 0x11e   :  { %s2588_s14 = sshra.s32 %s400_s19, 4  ;;  %s2589_s14 = int_to_ptr.hbm [resolvable:$true] %s2588_s14 }
 0x11f   :  { %s2590_s16 = scalar_lea.hbm %s2589_s14, 1  ;;  %p2593_p13 = scmp.lt.s32.totalorder %s2589_s14, %s4500_s1 }
 0x120   :  { %p2591_p12 = scmp.ne.s32.totalorder %s2589_s14, %s2590_s16  ;;  %p2594_p0 = scmp.lt.s32.totalorder %s3856_s6, %s2590_s16 }
 0x122   :  { %p2595_p1 = por %p2594_p0, %p2593_p13 }
 0x124   :  { %p2596_p2 = pnand %p2595_p1, %p2591_p12 }
 0x126   :  { %2599 = shalt.err (!%p2596_p2)  }
 0x127   :  { %404 = dma.hbm_to_vmem [thread:$0]  %s400_s19, 16, %s402_s10, [#allocation3 + $0x16] }
 0x128   :  { %s406_s23 = scalar_lea.hbm %s4500_s1, %s1874_s11  ;;  %s423_s30 = scalar_lea.hbm %s4500_s1, %s1875_s8 }
 0x129   :  { %s416_s27 = sshll.u32 %s406_s23, 4  ;;  %s433_s21 = sshll.u32 %s423_s30, 4  ;;  %s417_s27 = int_to_ptr.hbm [resolvable:$true] %s416_s27  ;;  %s434_s21 = int_to_ptr.hbm [resolvable:$true] %s433_s21 }
 0x12a   :  { %s2612_s4 = sshra.s32 %s417_s27, 4  ;;  %s2613_s4 = int_to_ptr.hbm [resolvable:$true] %s2612_s4 }
 0x12b   :  { %s2614_s20 = scalar_lea.hbm %s2613_s4, 1  ;;  %p2617_p4 = scmp.lt.s32.totalorder %s2613_s4, %s4500_s1 }
 0x12c   :  { %p2615_p3 = scmp.ne.s32.totalorder %s2613_s4, %s2614_s20  ;;  %p2618_p5 = scmp.lt.s32.totalorder %s3856_s6, %s2614_s20 }
 0x12e   :  { %p2619_p6 = por %p2618_p5, %p2617_p4 }
 0x130   :  { %p2620_p7 = pnand %p2619_p6, %p2615_p3 }
 0x132   :  { %2623 = shalt.err (!%p2620_p7)  }
 0x133   :  { %421 = dma.hbm_to_vmem [thread:$0]  %s417_s27, 16, %s419_s12, [#allocation3 + $0x17] }
 0x134   :  { %s1876_s3 = sld [smem:[#allocation5 + $0x181]]  ;;  %s2636_s10 = sshra.s32 %s434_s21, 4  ;;  %s2637_s10 = int_to_ptr.hbm [resolvable:$true] %s2636_s10 }
 0x135   :  { %s2638_s11 = scalar_lea.hbm %s2637_s10, 1  ;;  %p2641_p9 = scmp.lt.s32.totalorder %s2637_s10, %s4500_s1 }
 0x136   :  { %p2639_p8 = scmp.ne.s32.totalorder %s2637_s10, %s2638_s11  ;;  %p2642_p10 = scmp.lt.s32.totalorder %s3856_s6, %s2638_s11 }
 0x138   :  { %p2643_p11 = por %p2642_p10, %p2641_p9 }
 0x13a   :  { %p2644_p12 = pnand %p2643_p11, %p2639_p8 }
 0x13c   :  { %2647 = shalt.err (!%p2644_p12)  }
 0x13d   :  { %438 = dma.hbm_to_vmem [thread:$0]  %s434_s21, 16, %s436_s22, [#allocation3 + $0x18] }
 0x13e   :  { %s1877_s9 = sld [smem:[#allocation5 + $0x182]]  ;;  %s3778_s15 = smov [#allocation2 + $0x19]  }
 0x13f   :  { %s452_s17 = sshll.u32 %s3778_s15, 4  ;;  %s3779_s12 = smov [#allocation2 + $0x1a]   ;;  %s453_s17 = int_to_ptr.vmem [resolvable:$true] %s452_s17 }
 0x140   :  { %s4098_s19 = sshll.u32 %s3779_s12, 4  ;;  %s4101_s13 = sld [smem:[#allocation5 + $0x183]]  ;;  %s470_s19 = int_to_ptr.vmem [resolvable:$true] %s4098_s19 }
 0x141   :  { %s440_s24 = scalar_lea.hbm %s4500_s1, %s1876_s3  ;;  %s3780_s0 = smov [#allocation2 + $0x1b]  }
 0x142   :  { %s450_s25 = sshll.u32 %s440_s24, 4  ;;  %s4106_s18 = sshll.u32 %s3780_s0, 4  ;;  %s451_s25 = int_to_ptr.hbm [resolvable:$true] %s450_s25  ;;  %s487_s18 = int_to_ptr.vmem [resolvable:$true] %s4106_s18 }
 0x143   :  { %s2660_s28 = sshra.s32 %s451_s25, 4  ;;  %s2661_s28 = int_to_ptr.hbm [resolvable:$true] %s2660_s28 }
 0x144   :  { %s457_s27 = scalar_lea.hbm %s4500_s1, %s1877_s9  ;;  %s2662_s26 = scalar_lea.hbm %s2661_s28, 1 }
 0x145   :  { %p2663_p13 = scmp.ne.s32.totalorder %s2661_s28, %s2662_s26  ;;  %p2665_p0 = scmp.lt.s32.totalorder %s2661_s28, %s4500_s1 }
 0x146   :  { %p2666_p1 = scmp.lt.s32.totalorder %s3856_s6, %s2662_s26 }
 0x148   :  { %p2667_p2 = por %p2666_p1, %p2665_p0 }
 0x14a   :  { %p2668_p3 = pnand %p2667_p2, %p2663_p13 }
 0x14c   :  { %2671 = shalt.err (!%p2668_p3)  }
 0x14d   :  { %455 = dma.hbm_to_vmem [thread:$0]  %s451_s25, 16, %s453_s17, [#allocation3 + $0x19] }
 0x14e   :  { %s467_s4 = sshll.u32 %s457_s27, 4  ;;  %s474_s7 = scalar_lea.hbm %s4500_s1, %s4101_s13  ;;  %s468_s4 = int_to_ptr.hbm [resolvable:$true] %s467_s4 }
 0x14f   :  { %s2684_s3 = sshra.s32 %s468_s4, 4  ;;  %s2685_s3 = int_to_ptr.hbm [resolvable:$true] %s2684_s3 }
 0x150   :  { %s2686_s10 = scalar_lea.hbm %s2685_s3, 1  ;;  %p2689_p5 = scmp.lt.s32.totalorder %s2685_s3, %s4500_s1 }
 0x151   :  { %p2687_p4 = scmp.ne.s32.totalorder %s2685_s3, %s2686_s10  ;;  %p2690_p6 = scmp.lt.s32.totalorder %s3856_s6, %s2686_s10 }
 0x153   :  { %p2691_p7 = por %p2690_p6, %p2689_p5 }
 0x155   :  { %p2692_p8 = pnand %p2691_p7, %p2687_p4 }
 0x157   :  { %2695 = shalt.err (!%p2692_p8)  }
 0x158   :  { %472 = dma.hbm_to_vmem [thread:$0]  %s468_s4, 16, %s470_s19, [#allocation3 + $0x1a] }
 0x159   :  { %s484_s8 = sshll.u32 %s474_s7, 4  ;;  %s1879_s9 = sld [smem:[#allocation5 + $0x184]]  ;;  %s485_s8 = int_to_ptr.hbm [resolvable:$true] %s484_s8 }
 0x15a   :  { %s2708_s15 = sshra.s32 %s485_s8, 4  ;;  %s2709_s15 = int_to_ptr.hbm [resolvable:$true] %s2708_s15 }
 0x15b   :  { %s2710_s17 = scalar_lea.hbm %s2709_s15, 1  ;;  %p2713_p10 = scmp.lt.s32.totalorder %s2709_s15, %s4500_s1 }
 0x15c   :  { %p2711_p9 = scmp.ne.s32.totalorder %s2709_s15, %s2710_s17  ;;  %p2714_p11 = scmp.lt.s32.totalorder %s3856_s6, %s2710_s17 }
 0x15e   :  { %p2715_p12 = por %p2714_p11, %p2713_p10 }
 0x160   :  { %p2716_p13 = pnand %p2715_p12, %p2711_p9 }
 0x162   :  { %2719 = shalt.err (!%p2716_p13)  }
 0x163   :  { %489 = dma.hbm_to_vmem [thread:$0]  %s485_s8, 16, %s487_s18, [#allocation3 + $0x1b] }
 0x164   :  { %s3781_s14 = smov [#allocation2 + $0x1c]   ;;  %s1880_s24 = sld [smem:[#allocation5 + $0x185]] }
 0x165   :  { %s503_s16 = sshll.u32 %s3781_s14, 4  ;;  %s3782_s19 = smov [#allocation2 + $0x1d]   ;;  %s504_s16 = int_to_ptr.vmem [resolvable:$true] %s503_s16 }
 0x166   :  { %s4130_s25 = sshll.u32 %s3782_s19, 4  ;;  %s1881_s0 = sld [smem:[#allocation5 + $0x186]]  ;;  %s521_s25 = int_to_ptr.vmem [resolvable:$true] %s4130_s25 }
 0x167   :  { %s491_s27 = scalar_lea.hbm %s4500_s1, %s1879_s9  ;;  %s3783_s26 = smov [#allocation2 + $0x1e]  }
 0x168   :  { %s501_s28 = sshll.u32 %s491_s27, 4  ;;  %s4136_s30 = sshll.u32 %s3783_s26, 4  ;;  %s502_s28 = int_to_ptr.hbm [resolvable:$true] %s501_s28  ;;  %s538_s30 = int_to_ptr.vmem [resolvable:$true] %s4136_s30 }
 0x169   :  { %s2732_s18 = sshra.s32 %s502_s28, 4  ;;  %s2733_s18 = int_to_ptr.hbm [resolvable:$true] %s2732_s18 }
 0x16a   :  { %s2734_s21 = scalar_lea.hbm %s2733_s18, 1  ;;  %p2737_p1 = scmp.lt.s32.totalorder %s2733_s18, %s4500_s1 }
 0x16b   :  { %p2735_p0 = scmp.ne.s32.totalorder %s2733_s18, %s2734_s21  ;;  %p2738_p2 = scmp.lt.s32.totalorder %s3856_s6, %s2734_s21 }
 0x16d   :  { %p2739_p3 = por %p2738_p2, %p2737_p1 }
 0x16f   :  { %p2740_p4 = pnand %p2739_p3, %p2735_p0 }
 0x171   :  { %2743 = shalt.err (!%p2740_p4)  }
 0x172   :  { %506 = dma.hbm_to_vmem [thread:$0]  %s502_s28, 16, %s504_s16, [#allocation3 + $0x1c] }
 0x173   :  { %s508_s3 = scalar_lea.hbm %s4500_s1, %s1880_s24  ;;  %s525_s8 = scalar_lea.hbm %s4500_s1, %s1881_s0 }
 0x174   :  { %s518_s10 = sshll.u32 %s508_s3, 4  ;;  %s535_s9 = sshll.u32 %s525_s8, 4  ;;  %s519_s10 = int_to_ptr.hbm [resolvable:$true] %s518_s10  ;;  %s536_s9 = int_to_ptr.hbm [resolvable:$true] %s535_s9 }
 0x175   :  { %s2756_s15 = sshra.s32 %s519_s10, 4  ;;  %s2757_s15 = int_to_ptr.hbm [resolvable:$true] %s2756_s15 }
 0x176   :  { %s2758_s17 = scalar_lea.hbm %s2757_s15, 1  ;;  %p2761_p6 = scmp.lt.s32.totalorder %s2757_s15, %s4500_s1 }
 0x177   :  { %p2759_p5 = scmp.ne.s32.totalorder %s2757_s15, %s2758_s17  ;;  %p2762_p7 = scmp.lt.s32.totalorder %s3856_s6, %s2758_s17 }
 0x179   :  { %p2763_p8 = por %p2762_p7, %p2761_p6 }
 0x17b   :  { %p2764_p9 = pnand %p2763_p8, %p2759_p5 }
 0x17d   :  { %2767 = shalt.err (!%p2764_p9)  }
 0x17e   :  { %523 = dma.hbm_to_vmem [thread:$0]  %s519_s10, 16, %s521_s25, [#allocation3 + $0x1d] }
 0x17f   :  { %s1882_s14 = sld [smem:[#allocation5 + $0x187]]  ;;  %s2780_s16 = sshra.s32 %s536_s9, 4  ;;  %s2781_s16 = int_to_ptr.hbm [resolvable:$true] %s2780_s16 }
 0x180   :  { %s2782_s24 = scalar_lea.hbm %s2781_s16, 1  ;;  %p2785_p11 = scmp.lt.s32.totalorder %s2781_s16, %s4500_s1 }
 0x181   :  { %p2783_p10 = scmp.ne.s32.totalorder %s2781_s16, %s2782_s24  ;;  %p2786_p12 = scmp.lt.s32.totalorder %s3856_s6, %s2782_s24 }
 0x183   :  { %p2787_p13 = por %p2786_p12, %p2785_p11 }
 0x185   :  { %p2788_p0 = pnand %p2787_p13, %p2783_p10 }
 0x187   :  { %2791 = shalt.err (!%p2788_p0)  }
 0x188   :  { %540 = dma.hbm_to_vmem [thread:$0]  %s536_s9, 16, %s538_s30, [#allocation3 + $0x1e] }
 0x189   :  { %s1883_s22 = sld [smem:[#allocation5 + $0x200]]  ;;  %s3784_s23 = smov [#allocation2 + $0x1f]  }
 0x18a   :  { %s554_s27 = sshll.u32 %s3784_s23, 4  ;;  %s3785_s25 = smov [#allocation2 + $0x20]   ;;  %s555_s27 = int_to_ptr.vmem [resolvable:$true] %s554_s27 }
 0x18b   :  { %s4159_s28 = sshll.u32 %s3785_s25, 4  ;;  %s4162_s26 = sld [smem:[#allocation5 + $0x201]]  ;;  %s572_s28 = int_to_ptr.vmem [resolvable:$true] %s4159_s28 }
 0x18c   :  { %s542_s4 = scalar_lea.hbm %s4500_s1, %s1882_s14  ;;  %s3786_s29 = smov [#allocation2 + $0x21]  }
 0x18d   :  { %s552_s20 = sshll.u32 %s542_s4, 4  ;;  %s4167_s7 = sshll.u32 %s3786_s29, 4  ;;  %s553_s20 = int_to_ptr.hbm [resolvable:$true] %s552_s20  ;;  %s589_s7 = int_to_ptr.vmem [resolvable:$true] %s4167_s7 }
 0x18e   :  { %s2804_s11 = sshra.s32 %s553_s20, 4  ;;  %s2805_s11 = int_to_ptr.hbm [resolvable:$true] %s2804_s11 }
 0x18f   :  { %s559_s10 = scalar_lea.hbm %s4500_s1, %s1883_s22  ;;  %s2806_s5 = scalar_lea.hbm %s2805_s11, 1 }
 0x190   :  { %p2807_p1 = scmp.ne.s32.totalorder %s2805_s11, %s2806_s5  ;;  %p2809_p2 = scmp.lt.s32.totalorder %s2805_s11, %s4500_s1 }
 0x191   :  { %p2810_p3 = scmp.lt.s32.totalorder %s3856_s6, %s2806_s5 }
 0x193   :  { %p2811_p4 = por %p2810_p3, %p2809_p2 }
 0x195   :  { %p2812_p5 = pnand %p2811_p4, %p2807_p1 }
 0x197   :  { %2815 = shalt.err (!%p2812_p5)  }
 0x198   :  { %557 = dma.hbm_to_vmem [thread:$0]  %s553_s20, 16, %s555_s27, [#allocation3 + $0x1f] }
 0x199   :  { %s569_s15 = sshll.u32 %s559_s10, 4  ;;  %s576_s13 = scalar_lea.hbm %s4500_s1, %s4162_s26  ;;  %s570_s15 = int_to_ptr.hbm [resolvable:$true] %s569_s15 }
 0x19a   :  { %s2828_s14 = sshra.s32 %s570_s15, 4  ;;  %s2829_s14 = int_to_ptr.hbm [resolvable:$true] %s2828_s14 }
 0x19b   :  { %s2830_s16 = scalar_lea.hbm %s2829_s14, 1  ;;  %p2833_p7 = scmp.lt.s32.totalorder %s2829_s14, %s4500_s1 }
 0x19c   :  { %p2831_p6 = scmp.ne.s32.totalorder %s2829_s14, %s2830_s16  ;;  %p2834_p8 = scmp.lt.s32.totalorder %s3856_s6, %s2830_s16 }
 0x19e   :  { %p2835_p9 = por %p2834_p8, %p2833_p7 }
 0x1a0   :  { %p2836_p10 = pnand %p2835_p9, %p2831_p6 }
 0x1a2   :  { %2839 = shalt.err (!%p2836_p10)  }
 0x1a3   :  { %574 = dma.hbm_to_vmem [thread:$0]  %s570_s15, 16, %s572_s28, [#allocation3 + $0x20] }
 0x1a4   :  { %s586_s0 = sshll.u32 %s576_s13, 4  ;;  %s1885_s22 = sld [smem:[#allocation5 + $0x202]]  ;;  %s587_s0 = int_to_ptr.hbm [resolvable:$true] %s586_s0 }
 0x1a5   :  { %s2852_s23 = sshra.s32 %s587_s0, 4  ;;  %s2853_s23 = int_to_ptr.hbm [resolvable:$true] %s2852_s23 }
 0x1a6   :  { %s2854_s27 = scalar_lea.hbm %s2853_s23, 1  ;;  %p2857_p12 = scmp.lt.s32.totalorder %s2853_s23, %s4500_s1 }
 0x1a7   :  { %p2855_p11 = scmp.ne.s32.totalorder %s2853_s23, %s2854_s27  ;;  %p2858_p13 = scmp.lt.s32.totalorder %s3856_s6, %s2854_s27 }
 0x1a9   :  { %p2859_p0 = por %p2858_p13, %p2857_p12 }
 0x1ab   :  { %p2860_p1 = pnand %p2859_p0, %p2855_p11 }
 0x1ad   :  { %2863 = shalt.err (!%p2860_p1)  }
 0x1ae   :  { %591 = dma.hbm_to_vmem [thread:$0]  %s587_s0, 16, %s589_s7, [#allocation3 + $0x21] }
 0x1af   :  { %s3787_s18 = smov [#allocation2 + $0x22]   ;;  %s1886_s4 = sld [smem:[#allocation5 + $0x203]] }
 0x1b0   :  { %s605_s21 = sshll.u32 %s3787_s18, 4  ;;  %s3788_s28 = smov [#allocation2 + $0x23]   ;;  %s606_s21 = int_to_ptr.vmem [resolvable:$true] %s605_s21 }
 0x1b1   :  { %s4191_s20 = sshll.u32 %s3788_s28, 4  ;;  %s1887_s29 = sld [smem:[#allocation5 + $0x204]]  ;;  %s623_s20 = int_to_ptr.vmem [resolvable:$true] %s4191_s20 }
 0x1b2   :  { %s593_s10 = scalar_lea.hbm %s4500_s1, %s1885_s22  ;;  %s3789_s5 = smov [#allocation2 + $0x24]  }
 0x1b3   :  { %s603_s11 = sshll.u32 %s593_s10, 4  ;;  %s4197_s8 = sshll.u32 %s3789_s5, 4  ;;  %s604_s11 = int_to_ptr.hbm [resolvable:$true] %s603_s11  ;;  %s640_s8 = int_to_ptr.vmem [resolvable:$true] %s4197_s8 }
 0x1b4   :  { %s2876_s7 = sshra.s32 %s604_s11, 4  ;;  %s2877_s7 = int_to_ptr.hbm [resolvable:$true] %s2876_s7 }
 0x1b5   :  { %s2878_s9 = scalar_lea.hbm %s2877_s7, 1  ;;  %p2881_p3 = scmp.lt.s32.totalorder %s2877_s7, %s4500_s1 }
 0x1b6   :  { %p2879_p2 = scmp.ne.s32.totalorder %s2877_s7, %s2878_s9  ;;  %p2882_p4 = scmp.lt.s32.totalorder %s3856_s6, %s2878_s9 }
 0x1b8   :  { %p2883_p5 = por %p2882_p4, %p2881_p3 }
 0x1ba   :  { %p2884_p6 = pnand %p2883_p5, %p2879_p2 }
 0x1bc   :  { %2887 = shalt.err (!%p2884_p6)  }
 0x1bd   :  { %608 = dma.hbm_to_vmem [thread:$0]  %s604_s11, 16, %s606_s21, [#allocation3 + $0x22] }
 0x1be   :  { %s610_s14 = scalar_lea.hbm %s4500_s1, %s1886_s4  ;;  %s627_s0 = scalar_lea.hbm %s4500_s1, %s1887_s29 }
 0x1bf   :  { %s620_s16 = sshll.u32 %s610_s14, 4  ;;  %s637_s22 = sshll.u32 %s627_s0, 4  ;;  %s621_s16 = int_to_ptr.hbm [resolvable:$true] %s620_s16  ;;  %s638_s22 = int_to_ptr.hbm [resolvable:$true] %s637_s22 }
 0x1c0   :  { %s2900_s23 = sshra.s32 %s621_s16, 4  ;;  %s2901_s23 = int_to_ptr.hbm [resolvable:$true] %s2900_s23 }
 0x1c1   :  { %s2902_s27 = scalar_lea.hbm %s2901_s23, 1  ;;  %p2905_p8 = scmp.lt.s32.totalorder %s2901_s23, %s4500_s1 }
 0x1c2   :  { %p2903_p7 = scmp.ne.s32.totalorder %s2901_s23, %s2902_s27  ;;  %p2906_p9 = scmp.lt.s32.totalorder %s3856_s6, %s2902_s27 }
 0x1c4   :  { %p2907_p10 = por %p2906_p9, %p2905_p8 }
 0x1c6   :  { %p2908_p11 = pnand %p2907_p10, %p2903_p7 }
 0x1c8   :  { %2911 = shalt.err (!%p2908_p11)  }
 0x1c9   :  { %625 = dma.hbm_to_vmem [thread:$0]  %s621_s16, 16, %s623_s20, [#allocation3 + $0x23] }
 0x1ca   :  { %s1888_s18 = sld [smem:[#allocation5 + $0x205]]  ;;  %s2924_s21 = sshra.s32 %s638_s22, 4  ;;  %s2925_s21 = int_to_ptr.hbm [resolvable:$true] %s2924_s21 }
 0x1cb   :  { %s2926_s4 = scalar_lea.hbm %s2925_s21, 1  ;;  %p2929_p13 = scmp.lt.s32.totalorder %s2925_s21, %s4500_s1 }
 0x1cc   :  { %p2927_p12 = scmp.ne.s32.totalorder %s2925_s21, %s2926_s4  ;;  %p2930_p0 = scmp.lt.s32.totalorder %s3856_s6, %s2926_s4 }
 0x1ce   :  { %p2931_p1 = por %p2930_p0, %p2929_p13 }
 0x1d0   :  { %p2932_p2 = pnand %p2931_p1, %p2927_p12 }
 0x1d2   :  { %2935 = shalt.err (!%p2932_p2)  }
 0x1d3   :  { %642 = dma.hbm_to_vmem [thread:$0]  %s638_s22, 16, %s640_s8, [#allocation3 + $0x24] }
 0x1d4   :  { %s1889_s30 = sld [smem:[#allocation5 + $0x206]]  ;;  %s3790_s3 = smov [#allocation2 + $0x25]  }
 0x1d5   :  { %s656_s10 = sshll.u32 %s3790_s3, 4  ;;  %s3791_s20 = smov [#allocation2 + $0x26]   ;;  %s657_s10 = int_to_ptr.vmem [resolvable:$true] %s656_s10 }
 0x1d6   :  { %s4220_s11 = sshll.u32 %s3791_s20, 4  ;;  %s4223_s5 = sld [smem:[#allocation5 + $0x207]]  ;;  %s674_s11 = int_to_ptr.vmem [resolvable:$true] %s4220_s11 }
 0x1d7   :  { %s644_s15 = scalar_lea.hbm %s4500_s1, %s1888_s18  ;;  %s3792_s12 = smov [#allocation2 + $0x27]  }
 0x1d8   :  { %s654_s17 = sshll.u32 %s644_s15, 4  ;;  %s4228_s13 = sshll.u32 %s3792_s12, 4  ;;  %s655_s17 = int_to_ptr.hbm [resolvable:$true] %s654_s17  ;;  %s691_s13 = int_to_ptr.vmem [resolvable:$true] %s4228_s13 }
 0x1d9   :  { %s2948_s24 = sshra.s32 %s655_s17, 4  ;;  %s2949_s24 = int_to_ptr.hbm [resolvable:$true] %s2948_s24 }
 0x1da   :  { %s661_s16 = scalar_lea.hbm %s4500_s1, %s1889_s30  ;;  %s2950_s19 = scalar_lea.hbm %s2949_s24, 1 }
 0x1db   :  { %p2951_p3 = scmp.ne.s32.totalorder %s2949_s24, %s2950_s19  ;;  %p2953_p4 = scmp.lt.s32.totalorder %s2949_s24, %s4500_s1 }
 0x1dc   :  { %p2954_p5 = scmp.lt.s32.totalorder %s3856_s6, %s2950_s19 }
 0x1de   :  { %p2955_p6 = por %p2954_p5, %p2953_p4 }
 0x1e0   :  { %p2956_p7 = pnand %p2955_p6, %p2951_p3 }
 0x1e2   :  { %2959 = shalt.err (!%p2956_p7)  }
 0x1e3   :  { %659 = dma.hbm_to_vmem [thread:$0]  %s655_s17, 16, %s657_s10, [#allocation3 + $0x25] }
 0x1e4   :  { %s671_s23 = sshll.u32 %s661_s16, 4  ;;  %s678_s26 = scalar_lea.hbm %s4500_s1, %s4223_s5  ;;  %s672_s23 = int_to_ptr.hbm [resolvable:$true] %s671_s23 }
 0x1e5   :  { %s2972_s18 = sshra.s32 %s672_s23, 4  ;;  %s2973_s18 = int_to_ptr.hbm [resolvable:$true] %s2972_s18 }
 0x1e6   :  { %s2974_s21 = scalar_lea.hbm %s2973_s18, 1  ;;  %p2977_p9 = scmp.lt.s32.totalorder %s2973_s18, %s4500_s1 }
 0x1e7   :  { %p2975_p8 = scmp.ne.s32.totalorder %s2973_s18, %s2974_s21  ;;  %p2978_p10 = scmp.lt.s32.totalorder %s3856_s6, %s2974_s21 }
 0x1e9   :  { %p2979_p11 = por %p2978_p10, %p2977_p9 }
 0x1eb   :  { %p2980_p12 = pnand %p2979_p11, %p2975_p8 }
 0x1ed   :  { %2983 = shalt.err (!%p2980_p12)  }
 0x1ee   :  { %676 = dma.hbm_to_vmem [thread:$0]  %s672_s23, 16, %s674_s11, [#allocation3 + $0x26] }
 0x1ef   :  { %s688_s29 = sshll.u32 %s678_s26, 4  ;;  %s1891_s30 = sld [smem:[#allocation5 + $0x280]]  ;;  %s689_s29 = int_to_ptr.hbm [resolvable:$true] %s688_s29 }
 0x1f0   :  { %s2996_s3 = sshra.s32 %s689_s29, 4  ;;  %s2997_s3 = int_to_ptr.hbm [resolvable:$true] %s2996_s3 }
 0x1f1   :  { %s2998_s10 = scalar_lea.hbm %s2997_s3, 1  ;;  %p3001_p0 = scmp.lt.s32.totalorder %s2997_s3, %s4500_s1 }
 0x1f2   :  { %p2999_p13 = scmp.ne.s32.totalorder %s2997_s3, %s2998_s10  ;;  %p3002_p1 = scmp.lt.s32.totalorder %s3856_s6, %s2998_s10 }
 0x1f4   :  { %p3003_p2 = por %p3002_p1, %p3001_p0 }
 0x1f6   :  { %p3004_p3 = pnand %p3003_p2, %p2999_p13 }
 0x1f8   :  { %3007 = shalt.err (!%p3004_p3)  }
 0x1f9   :  { %693 = dma.hbm_to_vmem [thread:$0]  %s689_s29, 16, %s691_s13, [#allocation3 + $0x27] }
 0x1fa   :  { %s3793_s7 = smov [#allocation2 + $0x28]   ;;  %s1892_s15 = sld [smem:[#allocation5 + $0x281]] }
 0x1fb   :  { %s707_s9 = sshll.u32 %s3793_s7, 4  ;;  %s3794_s11 = smov [#allocation2 + $0x29]   ;;  %s708_s9 = int_to_ptr.vmem [resolvable:$true] %s707_s9 }
 0x1fc   :  { %s4252_s17 = sshll.u32 %s3794_s11, 4  ;;  %s1893_s12 = sld [smem:[#allocation5 + $0x282]]  ;;  %s725_s17 = int_to_ptr.vmem [resolvable:$true] %s4252_s17 }
 0x1fd   :  { %s695_s16 = scalar_lea.hbm %s4500_s1, %s1891_s30  ;;  %s3795_s19 = smov [#allocation2 + $0x2a]  }
 0x1fe   :  { %s705_s24 = sshll.u32 %s695_s16, 4  ;;  %s4258_s0 = sshll.u32 %s3795_s19, 4  ;;  %s706_s24 = int_to_ptr.hbm [resolvable:$true] %s705_s24  ;;  %s742_s0 = int_to_ptr.vmem [resolvable:$true] %s4258_s0 }
 0x1ff   :  { %s3020_s13 = sshra.s32 %s706_s24, 4  ;;  %s3021_s13 = int_to_ptr.hbm [resolvable:$true] %s3020_s13 }
 0x200   :  { %s3022_s22 = scalar_lea.hbm %s3021_s13, 1  ;;  %p3025_p5 = scmp.lt.s32.totalorder %s3021_s13, %s4500_s1 }
 0x201   :  { %p3023_p4 = scmp.ne.s32.totalorder %s3021_s13, %s3022_s22  ;;  %p3026_p6 = scmp.lt.s32.totalorder %s3856_s6, %s3022_s22 }
 0x203   :  { %p3027_p7 = por %p3026_p6, %p3025_p5 }
 0x205   :  { %p3028_p8 = pnand %p3027_p7, %p3023_p4 }
 0x207   :  { %3031 = shalt.err (!%p3028_p8)  }
 0x208   :  { %710 = dma.hbm_to_vmem [thread:$0]  %s706_s24, 16, %s708_s9, [#allocation3 + $0x28] }
 0x209   :  { %s712_s18 = scalar_lea.hbm %s4500_s1, %s1892_s15  ;;  %s729_s29 = scalar_lea.hbm %s4500_s1, %s1893_s12 }
 0x20a   :  { %s722_s21 = sshll.u32 %s712_s18, 4  ;;  %s739_s30 = sshll.u32 %s729_s29, 4  ;;  %s723_s21 = int_to_ptr.hbm [resolvable:$true] %s722_s21  ;;  %s740_s30 = int_to_ptr.hbm [resolvable:$true] %s739_s30 }
 0x20b   :  { %s3044_s3 = sshra.s32 %s723_s21, 4  ;;  %s3045_s3 = int_to_ptr.hbm [resolvable:$true] %s3044_s3 }
 0x20c   :  { %s3046_s10 = scalar_lea.hbm %s3045_s3, 1  ;;  %p3049_p10 = scmp.lt.s32.totalorder %s3045_s3, %s4500_s1 }
 0x20d   :  { %p3047_p9 = scmp.ne.s32.totalorder %s3045_s3, %s3046_s10  ;;  %p3050_p11 = scmp.lt.s32.totalorder %s3856_s6, %s3046_s10 }
 0x20f   :  { %p3051_p12 = por %p3050_p11, %p3049_p10 }
 0x211   :  { %p3052_p13 = pnand %p3051_p12, %p3047_p9 }
 0x213   :  { %3055 = shalt.err (!%p3052_p13)  }
 0x214   :  { %727 = dma.hbm_to_vmem [thread:$0]  %s723_s21, 16, %s725_s17, [#allocation3 + $0x29] }
 0x215   :  { %s1894_s7 = sld [smem:[#allocation5 + $0x283]]  ;;  %s3068_s9 = sshra.s32 %s740_s30, 4  ;;  %s3069_s9 = int_to_ptr.hbm [resolvable:$true] %s3068_s9 }
 0x216   :  { %s3070_s15 = scalar_lea.hbm %s3069_s9, 1  ;;  %p3073_p1 = scmp.lt.s32.totalorder %s3069_s9, %s4500_s1 }
 0x217   :  { %p3071_p0 = scmp.ne.s32.totalorder %s3069_s9, %s3070_s15  ;;  %p3074_p2 = scmp.lt.s32.totalorder %s3856_s6, %s3070_s15 }
 0x219   :  { %p3075_p3 = por %p3074_p2, %p3073_p1 }
 0x21b   :  { %p3076_p4 = pnand %p3075_p3, %p3071_p0 }
 0x21d   :  { %3079 = shalt.err (!%p3076_p4)  }
 0x21e   :  { %744 = dma.hbm_to_vmem [thread:$0]  %s740_s30, 16, %s742_s0, [#allocation3 + $0x2a] }
 0x21f   :  { %s1895_s8 = sld [smem:[#allocation5 + $0x284]]  ;;  %s3796_s14 = smov [#allocation2 + $0x2b]  }
 0x220   :  { %s758_s16 = sshll.u32 %s3796_s14, 4  ;;  %s3797_s17 = smov [#allocation2 + $0x2c]   ;;  %s759_s16 = int_to_ptr.vmem [resolvable:$true] %s758_s16 }
 0x221   :  { %s4281_s24 = sshll.u32 %s3797_s17, 4  ;;  %s4284_s19 = sld [smem:[#allocation5 + $0x285]]  ;;  %s776_s24 = int_to_ptr.vmem [resolvable:$true] %s4281_s24 }
 0x222   :  { %s746_s23 = scalar_lea.hbm %s4500_s1, %s1894_s7  ;;  %s3798_s25 = smov [#allocation2 + $0x2d]  }
 0x223   :  { %s756_s27 = sshll.u32 %s746_s23, 4  ;;  %s4289_s26 = sshll.u32 %s3798_s25, 4  ;;  %s757_s27 = int_to_ptr.hbm [resolvable:$true] %s756_s27  ;;  %s793_s26 = int_to_ptr.vmem [resolvable:$true] %s4289_s26 }
 0x224   :  { %s3092_s4 = sshra.s32 %s757_s27, 4  ;;  %s3093_s4 = int_to_ptr.hbm [resolvable:$true] %s3092_s4 }
 0x225   :  { %s763_s21 = scalar_lea.hbm %s4500_s1, %s1895_s8  ;;  %s3094_s28 = scalar_lea.hbm %s3093_s4, 1 }
 0x226   :  { %p3095_p5 = scmp.ne.s32.totalorder %s3093_s4, %s3094_s28  ;;  %p3097_p6 = scmp.lt.s32.totalorder %s3093_s4, %s4500_s1 }
 0x227   :  { %p3098_p7 = scmp.lt.s32.totalorder %s3856_s6, %s3094_s28 }
 0x229   :  { %p3099_p8 = por %p3098_p7, %p3097_p6 }
 0x22b   :  { %p3100_p9 = pnand %p3099_p8, %p3095_p5 }
 0x22d   :  { %3103 = shalt.err (!%p3100_p9)  }
 0x22e   :  { %761 = dma.hbm_to_vmem [thread:$0]  %s757_s27, 16, %s759_s16, [#allocation3 + $0x2b] }
 0x22f   :  { %s773_s3 = sshll.u32 %s763_s21, 4  ;;  %s780_s5 = scalar_lea.hbm %s4500_s1, %s4284_s19  ;;  %s774_s3 = int_to_ptr.hbm [resolvable:$true] %s773_s3 }
 0x230   :  { %s3116_s7 = sshra.s32 %s774_s3, 4  ;;  %s3117_s7 = int_to_ptr.hbm [resolvable:$true] %s3116_s7 }
 0x231   :  { %s3118_s9 = scalar_lea.hbm %s3117_s7, 1  ;;  %p3121_p11 = scmp.lt.s32.totalorder %s3117_s7, %s4500_s1 }
 0x232   :  { %p3119_p10 = scmp.ne.s32.totalorder %s3117_s7, %s3118_s9  ;;  %p3122_p12 = scmp.lt.s32.totalorder %s3856_s6, %s3118_s9 }
 0x234   :  { %p3123_p13 = por %p3122_p12, %p3121_p11 }
 0x236   :  { %p3124_p0 = pnand %p3123_p13, %p3119_p10 }
 0x238   :  { %3127 = shalt.err (!%p3124_p0)  }
 0x239   :  { %778 = dma.hbm_to_vmem [thread:$0]  %s774_s3, 16, %s776_s24, [#allocation3 + $0x2c] }
 0x23a   :  { %s790_s12 = sshll.u32 %s780_s5, 4  ;;  %s1897_s8 = sld [smem:[#allocation5 + $0x286]]  ;;  %s791_s12 = int_to_ptr.hbm [resolvable:$true] %s790_s12 }
 0x23b   :  { %s3140_s14 = sshra.s32 %s791_s12, 4  ;;  %s3141_s14 = int_to_ptr.hbm [resolvable:$true] %s3140_s14 }
 0x23c   :  { %s3142_s16 = scalar_lea.hbm %s3141_s14, 1  ;;  %p3145_p2 = scmp.lt.s32.totalorder %s3141_s14, %s4500_s1 }
 0x23d   :  { %p3143_p1 = scmp.ne.s32.totalorder %s3141_s14, %s3142_s16  ;;  %p3146_p3 = scmp.lt.s32.totalorder %s3856_s6, %s3142_s16 }
 0x23f   :  { %p3147_p4 = por %p3146_p3, %p3145_p2 }
 0x241   :  { %p3148_p5 = pnand %p3147_p4, %p3143_p1 }
 0x243   :  { %3151 = shalt.err (!%p3148_p5)  }
 0x244   :  { %795 = dma.hbm_to_vmem [thread:$0]  %s791_s12, 16, %s793_s26, [#allocation3 + $0x2d] }
 0x245   :  { %s3799_s13 = smov [#allocation2 + $0x2e]   ;;  %s1898_s23 = sld [smem:[#allocation5 + $0x287]] }
 0x246   :  { %s809_s22 = sshll.u32 %s3799_s13, 4  ;;  %s3800_s24 = smov [#allocation2 + $0x2f]   ;;  %s810_s22 = int_to_ptr.vmem [resolvable:$true] %s809_s22 }
 0x247   :  { %s4313_s27 = sshll.u32 %s3800_s24, 4  ;;  %s1899_s25 = sld [smem:[#allocation5 + $0x300]]  ;;  %s827_s27 = int_to_ptr.vmem [resolvable:$true] %s4313_s27 }
 0x248   :  { %s797_s21 = scalar_lea.hbm %s4500_s1, %s1897_s8  ;;  %s3801_s28 = smov [#allocation2 + $0x30]  }
 0x249   :  { %s807_s4 = sshll.u32 %s797_s21, 4  ;;  %s4319_s29 = sshll.u32 %s3801_s28, 4  ;;  %s808_s4 = int_to_ptr.hbm [resolvable:$true] %s807_s4  ;;  %s844_s29 = int_to_ptr.vmem [resolvable:$true] %s4319_s29 }
 0x24a   :  { %s3164_s26 = sshra.s32 %s808_s4, 4  ;;  %s3165_s26 = int_to_ptr.hbm [resolvable:$true] %s3164_s26 }
 0x24b   :  { %s3166_s30 = scalar_lea.hbm %s3165_s26, 1  ;;  %p3169_p7 = scmp.lt.s32.totalorder %s3165_s26, %s4500_s1 }
 0x24c   :  { %p3167_p6 = scmp.ne.s32.totalorder %s3165_s26, %s3166_s30  ;;  %p3170_p8 = scmp.lt.s32.totalorder %s3856_s6, %s3166_s30 }
 0x24e   :  { %p3171_p9 = por %p3170_p8, %p3169_p7 }
 0x250   :  { %p3172_p10 = pnand %p3171_p9, %p3167_p6 }
 0x252   :  { %3175 = shalt.err (!%p3172_p10)  }
 0x253   :  { %812 = dma.hbm_to_vmem [thread:$0]  %s808_s4, 16, %s810_s22, [#allocation3 + $0x2e] }
 0x254   :  { %s814_s7 = scalar_lea.hbm %s4500_s1, %s1898_s23  ;;  %s831_s12 = scalar_lea.hbm %s4500_s1, %s1899_s25 }
 0x255   :  { %s824_s9 = sshll.u32 %s814_s7, 4  ;;  %s841_s8 = sshll.u32 %s831_s12, 4  ;;  %s825_s9 = int_to_ptr.hbm [resolvable:$true] %s824_s9  ;;  %s842_s8 = int_to_ptr.hbm [resolvable:$true] %s841_s8 }
 0x256   :  { %s3188_s14 = sshra.s32 %s825_s9, 4  ;;  %s3189_s14 = int_to_ptr.hbm [resolvable:$true] %s3188_s14 }
 0x257   :  { %s3190_s16 = scalar_lea.hbm %s3189_s14, 1  ;;  %p3193_p12 = scmp.lt.s32.totalorder %s3189_s14, %s4500_s1 }
 0x258   :  { %p3191_p11 = scmp.ne.s32.totalorder %s3189_s14, %s3190_s16  ;;  %p3194_p13 = scmp.lt.s32.totalorder %s3856_s6, %s3190_s16 }
 0x25a   :  { %p3195_p0 = por %p3194_p13, %p3193_p12 }
 0x25c   :  { %p3196_p1 = pnand %p3195_p0, %p3191_p11 }
 0x25e   :  { %3199 = shalt.err (!%p3196_p1)  }
 0x25f   :  { %829 = dma.hbm_to_vmem [thread:$0]  %s825_s9, 16, %s827_s27, [#allocation3 + $0x2f] }
 0x260   :  { %s1900_s13 = sld [smem:[#allocation5 + $0x301]]  ;;  %s3212_s22 = sshra.s32 %s842_s8, 4  ;;  %s3213_s22 = int_to_ptr.hbm [resolvable:$true] %s3212_s22 }
 0x261   :  { %s3214_s23 = scalar_lea.hbm %s3213_s22, 1  ;;  %p3217_p3 = scmp.lt.s32.totalorder %s3213_s22, %s4500_s1 }
 0x262   :  { %p3215_p2 = scmp.ne.s32.totalorder %s3213_s22, %s3214_s23  ;;  %p3218_p4 = scmp.lt.s32.totalorder %s3856_s6, %s3214_s23 }
 0x264   :  { %p3219_p5 = por %p3218_p4, %p3217_p3 }
 0x266   :  { %p3220_p6 = pnand %p3219_p5, %p3215_p2 }
 0x268   :  { %3223 = shalt.err (!%p3220_p6)  }
 0x269   :  { %846 = dma.hbm_to_vmem [thread:$0]  %s842_s8, 16, %s844_s29, [#allocation3 + $0x30] }
 0x26a   :  { %s1901_s0 = sld [smem:[#allocation5 + $0x302]]  ;;  %s3802_s18 = smov [#allocation2 + $0x31]  }
 0x26b   :  { %s860_s21 = sshll.u32 %s3802_s18, 4  ;;  %s3803_s27 = smov [#allocation2 + $0x32]   ;;  %s861_s21 = int_to_ptr.vmem [resolvable:$true] %s860_s21 }
 0x26c   :  { %s4342_s4 = sshll.u32 %s3803_s27, 4  ;;  %s4345_s28 = sld [smem:[#allocation5 + $0x303]]  ;;  %s878_s4 = int_to_ptr.vmem [resolvable:$true] %s4342_s4 }
 0x26d   :  { %s848_s3 = scalar_lea.hbm %s4500_s1, %s1900_s13  ;;  %s3804_s20 = smov [#allocation2 + $0x33]  }
 0x26e   :  { %s858_s10 = sshll.u32 %s848_s3, 4  ;;  %s4350_s5 = sshll.u32 %s3804_s20, 4  ;;  %s859_s10 = int_to_ptr.hbm [resolvable:$true] %s858_s10  ;;  %s895_s5 = int_to_ptr.vmem [resolvable:$true] %s4350_s5 }
 0x26f   :  { %s3236_s15 = sshra.s32 %s859_s10, 4  ;;  %s3237_s15 = int_to_ptr.hbm [resolvable:$true] %s3236_s15 }
 0x270   :  { %s865_s9 = scalar_lea.hbm %s4500_s1, %s1901_s0  ;;  %s3238_s11 = scalar_lea.hbm %s3237_s15, 1 }
 0x271   :  { %p3239_p7 = scmp.ne.s32.totalorder %s3237_s15, %s3238_s11  ;;  %p3241_p8 = scmp.lt.s32.totalorder %s3237_s15, %s4500_s1 }
 0x272   :  { %p3242_p9 = scmp.lt.s32.totalorder %s3856_s6, %s3238_s11 }
 0x274   :  { %p3243_p10 = por %p3242_p9, %p3241_p8 }
 0x276   :  { %p3244_p11 = pnand %p3243_p10, %p3239_p7 }
 0x278   :  { %3247 = shalt.err (!%p3244_p11)  }
 0x279   :  { %863 = dma.hbm_to_vmem [thread:$0]  %s859_s10, 16, %s861_s21, [#allocation3 + $0x31] }
 0x27a   :  { %s875_s14 = sshll.u32 %s865_s9, 4  ;;  %s882_s19 = scalar_lea.hbm %s4500_s1, %s4345_s28  ;;  %s876_s14 = int_to_ptr.hbm [resolvable:$true] %s875_s14 }
 0x27b   :  { %s3260_s13 = sshra.s32 %s876_s14, 4  ;;  %s3261_s13 = int_to_ptr.hbm [resolvable:$true] %s3260_s13 }
 0x27c   :  { %s3262_s22 = scalar_lea.hbm %s3261_s13, 1  ;;  %p3265_p13 = scmp.lt.s32.totalorder %s3261_s13, %s4500_s1 }
 0x27d   :  { %p3263_p12 = scmp.ne.s32.totalorder %s3261_s13, %s3262_s22  ;;  %p3266_p0 = scmp.lt.s32.totalorder %s3856_s6, %s3262_s22 }
 0x27f   :  { %p3267_p1 = por %p3266_p0, %p3265_p13 }
 0x281   :  { %p3268_p2 = pnand %p3267_p1, %p3263_p12 }
 0x283   :  { %3271 = shalt.err (!%p3268_p2)  }
 0x284   :  { %880 = dma.hbm_to_vmem [thread:$0]  %s876_s14, 16, %s878_s4, [#allocation3 + $0x32] }
 0x285   :  { %s892_s25 = sshll.u32 %s882_s19, 4  ;;  %s1903_s0 = sld [smem:[#allocation5 + $0x304]]  ;;  %s893_s25 = int_to_ptr.hbm [resolvable:$true] %s892_s25 }
 0x286   :  { %s3284_s18 = sshra.s32 %s893_s25, 4  ;;  %s3285_s18 = int_to_ptr.hbm [resolvable:$true] %s3284_s18 }
 0x287   :  { %s3286_s21 = scalar_lea.hbm %s3285_s18, 1  ;;  %p3289_p4 = scmp.lt.s32.totalorder %s3285_s18, %s4500_s1 }
 0x288   :  { %p3287_p3 = scmp.ne.s32.totalorder %s3285_s18, %s3286_s21  ;;  %p3290_p5 = scmp.lt.s32.totalorder %s3856_s6, %s3286_s21 }
 0x28a   :  { %p3291_p6 = por %p3290_p5, %p3289_p4 }
 0x28c   :  { %p3292_p7 = pnand %p3291_p6, %p3287_p3 }
 0x28e   :  { %3295 = shalt.err (!%p3292_p7)  }
 0x28f   :  { %897 = dma.hbm_to_vmem [thread:$0]  %s893_s25, 16, %s895_s5, [#allocation3 + $0x33] }
 0x290   :  { %s3805_s26 = smov [#allocation2 + $0x34]   ;;  %s1904_s3 = sld [smem:[#allocation5 + $0x305]] }
 0x291   :  { %s911_s30 = sshll.u32 %s3805_s26, 4  ;;  %s3806_s4 = smov [#allocation2 + $0x35]   ;;  %s912_s30 = int_to_ptr.vmem [resolvable:$true] %s911_s30 }
 0x292   :  { %s4374_s10 = sshll.u32 %s3806_s4, 4  ;;  %s1905_s20 = sld [smem:[#allocation5 + $0x306]]  ;;  %s929_s10 = int_to_ptr.vmem [resolvable:$true] %s4374_s10 }
 0x293   :  { %s899_s9 = scalar_lea.hbm %s4500_s1, %s1903_s0  ;;  %s3807_s11 = smov [#allocation2 + $0x36]  }
 0x294   :  { %s909_s15 = sshll.u32 %s899_s9, 4  ;;  %s4380_s12 = sshll.u32 %s3807_s11, 4  ;;  %s910_s15 = int_to_ptr.hbm [resolvable:$true] %s909_s15  ;;  %s946_s12 = int_to_ptr.vmem [resolvable:$true] %s4380_s12 }
 0x295   :  { %s3308_s5 = sshra.s32 %s910_s15, 4  ;;  %s3309_s5 = int_to_ptr.hbm [resolvable:$true] %s3308_s5 }
 0x296   :  { %s3310_s8 = scalar_lea.hbm %s3309_s5, 1  ;;  %p3313_p9 = scmp.lt.s32.totalorder %s3309_s5, %s4500_s1 }
 0x297   :  { %p3311_p8 = scmp.ne.s32.totalorder %s3309_s5, %s3310_s8  ;;  %p3314_p10 = scmp.lt.s32.totalorder %s3856_s6, %s3310_s8 }
 0x299   :  { %p3315_p11 = por %p3314_p10, %p3313_p9 }
 0x29b   :  { %p3316_p12 = pnand %p3315_p11, %p3311_p8 }
 0x29d   :  { %3319 = shalt.err (!%p3316_p12)  }
 0x29e   :  { %914 = dma.hbm_to_vmem [thread:$0]  %s910_s15, 16, %s912_s30, [#allocation3 + $0x34] }
 0x29f   :  { %s916_s13 = scalar_lea.hbm %s4500_s1, %s1904_s3  ;;  %s933_s25 = scalar_lea.hbm %s4500_s1, %s1905_s20 }
 0x2a0   :  { %s926_s22 = sshll.u32 %s916_s13, 4  ;;  %s943_s0 = sshll.u32 %s933_s25, 4  ;;  %s927_s22 = int_to_ptr.hbm [resolvable:$true] %s926_s22  ;;  %s944_s0 = int_to_ptr.hbm [resolvable:$true] %s943_s0 }
 0x2a1   :  { %s3332_s18 = sshra.s32 %s927_s22, 4  ;;  %s3333_s18 = int_to_ptr.hbm [resolvable:$true] %s3332_s18 }
 0x2a2   :  { %s3334_s21 = scalar_lea.hbm %s3333_s18, 1  ;;  %p3337_p0 = scmp.lt.s32.totalorder %s3333_s18, %s4500_s1 }
 0x2a3   :  { %p3335_p13 = scmp.ne.s32.totalorder %s3333_s18, %s3334_s21  ;;  %p3338_p1 = scmp.lt.s32.totalorder %s3856_s6, %s3334_s21 }
 0x2a5   :  { %p3339_p2 = por %p3338_p1, %p3337_p0 }
 0x2a7   :  { %p3340_p3 = pnand %p3339_p2, %p3335_p13 }
 0x2a9   :  { %3343 = shalt.err (!%p3340_p3)  }
 0x2aa   :  { %931 = dma.hbm_to_vmem [thread:$0]  %s927_s22, 16, %s929_s10, [#allocation3 + $0x35] }
 0x2ab   :  { %s1906_s26 = sld [smem:[#allocation5 + $0x307]]  ;;  %s3356_s30 = sshra.s32 %s944_s0, 4  ;;  %s3357_s30 = int_to_ptr.hbm [resolvable:$true] %s3356_s30 }
 0x2ac   :  { %s3358_s3 = scalar_lea.hbm %s3357_s30, 1  ;;  %p3361_p5 = scmp.lt.s32.totalorder %s3357_s30, %s4500_s1 }
 0x2ad   :  { %p3359_p4 = scmp.ne.s32.totalorder %s3357_s30, %s3358_s3  ;;  %p3362_p6 = scmp.lt.s32.totalorder %s3856_s6, %s3358_s3 }
 0x2af   :  { %p3363_p7 = por %p3362_p6, %p3361_p5 }
 0x2b1   :  { %p3364_p8 = pnand %p3363_p7, %p3359_p4 }
 0x2b3   :  { %3367 = shalt.err (!%p3364_p8)  }
 0x2b4   :  { %948 = dma.hbm_to_vmem [thread:$0]  %s944_s0, 16, %s946_s12, [#allocation3 + $0x36] }
 0x2b5   :  { %s1907_s29 = sld [smem:[#allocation5 + $0x380]]  ;;  %s3808_s7 = smov [#allocation2 + $0x37]  }
 0x2b6   :  { %s962_s9 = sshll.u32 %s3808_s7, 4  ;;  %s3809_s10 = smov [#allocation2 + $0x38]   ;;  %s963_s9 = int_to_ptr.vmem [resolvable:$true] %s962_s9 }
 0x2b7   :  { %s4403_s15 = sshll.u32 %s3809_s10, 4  ;;  %s4406_s11 = sld [smem:[#allocation5 + $0x381]]  ;;  %s980_s15 = int_to_ptr.vmem [resolvable:$true] %s4403_s15 }
 0x2b8   :  { %s950_s14 = scalar_lea.hbm %s4500_s1, %s1906_s26  ;;  %s3810_s17 = smov [#allocation2 + $0x39]  }
 0x2b9   :  { %s960_s16 = sshll.u32 %s950_s14, 4  ;;  %s4411_s19 = sshll.u32 %s3810_s17, 4  ;;  %s961_s16 = int_to_ptr.hbm [resolvable:$true] %s960_s16  ;;  %s997_s19 = int_to_ptr.vmem [resolvable:$true] %s4411_s19 }
 0x2ba   :  { %s3380_s23 = sshra.s32 %s961_s16, 4  ;;  %s3381_s23 = int_to_ptr.hbm [resolvable:$true] %s3380_s23 }
 0x2bb   :  { %s967_s22 = scalar_lea.hbm %s4500_s1, %s1907_s29  ;;  %s3382_s24 = scalar_lea.hbm %s3381_s23, 1 }
 0x2bc   :  { %p3383_p9 = scmp.ne.s32.totalorder %s3381_s23, %s3382_s24  ;;  %p3385_p10 = scmp.lt.s32.totalorder %s3381_s23, %s4500_s1 }
 0x2bd   :  { %p3386_p11 = scmp.lt.s32.totalorder %s3856_s6, %s3382_s24 }
 0x2bf   :  { %p3387_p12 = por %p3386_p11, %p3385_p10 }
 0x2c1   :  { %p3388_p13 = pnand %p3387_p12, %p3383_p9 }
 0x2c3   :  { %3391 = shalt.err (!%p3388_p13)  }
 0x2c4   :  { %965 = dma.hbm_to_vmem [thread:$0]  %s961_s16, 16, %s963_s9, [#allocation3 + $0x37] }
 0x2c5   :  { %s977_s18 = sshll.u32 %s967_s22, 4  ;;  %s984_s28 = scalar_lea.hbm %s4500_s1, %s4406_s11  ;;  %s978_s18 = int_to_ptr.hbm [resolvable:$true] %s977_s18 }
 0x2c6   :  { %s3404_s26 = sshra.s32 %s978_s18, 4  ;;  %s3405_s26 = int_to_ptr.hbm [resolvable:$true] %s3404_s26 }
 0x2c7   :  { %s3406_s30 = scalar_lea.hbm %s3405_s26, 1  ;;  %p3409_p1 = scmp.lt.s32.totalorder %s3405_s26, %s4500_s1 }
 0x2c8   :  { %p3407_p0 = scmp.ne.s32.totalorder %s3405_s26, %s3406_s30  ;;  %p3410_p2 = scmp.lt.s32.totalorder %s3856_s6, %s3406_s30 }
 0x2ca   :  { %p3411_p3 = por %p3410_p2, %p3409_p1 }
 0x2cc   :  { %p3412_p4 = pnand %p3411_p3, %p3407_p0 }
 0x2ce   :  { %3415 = shalt.err (!%p3412_p4)  }
 0x2cf   :  { %982 = dma.hbm_to_vmem [thread:$0]  %s978_s18, 16, %s980_s15, [#allocation3 + $0x38] }
 0x2d0   :  { %s994_s20 = sshll.u32 %s984_s28, 4  ;;  %s1909_s29 = sld [smem:[#allocation5 + $0x382]]  ;;  %s995_s20 = int_to_ptr.hbm [resolvable:$true] %s994_s20 }
 0x2d1   :  { %s3428_s7 = sshra.s32 %s995_s20, 4  ;;  %s3429_s7 = int_to_ptr.hbm [resolvable:$true] %s3428_s7 }
 0x2d2   :  { %s3430_s9 = scalar_lea.hbm %s3429_s7, 1  ;;  %p3433_p6 = scmp.lt.s32.totalorder %s3429_s7, %s4500_s1 }
 0x2d3   :  { %p3431_p5 = scmp.ne.s32.totalorder %s3429_s7, %s3430_s9  ;;  %p3434_p7 = scmp.lt.s32.totalorder %s3856_s6, %s3430_s9 }
 0x2d5   :  { %p3435_p8 = por %p3434_p7, %p3433_p6 }
 0x2d7   :  { %p3436_p9 = pnand %p3435_p8, %p3431_p5 }
 0x2d9   :  { %3439 = shalt.err (!%p3436_p9)  }
 0x2da   :  { %999 = dma.hbm_to_vmem [thread:$0]  %s995_s20, 16, %s997_s19, [#allocation3 + $0x39] }
 0x2db   :  { %s3811_s5 = smov [#allocation2 + $0x3a]   ;;  %s1910_s14 = sld [smem:[#allocation5 + $0x383]] }
 0x2dc   :  { %s1013_s8 = sshll.u32 %s3811_s5, 4  ;;  %s3812_s15 = smov [#allocation2 + $0x3b]   ;;  %s1014_s8 = int_to_ptr.vmem [resolvable:$true] %s1013_s8 }
 0x2dd   :  { %s4435_s16 = sshll.u32 %s3812_s15, 4  ;;  %s1911_s17 = sld [smem:[#allocation5 + $0x384]]  ;;  %s1031_s16 = int_to_ptr.vmem [resolvable:$true] %s4435_s16 }
 0x2de   :  { %s1001_s22 = scalar_lea.hbm %s4500_s1, %s1909_s29  ;;  %s3813_s24 = smov [#allocation2 + $0x3c]  }
 0x2df   :  { %s1011_s23 = sshll.u32 %s1001_s22, 4  ;;  %s4441_s25 = sshll.u32 %s3813_s24, 4  ;;  %s1012_s23 = int_to_ptr.hbm [resolvable:$true] %s1011_s23  ;;  %s1048_s25 = int_to_ptr.vmem [resolvable:$true] %s4441_s25 }
 0x2e0   :  { %s3452_s19 = sshra.s32 %s1012_s23, 4  ;;  %s3453_s19 = int_to_ptr.hbm [resolvable:$true] %s3452_s19 }
 0x2e1   :  { %s3454_s0 = scalar_lea.hbm %s3453_s19, 1  ;;  %p3457_p11 = scmp.lt.s32.totalorder %s3453_s19, %s4500_s1 }
 0x2e2   :  { %p3455_p10 = scmp.ne.s32.totalorder %s3453_s19, %s3454_s0  ;;  %p3458_p12 = scmp.lt.s32.totalorder %s3856_s6, %s3454_s0 }
 0x2e4   :  { %p3459_p13 = por %p3458_p12, %p3457_p11 }
 0x2e6   :  { %p3460_p0 = pnand %p3459_p13, %p3455_p10 }
 0x2e8   :  { %3463 = shalt.err (!%p3460_p0)  }
 0x2e9   :  { %1016 = dma.hbm_to_vmem [thread:$0]  %s1012_s23, 16, %s1014_s8, [#allocation3 + $0x3a] }
 0x2ea   :  { %s1018_s26 = scalar_lea.hbm %s4500_s1, %s1910_s14  ;;  %s1035_s20 = scalar_lea.hbm %s4500_s1, %s1911_s17 }
 0x2eb   :  { %s1028_s30 = sshll.u32 %s1018_s26, 4  ;;  %s1045_s29 = sshll.u32 %s1035_s20, 4  ;;  %s1029_s30 = int_to_ptr.hbm [resolvable:$true] %s1028_s30  ;;  %s1046_s29 = int_to_ptr.hbm [resolvable:$true] %s1045_s29 }
 0x2ec   :  { %s3476_s7 = sshra.s32 %s1029_s30, 4  ;;  %s3477_s7 = int_to_ptr.hbm [resolvable:$true] %s3476_s7 }
 0x2ed   :  { %s3478_s9 = scalar_lea.hbm %s3477_s7, 1  ;;  %p3481_p2 = scmp.lt.s32.totalorder %s3477_s7, %s4500_s1 }
 0x2ee   :  { %p3479_p1 = scmp.ne.s32.totalorder %s3477_s7, %s3478_s9  ;;  %p3482_p3 = scmp.lt.s32.totalorder %s3856_s6, %s3478_s9 }
 0x2f0   :  { %p3483_p4 = por %p3482_p3, %p3481_p2 }
 0x2f2   :  { %p3484_p5 = pnand %p3483_p4, %p3479_p1 }
 0x2f4   :  { %3487 = shalt.err (!%p3484_p5)  }
 0x2f5   :  { %1033 = dma.hbm_to_vmem [thread:$0]  %s1029_s30, 16, %s1031_s16, [#allocation3 + $0x3b] }
 0x2f6   :  { %s1912_s5 = sld [smem:[#allocation5 + $0x385]]  ;;  %s3500_s8 = sshra.s32 %s1046_s29, 4  ;;  %s3501_s8 = int_to_ptr.hbm [resolvable:$true] %s3500_s8 }
 0x2f7   :  { %s3502_s14 = scalar_lea.hbm %s3501_s8, 1  ;;  %p3505_p7 = scmp.lt.s32.totalorder %s3501_s8, %s4500_s1 }
 0x2f8   :  { %p3503_p6 = scmp.ne.s32.totalorder %s3501_s8, %s3502_s14  ;;  %p3506_p8 = scmp.lt.s32.totalorder %s3856_s6, %s3502_s14 }
 0x2fa   :  { %p3507_p9 = por %p3506_p8, %p3505_p7 }
 0x2fc   :  { %p3508_p10 = pnand %p3507_p9, %p3503_p6 }
 0x2fe   :  { %3511 = shalt.err (!%p3508_p10)  }
 0x2ff   :  { %1050 = dma.hbm_to_vmem [thread:$0]  %s1046_s29, 16, %s1048_s25, [#allocation3 + $0x3c] }
 0x300   :  { %s1913_s12 = sld [smem:[#allocation5 + $0x386]]  ;;  %s3814_s13 = smov [#allocation2 + $0x3d]  }
 0x301   :  { %s1064_s22 = sshll.u32 %s3814_s13, 4  ;;  %s3815_s16 = smov [#allocation2 + $0x3e]   ;;  %s1065_s22 = int_to_ptr.vmem [resolvable:$true] %s1064_s22 }
 0x302   :  { %s4464_s23 = sshll.u32 %s3815_s16, 4  ;;  %s4467_s24 = sld [smem:[#allocation5 + $0x387]]  ;;  %s1082_s23 = int_to_ptr.vmem [resolvable:$true] %s4464_s23 }
 0x303   :  { %s1052_s18 = scalar_lea.hbm %s4500_s1, %s1912_s5  ;;  %s3816_s27 = smov [#allocation2 + $0x3f]  }
 0x304   :  { %s1062_s21 = sshll.u32 %s1052_s18, 4  ;;  %s4472_s28 = sshll.u32 %s3816_s27, 4  ;;  %s1063_s21 = int_to_ptr.hbm [resolvable:$true] %s1062_s21  ;;  %s1099_s28 = int_to_ptr.vmem [resolvable:$true] %s4472_s28 }
 0x305   :  { %s3524_s3 = sshra.s32 %s1063_s21, 4  ;;  %s3525_s3 = int_to_ptr.hbm [resolvable:$true] %s3524_s3 }
 0x306   :  { %s1069_s30 = scalar_lea.hbm %s4500_s1, %s1913_s12  ;;  %s3526_s4 = scalar_lea.hbm %s3525_s3, 1 }
 0x307   :  { %p3527_p11 = scmp.ne.s32.totalorder %s3525_s3, %s3526_s4  ;;  %p3529_p12 = scmp.lt.s32.totalorder %s3525_s3, %s4500_s1 }
 0x308   :  { %p3530_p13 = scmp.lt.s32.totalorder %s3856_s6, %s3526_s4 }
 0x30a   :  { %p3531_p0 = por %p3530_p13, %p3529_p12 }
 0x30c   :  { %p3532_p1 = pnand %p3531_p0, %p3527_p11 }
 0x30e   :  { %3535 = shalt.err (!%p3532_p1)  }
 0x30f   :  { %1067 = dma.hbm_to_vmem [thread:$0]  %s1063_s21, 16, %s1065_s22, [#allocation3 + $0x3d] }
 0x310   :  { %s1079_s7 = sshll.u32 %s1069_s30, 4  ;;  %s1086_s11 = scalar_lea.hbm %s4500_s1, %s4467_s24  ;;  %s1080_s7 = int_to_ptr.hbm [resolvable:$true] %s1079_s7 }
 0x311   :  { %s3548_s5 = sshra.s32 %s1080_s7, 4  ;;  %s3549_s5 = int_to_ptr.hbm [resolvable:$true] %s3548_s5 }
 0x312   :  { %s3550_s8 = scalar_lea.hbm %s3549_s5, 1  ;;  %p3553_p3 = scmp.lt.s32.totalorder %s3549_s5, %s4500_s1 }
 0x313   :  { %p3551_p2 = scmp.ne.s32.totalorder %s3549_s5, %s3550_s8  ;;  %p3554_p4 = scmp.lt.s32.totalorder %s3856_s6, %s3550_s8 }
 0x315   :  { %p3555_p5 = por %p3554_p4, %p3553_p3 }
 0x317   :  { %p3556_p6 = pnand %p3555_p5, %p3551_p2 }
 0x319   :  { %3559 = shalt.err (!%p3556_p6)  }
 0x31a   :  { %1084 = dma.hbm_to_vmem [thread:$0]  %s1080_s7, 16, %s1082_s23, [#allocation3 + $0x3e] }
 0x31b   :  { %s1096_s17 = sshll.u32 %s1086_s11, 4  ;;  %s1097_s17 = int_to_ptr.hbm [resolvable:$true] %s1096_s17 }
 0x31c   :  { %s3572_s12 = sshra.s32 %s1097_s17, 4  ;;  %s3573_s12 = int_to_ptr.hbm [resolvable:$true] %s3572_s12 }
 0x31d   :  { %s3574_s13 = scalar_lea.hbm %s3573_s12, 1  ;;  %p3577_p8 = scmp.lt.s32.totalorder %s3573_s12, %s4500_s1 }
 0x31e   :  { %p3575_p7 = scmp.ne.s32.totalorder %s3573_s12, %s3574_s13  ;;  %p3578_p9 = scmp.lt.s32.totalorder %s3856_s6, %s3574_s13 }
 0x320   :  { %p3579_p10 = por %p3578_p9, %p3577_p8 }
 0x322   :  { %p3580_p11 = pnand %p3579_p10, %p3575_p7 }
 0x324   :  { %3583 = shalt.err (!%p3580_p11)  }
 0x325   :  { %1101 = dma.hbm_to_vmem [thread:$0]  %s1097_s17, 16, %s1099_s28, [#allocation3 + $0x3f] }
 0x326   :  { %3622 = dma.done.wait [#allocation3], 16 }
 0x327   :  { %3623 = vsyncadd [#allocation3], 4294967280 }
 0x328   :  { %3624 = dma.done.wait [#allocation3 + $0x1], 16 }
 0x329   :  { %3625 = vsyncadd [#allocation3 + $0x1], 4294967280 }
 0x32a   :  { %3626 = dma.done.wait [#allocation3 + $0x2], 16 }
 0x32b   :  { %3627 = vsyncadd [#allocation3 + $0x2], 4294967280 }
 0x32c   :  { %3628 = dma.done.wait [#allocation3 + $0x3], 16 }
 0x32d   :  { %3629 = vsyncadd [#allocation3 + $0x3], 4294967280 }
 0x32e   :  { %3630 = dma.done.wait [#allocation3 + $0x4], 16 }
 0x32f   :  { %3631 = vsyncadd [#allocation3 + $0x4], 4294967280 }
 0x330   :  { %3632 = dma.done.wait [#allocation3 + $0x5], 16 }
 0x331   :  { %3633 = vsyncadd [#allocation3 + $0x5], 4294967280 }
 0x332   :  { %3634 = dma.done.wait [#allocation3 + $0x6], 16 }
 0x333   :  { %3635 = vsyncadd [#allocation3 + $0x6], 4294967280 }
 0x334   :  { %3636 = dma.done.wait [#allocation3 + $0x7], 16 }
 0x335   :  { %3637 = vsyncadd [#allocation3 + $0x7], 4294967280 }
 0x336   :  { %3638 = dma.done.wait [#allocation3 + $0x8], 16 }
 0x337   :  { %3639 = vsyncadd [#allocation3 + $0x8], 4294967280 }
 0x338   :  { %3640 = dma.done.wait [#allocation3 + $0x9], 16 }
 0x339   :  { %3641 = vsyncadd [#allocation3 + $0x9], 4294967280 }
 0x33a   :  { %3642 = dma.done.wait [#allocation3 + $0xa], 16 }
 0x33b   :  { %3643 = vsyncadd [#allocation3 + $0xa], 4294967280 }
 0x33c   :  { %3644 = dma.done.wait [#allocation3 + $0xb], 16 }
 0x33d   :  { %3645 = vsyncadd [#allocation3 + $0xb], 4294967280 }
 0x33e   :  { %3646 = dma.done.wait [#allocation3 + $0xc], 16 }
 0x33f   :  { %3647 = vsyncadd [#allocation3 + $0xc], 4294967280 }
 0x340   :  { %3648 = dma.done.wait [#allocation3 + $0xd], 16 }
 0x341   :  { %3649 = vsyncadd [#allocation3 + $0xd], 4294967280 }
 0x342   :  { %3650 = dma.done.wait [#allocation3 + $0xe], 16 }
 0x343   :  { %3651 = vsyncadd [#allocation3 + $0xe], 4294967280 }
 0x344   :  { %3652 = dma.done.wait [#allocation3 + $0xf], 16 }
 0x345   :  { %3653 = vsyncadd [#allocation3 + $0xf], 4294967280 }
 0x346   :  { %3654 = dma.done.wait [#allocation3 + $0x10], 16 }
 0x347   :  { %3655 = vsyncadd [#allocation3 + $0x10], 4294967280 }
 0x348   :  { %3656 = dma.done.wait [#allocation3 + $0x11], 16 }
 0x349   :  { %3657 = vsyncadd [#allocation3 + $0x11], 4294967280 }
 0x34a   :  { %3658 = dma.done.wait [#allocation3 + $0x12], 16 }
 0x34b   :  { %3659 = vsyncadd [#allocation3 + $0x12], 4294967280 }
 0x34c   :  { %3660 = dma.done.wait [#allocation3 + $0x13], 16 }
 0x34d   :  { %3661 = vsyncadd [#allocation3 + $0x13], 4294967280 }
 0x34e   :  { %3662 = dma.done.wait [#allocation3 + $0x14], 16 }
 0x34f   :  { %3663 = vsyncadd [#allocation3 + $0x14], 4294967280 }
 0x350   :  { %3664 = dma.done.wait [#allocation3 + $0x15], 16 }
 0x351   :  { %3665 = vsyncadd [#allocation3 + $0x15], 4294967280 }
 0x352   :  { %3666 = dma.done.wait [#allocation3 + $0x16], 16 }
 0x353   :  { %3667 = vsyncadd [#allocation3 + $0x16], 4294967280 }
 0x354   :  { %3668 = dma.done.wait [#allocation3 + $0x17], 16 }
 0x355   :  { %3669 = vsyncadd [#allocation3 + $0x17], 4294967280 }
 0x356   :  { %3670 = dma.done.wait [#allocation3 + $0x18], 16 }
 0x357   :  { %3671 = vsyncadd [#allocation3 + $0x18], 4294967280 }
 0x358   :  { %3672 = dma.done.wait [#allocation3 + $0x19], 16 }
 0x359   :  { %3673 = vsyncadd [#allocation3 + $0x19], 4294967280 }
 0x35a   :  { %3674 = dma.done.wait [#allocation3 + $0x1a], 16 }
 0x35b   :  { %3675 = vsyncadd [#allocation3 + $0x1a], 4294967280 }
 0x35c   :  { %3676 = dma.done.wait [#allocation3 + $0x1b], 16 }
 0x35d   :  { %3677 = vsyncadd [#allocation3 + $0x1b], 4294967280 }
 0x35e   :  { %3678 = dma.done.wait [#allocation3 + $0x1c], 16 }
 0x35f   :  { %3679 = vsyncadd [#allocation3 + $0x1c], 4294967280 }
 0x360   :  { %3680 = dma.done.wait [#allocation3 + $0x1d], 16 }
 0x361   :  { %3681 = vsyncadd [#allocation3 + $0x1d], 4294967280 }
 0x362   :  { %3682 = dma.done.wait [#allocation3 + $0x1e], 16 }
 0x363   :  { %3683 = vsyncadd [#allocation3 + $0x1e], 4294967280 }
 0x364   :  { %3684 = dma.done.wait [#allocation3 + $0x1f], 16 }
 0x365   :  { %3685 = vsyncadd [#allocation3 + $0x1f], 4294967280 }
 0x366   :  { %3686 = dma.done.wait [#allocation3 + $0x20], 16 }
 0x367   :  { %3687 = vsyncadd [#allocation3 + $0x20], 4294967280 }
 0x368   :  { %3688 = dma.done.wait [#allocation3 + $0x21], 16 }
 0x369   :  { %3689 = vsyncadd [#allocation3 + $0x21], 4294967280 }
 0x36a   :  { %3690 = dma.done.wait [#allocation3 + $0x22], 16 }
 0x36b   :  { %3691 = vsyncadd [#allocation3 + $0x22], 4294967280 }
 0x36c   :  { %3692 = dma.done.wait [#allocation3 + $0x23], 16 }
 0x36d   :  { %3693 = vsyncadd [#allocation3 + $0x23], 4294967280 }
 0x36e   :  { %3694 = dma.done.wait [#allocation3 + $0x24], 16 }
 0x36f   :  { %3695 = vsyncadd [#allocation3 + $0x24], 4294967280 }
 0x370   :  { %3696 = dma.done.wait [#allocation3 + $0x25], 16 }
 0x371   :  { %3697 = vsyncadd [#allocation3 + $0x25], 4294967280 }
 0x372   :  { %3698 = dma.done.wait [#allocation3 + $0x26], 16 }
 0x373   :  { %3699 = vsyncadd [#allocation3 + $0x26], 4294967280 }
 0x374   :  { %3700 = dma.done.wait [#allocation3 + $0x27], 16 }
 0x375   :  { %3701 = vsyncadd [#allocation3 + $0x27], 4294967280 }
 0x376   :  { %3702 = dma.done.wait [#allocation3 + $0x28], 16 }
 0x377   :  { %3703 = vsyncadd [#allocation3 + $0x28], 4294967280 }
 0x378   :  { %3704 = dma.done.wait [#allocation3 + $0x29], 16 }
 0x379   :  { %3705 = vsyncadd [#allocation3 + $0x29], 4294967280 }
 0x37a   :  { %3706 = dma.done.wait [#allocation3 + $0x2a], 16 }
 0x37b   :  { %3707 = vsyncadd [#allocation3 + $0x2a], 4294967280 }
 0x37c   :  { %3708 = dma.done.wait [#allocation3 + $0x2b], 16 }
 0x37d   :  { %3709 = vsyncadd [#allocation3 + $0x2b], 4294967280 }
 0x37e   :  { %3710 = dma.done.wait [#allocation3 + $0x2c], 16 }
 0x37f   :  { %3711 = vsyncadd [#allocation3 + $0x2c], 4294967280 }
 0x380   :  { %3712 = dma.done.wait [#allocation3 + $0x2d], 16 }
 0x381   :  { %3713 = vsyncadd [#allocation3 + $0x2d], 4294967280 }
 0x382   :  { %3714 = dma.done.wait [#allocation3 + $0x2e], 16 }
 0x383   :  { %3715 = vsyncadd [#allocation3 + $0x2e], 4294967280 }
 0x384   :  { %3716 = dma.done.wait [#allocation3 + $0x2f], 16 }
 0x385   :  { %3717 = vsyncadd [#allocation3 + $0x2f], 4294967280 }
 0x386   :  { %3718 = dma.done.wait [#allocation3 + $0x30], 16 }
 0x387   :  { %3719 = vsyncadd [#allocation3 + $0x30], 4294967280 }
 0x388   :  { %3720 = dma.done.wait [#allocation3 + $0x31], 16 }
 0x389   :  { %3721 = vsyncadd [#allocation3 + $0x31], 4294967280 }
 0x38a   :  { %3722 = dma.done.wait [#allocation3 + $0x32], 16 }
 0x38b   :  { %3723 = vsyncadd [#allocation3 + $0x32], 4294967280 }
 0x38c   :  { %3724 = dma.done.wait [#allocation3 + $0x33], 16 }
 0x38d   :  { %3725 = vsyncadd [#allocation3 + $0x33], 4294967280 }
 0x38e   :  { %3726 = dma.done.wait [#allocation3 + $0x34], 16 }
 0x38f   :  { %3727 = vsyncadd [#allocation3 + $0x34], 4294967280 }
 0x390   :  { %3728 = dma.done.wait [#allocation3 + $0x35], 16 }
 0x391   :  { %3729 = vsyncadd [#allocation3 + $0x35], 4294967280 }
 0x392   :  { %3730 = dma.done.wait [#allocation3 + $0x36], 16 }
 0x393   :  { %3731 = vsyncadd [#allocation3 + $0x36], 4294967280 }
 0x394   :  { %3732 = dma.done.wait [#allocation3 + $0x37], 16 }
 0x395   :  { %3733 = vsyncadd [#allocation3 + $0x37], 4294967280 }
 0x396   :  { %3734 = dma.done.wait [#allocation3 + $0x38], 16 }
 0x397   :  { %3735 = vsyncadd [#allocation3 + $0x38], 4294967280 }
 0x398   :  { %3736 = dma.done.wait [#allocation3 + $0x39], 16 }
 0x399   :  { %3737 = vsyncadd [#allocation3 + $0x39], 4294967280 }
 0x39a   :  { %3738 = dma.done.wait [#allocation3 + $0x3a], 16 }
 0x39b   :  { %3739 = vsyncadd [#allocation3 + $0x3a], 4294967280 }
 0x39c   :  { %3740 = dma.done.wait [#allocation3 + $0x3b], 16 }
 0x39d   :  { %3741 = vsyncadd [#allocation3 + $0x3b], 4294967280 }
 0x39e   :  { %3742 = dma.done.wait [#allocation3 + $0x3c], 16 }
 0x39f   :  { %3743 = vsyncadd [#allocation3 + $0x3c], 4294967280 }
 0x3a0   :  { %3744 = dma.done.wait [#allocation3 + $0x3d], 16 }
 0x3a1   :  { %3745 = vsyncadd [#allocation3 + $0x3d], 4294967280 }
 0x3a2   :  { %3746 = dma.done.wait [#allocation3 + $0x3e], 16 }
 0x3a3   :  { %3747 = vsyncadd [#allocation3 + $0x3e], 4294967280 }
 0x3a4   :  { %3748 = dma.done.wait [#allocation3 + $0x3f], 16 }
 0x3a5   :  { %3749 = vsyncadd [#allocation3 + $0x3f], 4294967280  ;;  %v1230_v0 = vld [vmem:[#allocation2] sm:$0xff]  ;;  %v1231_v1 = vld [vmem:[#allocation2 + $0x8] sm:$0xff]  ;;  %v3817_v3 = vmov 8.0   ;;  %vm1309_vm1 = vcmask 1041409  }
 0x3a6   :  { %v1232_v2 = vld [vmem:[#allocation2 + $0x10] sm:$0xff]  ;;  %2046 = vrcp.f32 %v3817_v3  ;;  %v1233_v4 = vld [vmem:[#allocation2 + $0x18] sm:$0xff]  ;;  %v1234_v5 = vld [vmem:[#allocation2 + $0x20] sm:$0xff]  ;;  %v1238_v7 = vrot.slane %v1230_v0, 4  ;;  %v1244_v8 = vrot.slane %v1231_v1, 4  ;;  %vm1311_vm2 = vcmask 1042434  }
 0x3a7   :  { %v1235_v6 = vld [vmem:[#allocation2 + $0x28] sm:$0xff]  ;;  %v1250_v9 = vrot.slane %v1232_v2, 4  ;;  %v1236_v10 = vld [vmem:[#allocation2 + $0x30] sm:$0xff]  ;;  %v1237_v11 = vld [vmem:[#allocation2 + $0x38] sm:$0xff]  ;;  %v1256_v12 = vrot.slane %v1233_v4, 4  ;;  %v1262_v13 = vrot.slane %v1234_v5, 4 }
 0x3a8   :  { %v1268_v14 = vrot.slane %v1235_v6, 4  ;;  %v1239_v15 = vadd.f32 %v1238_v7, %v1230_v0  ;;  %v1245_v16 = vadd.f32 %v1244_v8, %v1231_v1  ;;  %v1274_v18 = vrot.slane %v1236_v10, 4  ;;  %s3818_s1 = smov [#allocation6]   ;;  %s1332_s19 = sshll.u32 %s4501_s2, 4  ;;  %s1333_s19 = int_to_ptr.hbm [resolvable:$true] %s1332_s19 }
 0x3a9   :  { %v1251_v17 = vadd.f32 %v1250_v9, %v1232_v2  ;;  %v1257_v19 = vadd.f32 %v1256_v12, %v1233_v4  ;;  %v1263_v20 = vadd.f32 %v1262_v13, %v1234_v5  ;;  %v1280_v22 = vrot.slane %v1237_v11, 4  ;;  %s1330_s6 = sshll.u32 %s3818_s1, 4  ;;  %s1331_s6 = int_to_ptr.vmem [resolvable:$true] %s1330_s6 }
 0x3aa   :  { %v1269_v21 = vadd.f32 %v1268_v14, %v1235_v6  ;;  %v1240_v23 = vrot.slane %v1239_v15, 2  ;;  %v1246_v24 = vrot.slane %v1245_v16, 2  ;;  %v1275_v26 = vadd.f32 %v1274_v18, %v1236_v10 }
 0x3ab   :  { %v1252_v25 = vrot.slane %v1251_v17, 2  ;;  %v1258_v28 = vrot.slane %v1257_v19, 2  ;;  %v1264_v29 = vrot.slane %v1263_v20, 2  ;;  %v1281_v31 = vadd.f32 %v1280_v22, %v1237_v11 }
 0x3ac   :  { %v2047_v27 = vpop.eup %2046  ;;  %v1270_v30 = vrot.slane %v1269_v21, 2  ;;  %v1241_v32 = vadd.f32 %v1240_v23, %v1239_v15  ;;  %v1276_v33 = vrot.slane %v1275_v26, 2  ;;  %v1247_v34 = vadd.f32 %v1246_v24, %v1245_v16 }
 0x3ad   :  { %v1253_v35 = vadd.f32 %v1252_v25, %v1251_v17  ;;  %v1259_v36 = vadd.f32 %v1258_v28, %v1257_v19  ;;  %v1282_v37 = vrot.slane %v1281_v31, 2  ;;  %v1265_v38 = vadd.f32 %v1264_v29, %v1263_v20 }
 0x3ae   :  { %v1287_v39 = vmul.f32 8.0, %v2047_v27  ;;  %v1271_v40 = vadd.f32 %v1270_v30, %v1269_v21  ;;  %v1277_v41 = vadd.f32 %v1276_v33, %v1275_v26  ;;  %v1242_v43 = vrot.slane %v1241_v32, 1 }
 0x3af   :  { %v1283_v42 = vadd.f32 %v1282_v37, %v1281_v31  ;;  %v1248_v44 = vrot.slane %v1247_v34, 1  ;;  %v1254_v45 = vrot.slane %v1253_v35, 1  ;;  %v1260_v46 = vrot.slane %v1259_v36, 1 }
 0x3b0   :  { %v1266_v47 = vrot.slane %v1265_v38, 1  ;;  %v1288_v48 = vsub.f32 1.0, %v1287_v39  ;;  %v1272_v49 = vrot.slane %v1271_v40, 1  ;;  %v1278_v50 = vrot.slane %v1277_v41, 1 }
 0x3b1   :  { %v1284_v51 = vrot.slane %v1283_v42, 1  ;;  %vm1291_vm0 = vweird.f32 %v2047_v27  ;;  %v1243_v53 = vadd.f32 %v1242_v43, %v1241_v32  ;;  %v1249_v54 = vadd.f32 %v1248_v44, %v1247_v34 }
 0x3b2   :  { %v1289_v52 = vmul.f32 %v2047_v27, %v1288_v48  ;;  %v1255_v55 = vadd.f32 %v1254_v45, %v1253_v35  ;;  %v1261_v56 = vadd.f32 %v1260_v46, %v1259_v36  ;;  %v1267_v57 = vadd.f32 %v1266_v47, %v1265_v38 }
 0x3b3   :  { %v1273_v59 = vadd.f32 %v1272_v49, %v1271_v40  ;;  %v1279_v60 = vadd.f32 %v1278_v50, %v1277_v41  ;;  %v1285_v61 = vadd.f32 %v1284_v51, %v1283_v42  ;;  %vm1313_vm3 = vcmask 1043459  }
 0x3b4   :  { %v1290_v58 = vadd.f32 %v2047_v27, %v1289_v52  ;;  %vm1315_vm4 = vcmask 1044484   ;;  %vm1317_vm5 = vcmask 1045509   ;;  %vm1319_vm6 = vcmask 1046534  }
 0x3b5   :  { %vm1321_vm7 = vcmask 1047559  }
 0x3b6   :  { %v1292_v62 = vsel %vm1291_vm0, %v2047_v27, %v1290_v58 }
 0x3b7   :  { %v1293_v63 = vmul.f32 %v1292_v62, %v1243_v53  ;;  %v1294_v0 = vmul.f32 %v1292_v62, %v1249_v54  ;;  %v1295_v1 = vmul.f32 %v1292_v62, %v1255_v55  ;;  %v1296_v2 = vmul.f32 %v1292_v62, %v1261_v56 }
 0x3b8   :  { %v1297_v3 = vmul.f32 %v1292_v62, %v1267_v57  ;;  %v1298_v4 = vmul.f32 %v1292_v62, %v1273_v59  ;;  %v1299_v6 = vmul.f32 %v1292_v62, %v1279_v60  ;;  %v1300_v8 = vmul.f32 %v1292_v62, %v1285_v61 }
 0x3b9   :  { %v1310_v5 = vsel %vm1309_vm1, %v1294_v0, %v1293_v63 }
 0x3ba   :  { %v1312_v7 = vsel %vm1311_vm2, %v1295_v1, %v1310_v5 }
 0x3bb   :  { %v1314_v9 = vsel %vm1313_vm3, %v1296_v2, %v1312_v7 }
 0x3bc   :  { %v1316_v10 = vsel %vm1315_vm4, %v1297_v3, %v1314_v9 }
 0x3bd   :  { %v1318_v11 = vsel %vm1317_vm5, %v1298_v4, %v1316_v10 }
 0x3be   :  { %v1320_v12 = vsel %vm1319_vm6, %v1299_v6, %v1318_v11 }
 0x3bf   :  { %v1322_v13 = vsel %vm1321_vm7, %v1300_v8, %v1320_v12 }
 0x3c0   :  { %1324 = vst [vmem:[#allocation6] sm:$0xff] %v1322_v13 }
 0x3c1   :  { %1335 = dma.vmem_to_hbm [thread:$0]  %s1331_s6, 128, %s1333_s19, [#allocation7]  }
 0x3c2   :  { %3750 = dma.done.wait [#allocation7], 128  }
 0x3c3   :  { %3751 = vsyncadd [#allocation7], 4294967168 }
 0x3c4   :  { %1340 = vsyncpa [#allocation7], 1 }
 0x3c5   :  { %1341 = vsyncmov [#allocation3] }
 0x3c8   :  { %s1342_s0 = vpop.sfrf %1341 }
 0x3c9   :  { %p1915_p12 = scmp.ne.s32.totalorder %s1342_s0, 0 }
 0x3cb   :  { %1346 = shalt.err (%p1915_p12)  }
 0x3cc   :  { %1348 = vsyncmov [#allocation3 + $0x1] }
 0x3cf   :  { %s1349_s18 = vpop.sfrf %1348 }
 0x3d0   :  { %p1916_p13 = scmp.ne.s32.totalorder %s1349_s18, 0 }
 0x3d2   :  { %1353 = shalt.err (%p1916_p13)  }
 0x3d3   :  { %1355 = vsyncmov [#allocation3 + $0x2] }
 0x3d6   :  { %s1356_s2 = vpop.sfrf %1355 }
 0x3d7   :  { %p1917_p0 = scmp.ne.s32.totalorder %s1356_s2, 0 }
 0x3d9   :  { %1360 = shalt.err (%p1917_p0)  }
 0x3da   :  { %1362 = vsyncmov [#allocation3 + $0x3] }
 0x3dd   :  { %s1363_s21 = vpop.sfrf %1362 }
 0x3de   :  { %p1918_p1 = scmp.ne.s32.totalorder %s1363_s21, 0 }
 0x3e0   :  { %1367 = shalt.err (%p1918_p1)  }
 0x3e1   :  { %1369 = vsyncmov [#allocation3 + $0x4] }
 0x3e4   :  { %s1370_s27 = vpop.sfrf %1369 }
 0x3e5   :  { %p1919_p2 = scmp.ne.s32.totalorder %s1370_s27, 0 }
 0x3e7   :  { %1374 = shalt.err (%p1919_p2)  }
 0x3e8   :  { %1376 = vsyncmov [#allocation3 + $0x5] }
 0x3eb   :  { %s1377_s28 = vpop.sfrf %1376 }
 0x3ec   :  { %p1920_p3 = scmp.ne.s32.totalorder %s1377_s28, 0 }
 0x3ee   :  { %1381 = shalt.err (%p1920_p3)  }
 0x3ef   :  { %1383 = vsyncmov [#allocation3 + $0x6] }
 0x3f2   :  { %s1384_s25 = vpop.sfrf %1383 }
 0x3f3   :  { %p1921_p4 = scmp.ne.s32.totalorder %s1384_s25, 0 }
 0x3f5   :  { %1388 = shalt.err (%p1921_p4)  }
 0x3f6   :  { %1390 = vsyncmov [#allocation3 + $0x7] }
 0x3f9   :  { %s1391_s26 = vpop.sfrf %1390 }
 0x3fa   :  { %p1922_p5 = scmp.ne.s32.totalorder %s1391_s26, 0 }
 0x3fc   :  { %1395 = shalt.err (%p1922_p5)  }
 0x3fd   :  { %1397 = vsyncmov [#allocation3 + $0x8] }
 0x400   :  { %s1398_s30 = vpop.sfrf %1397 }
 0x401   :  { %p1923_p6 = scmp.ne.s32.totalorder %s1398_s30, 0 }
 0x403   :  { %1402 = shalt.err (%p1923_p6)  }
 0x404   :  { %1404 = vsyncmov [#allocation3 + $0x9] }
 0x407   :  { %s1405_s3 = vpop.sfrf %1404 }
 0x408   :  { %p1924_p7 = scmp.ne.s32.totalorder %s1405_s3, 0 }
 0x40a   :  { %1409 = shalt.err (%p1924_p7)  }
 0x40b   :  { %1411 = vsyncmov [#allocation3 + $0xa] }
 0x40e   :  { %s1412_s4 = vpop.sfrf %1411 }
 0x40f   :  { %p1925_p8 = scmp.ne.s32.totalorder %s1412_s4, 0 }
 0x411   :  { %1416 = shalt.err (%p1925_p8)  }
 0x412   :  { %1418 = vsyncmov [#allocation3 + $0xb] }
 0x415   :  { %s1419_s20 = vpop.sfrf %1418 }
 0x416   :  { %p1926_p9 = scmp.ne.s32.totalorder %s1419_s20, 0 }
 0x418   :  { %1423 = shalt.err (%p1926_p9)  }
 0x419   :  { %1425 = vsyncmov [#allocation3 + $0xc] }
 0x41c   :  { %s1426_s29 = vpop.sfrf %1425 }
 0x41d   :  { %p1927_p10 = scmp.ne.s32.totalorder %s1426_s29, 0 }
 0x41f   :  { %1430 = shalt.err (%p1927_p10)  }
 0x420   :  { %1432 = vsyncmov [#allocation3 + $0xd] }
 0x423   :  { %s1433_s7 = vpop.sfrf %1432 }
 0x424   :  { %p1928_p11 = scmp.ne.s32.totalorder %s1433_s7, 0 }
 0x426   :  { %1437 = shalt.err (%p1928_p11)  }
 0x427   :  { %1439 = vsyncmov [#allocation3 + $0xe] }
 0x42a   :  { %s1440_s9 = vpop.sfrf %1439 }
 0x42b   :  { %p1929_p12 = scmp.ne.s32.totalorder %s1440_s9, 0 }
 0x42d   :  { %1444 = shalt.err (%p1929_p12)  }
 0x42e   :  { %1446 = vsyncmov [#allocation3 + $0xf] }
 0x431   :  { %s1447_s10 = vpop.sfrf %1446 }
 0x432   :  { %p1930_p13 = scmp.ne.s32.totalorder %s1447_s10, 0 }
 0x434   :  { %1451 = shalt.err (%p1930_p13)  }
 0x435   :  { %1453 = vsyncmov [#allocation3 + $0x10] }
 0x438   :  { %s1454_s11 = vpop.sfrf %1453 }
 0x439   :  { %p1931_p0 = scmp.ne.s32.totalorder %s1454_s11, 0 }
 0x43b   :  { %1458 = shalt.err (%p1931_p0)  }
 0x43c   :  { %1460 = vsyncmov [#allocation3 + $0x11] }
 0x43f   :  { %s1461_s5 = vpop.sfrf %1460 }
 0x440   :  { %p1932_p1 = scmp.ne.s32.totalorder %s1461_s5, 0 }
 0x442   :  { %1465 = shalt.err (%p1932_p1)  }
 0x443   :  { %1467 = vsyncmov [#allocation3 + $0x12] }
 0x446   :  { %s1468_s8 = vpop.sfrf %1467 }
 0x447   :  { %p1933_p2 = scmp.ne.s32.totalorder %s1468_s8, 0 }
 0x449   :  { %1472 = shalt.err (%p1933_p2)  }
 0x44a   :  { %1474 = vsyncmov [#allocation3 + $0x13] }
 0x44d   :  { %s1475_s14 = vpop.sfrf %1474 }
 0x44e   :  { %p1934_p3 = scmp.ne.s32.totalorder %s1475_s14, 0 }
 0x450   :  { %1479 = shalt.err (%p1934_p3)  }
 0x451   :  { %1481 = vsyncmov [#allocation3 + $0x14] }
 0x454   :  { %s1482_s15 = vpop.sfrf %1481 }
 0x455   :  { %p1935_p4 = scmp.ne.s32.totalorder %s1482_s15, 0 }
 0x457   :  { %1486 = shalt.err (%p1935_p4)  }
 0x458   :  { %1488 = vsyncmov [#allocation3 + $0x15] }
 0x45b   :  { %s1489_s17 = vpop.sfrf %1488 }
 0x45c   :  { %p1936_p5 = scmp.ne.s32.totalorder %s1489_s17, 0 }
 0x45e   :  { %1493 = shalt.err (%p1936_p5)  }
 0x45f   :  { %1495 = vsyncmov [#allocation3 + $0x16] }
 0x462   :  { %s1496_s12 = vpop.sfrf %1495 }
 0x463   :  { %p1937_p6 = scmp.ne.s32.totalorder %s1496_s12, 0 }
 0x465   :  { %1500 = shalt.err (%p1937_p6)  }
 0x466   :  { %1502 = vsyncmov [#allocation3 + $0x17] }
 0x469   :  { %s1503_s13 = vpop.sfrf %1502 }
 0x46a   :  { %p1938_p7 = scmp.ne.s32.totalorder %s1503_s13, 0 }
 0x46c   :  { %1507 = shalt.err (%p1938_p7)  }
 0x46d   :  { %1509 = vsyncmov [#allocation3 + $0x18] }
 0x470   :  { %s1510_s22 = vpop.sfrf %1509 }
 0x471   :  { %p1939_p8 = scmp.ne.s32.totalorder %s1510_s22, 0 }
 0x473   :  { %1514 = shalt.err (%p1939_p8)  }
 0x474   :  { %1516 = vsyncmov [#allocation3 + $0x19] }
 0x477   :  { %s1517_s16 = vpop.sfrf %1516 }
 0x478   :  { %p1940_p9 = scmp.ne.s32.totalorder %s1517_s16, 0 }
 0x47a   :  { %1521 = shalt.err (%p1940_p9)  }
 0x47b   :  { %1523 = vsyncmov [#allocation3 + $0x1a] }
 0x47e   :  { %s1524_s1 = vpop.sfrf %1523 }
 0x47f   :  { %p1941_p10 = scmp.ne.s32.totalorder %s1524_s1, 0 }
 0x481   :  { %1528 = shalt.err (%p1941_p10)  }
 0x482   :  { %1530 = vsyncmov [#allocation3 + $0x1b] }
 0x485   :  { %s1531_s6 = vpop.sfrf %1530 }
 0x486   :  { %p1942_p11 = scmp.ne.s32.totalorder %s1531_s6, 0 }
 0x488   :  { %1535 = shalt.err (%p1942_p11)  }
 0x489   :  { %1537 = vsyncmov [#allocation3 + $0x1c] }
 0x48c   :  { %s1538_s23 = vpop.sfrf %1537 }
 0x48d   :  { %p1943_p12 = scmp.ne.s32.totalorder %s1538_s23, 0 }
 0x48f   :  { %1542 = shalt.err (%p1943_p12)  }
 0x490   :  { %1544 = vsyncmov [#allocation3 + $0x1d] }
 0x493   :  { %s1545_s24 = vpop.sfrf %1544 }
 0x494   :  { %p1944_p13 = scmp.ne.s32.totalorder %s1545_s24, 0 }
 0x496   :  { %1549 = shalt.err (%p1944_p13)  }
 0x497   :  { %1551 = vsyncmov [#allocation3 + $0x1e] }
 0x49a   :  { %s1552_s19 = vpop.sfrf %1551 }
 0x49b   :  { %p1945_p0 = scmp.ne.s32.totalorder %s1552_s19, 0 }
 0x49d   :  { %1556 = shalt.err (%p1945_p0)  }
 0x49e   :  { %1558 = vsyncmov [#allocation3 + $0x1f] }
 0x4a1   :  { %s1559_s0 = vpop.sfrf %1558 }
 0x4a2   :  { %p1946_p1 = scmp.ne.s32.totalorder %s1559_s0, 0 }
 0x4a4   :  { %1563 = shalt.err (%p1946_p1)  }
 0x4a5   :  { %1565 = vsyncmov [#allocation3 + $0x20] }
 0x4a8   :  { %s1566_s18 = vpop.sfrf %1565 }
 0x4a9   :  { %p1947_p2 = scmp.ne.s32.totalorder %s1566_s18, 0 }
 0x4ab   :  { %1570 = shalt.err (%p1947_p2)  }
 0x4ac   :  { %1572 = vsyncmov [#allocation3 + $0x21] }
 0x4af   :  { %s1573_s2 = vpop.sfrf %1572 }
 0x4b0   :  { %p1948_p3 = scmp.ne.s32.totalorder %s1573_s2, 0 }
 0x4b2   :  { %1577 = shalt.err (%p1948_p3)  }
 0x4b3   :  { %1579 = vsyncmov [#allocation3 + $0x22] }
 0x4b6   :  { %s1580_s21 = vpop.sfrf %1579 }
 0x4b7   :  { %p1949_p4 = scmp.ne.s32.totalorder %s1580_s21, 0 }
 0x4b9   :  { %1584 = shalt.err (%p1949_p4)  }
 0x4ba   :  { %1586 = vsyncmov [#allocation3 + $0x23] }
 0x4bd   :  { %s1587_s27 = vpop.sfrf %1586 }
 0x4be   :  { %p1950_p5 = scmp.ne.s32.totalorder %s1587_s27, 0 }
 0x4c0   :  { %1591 = shalt.err (%p1950_p5)  }
 0x4c1   :  { %1593 = vsyncmov [#allocation3 + $0x24] }
 0x4c4   :  { %s1594_s28 = vpop.sfrf %1593 }
 0x4c5   :  { %p1951_p6 = scmp.ne.s32.totalorder %s1594_s28, 0 }
 0x4c7   :  { %1598 = shalt.err (%p1951_p6)  }
 0x4c8   :  { %1600 = vsyncmov [#allocation3 + $0x25] }
 0x4cb   :  { %s1601_s25 = vpop.sfrf %1600 }
 0x4cc   :  { %p1952_p7 = scmp.ne.s32.totalorder %s1601_s25, 0 }
 0x4ce   :  { %1605 = shalt.err (%p1952_p7)  }
 0x4cf   :  { %1607 = vsyncmov [#allocation3 + $0x26] }
 0x4d2   :  { %s1608_s26 = vpop.sfrf %1607 }
 0x4d3   :  { %p1953_p8 = scmp.ne.s32.totalorder %s1608_s26, 0 }
 0x4d5   :  { %1612 = shalt.err (%p1953_p8)  }
 0x4d6   :  { %1614 = vsyncmov [#allocation3 + $0x27] }
 0x4d9   :  { %s1615_s30 = vpop.sfrf %1614 }
 0x4da   :  { %p1954_p9 = scmp.ne.s32.totalorder %s1615_s30, 0 }
 0x4dc   :  { %1619 = shalt.err (%p1954_p9)  }
 0x4dd   :  { %1621 = vsyncmov [#allocation3 + $0x28] }
 0x4e0   :  { %s1622_s3 = vpop.sfrf %1621 }
 0x4e1   :  { %p1955_p10 = scmp.ne.s32.totalorder %s1622_s3, 0 }
 0x4e3   :  { %1626 = shalt.err (%p1955_p10)  }
 0x4e4   :  { %1628 = vsyncmov [#allocation3 + $0x29] }
 0x4e7   :  { %s1629_s4 = vpop.sfrf %1628 }
 0x4e8   :  { %p1956_p11 = scmp.ne.s32.totalorder %s1629_s4, 0 }
 0x4ea   :  { %1633 = shalt.err (%p1956_p11)  }
 0x4eb   :  { %1635 = vsyncmov [#allocation3 + $0x2a] }
 0x4ee   :  { %s1636_s20 = vpop.sfrf %1635 }
 0x4ef   :  { %p1957_p12 = scmp.ne.s32.totalorder %s1636_s20, 0 }
 0x4f1   :  { %1640 = shalt.err (%p1957_p12)  }
 0x4f2   :  { %1642 = vsyncmov [#allocation3 + $0x2b] }
 0x4f5   :  { %s1643_s29 = vpop.sfrf %1642 }
 0x4f6   :  { %p1958_p13 = scmp.ne.s32.totalorder %s1643_s29, 0 }
 0x4f8   :  { %1647 = shalt.err (%p1958_p13)  }
 0x4f9   :  { %1649 = vsyncmov [#allocation3 + $0x2c] }
 0x4fc   :  { %s1650_s7 = vpop.sfrf %1649 }
 0x4fd   :  { %p1959_p0 = scmp.ne.s32.totalorder %s1650_s7, 0 }
 0x4ff   :  { %1654 = shalt.err (%p1959_p0)  }
 0x500   :  { %1656 = vsyncmov [#allocation3 + $0x2d] }
 0x503   :  { %s1657_s9 = vpop.sfrf %1656 }
 0x504   :  { %p1960_p1 = scmp.ne.s32.totalorder %s1657_s9, 0 }
 0x506   :  { %1661 = shalt.err (%p1960_p1)  }
 0x507   :  { %1663 = vsyncmov [#allocation3 + $0x2e] }
 0x50a   :  { %s1664_s10 = vpop.sfrf %1663 }
 0x50b   :  { %p1961_p2 = scmp.ne.s32.totalorder %s1664_s10, 0 }
 0x50d   :  { %1668 = shalt.err (%p1961_p2)  }
 0x50e   :  { %1670 = vsyncmov [#allocation3 + $0x2f] }
 0x511   :  { %s1671_s11 = vpop.sfrf %1670 }
 0x512   :  { %p1962_p3 = scmp.ne.s32.totalorder %s1671_s11, 0 }
 0x514   :  { %1675 = shalt.err (%p1962_p3)  }
 0x515   :  { %1677 = vsyncmov [#allocation3 + $0x30] }
 0x518   :  { %s1678_s5 = vpop.sfrf %1677 }
 0x519   :  { %p1963_p4 = scmp.ne.s32.totalorder %s1678_s5, 0 }
 0x51b   :  { %1682 = shalt.err (%p1963_p4)  }
 0x51c   :  { %1684 = vsyncmov [#allocation3 + $0x31] }
 0x51f   :  { %s1685_s8 = vpop.sfrf %1684 }
 0x520   :  { %p1964_p5 = scmp.ne.s32.totalorder %s1685_s8, 0 }
 0x522   :  { %1689 = shalt.err (%p1964_p5)  }
 0x523   :  { %1691 = vsyncmov [#allocation3 + $0x32] }
 0x526   :  { %s1692_s14 = vpop.sfrf %1691 }
 0x527   :  { %p1965_p6 = scmp.ne.s32.totalorder %s1692_s14, 0 }
 0x529   :  { %1696 = shalt.err (%p1965_p6)  }
 0x52a   :  { %1698 = vsyncmov [#allocation3 + $0x33] }
 0x52d   :  { %s1699_s15 = vpop.sfrf %1698 }
 0x52e   :  { %p1966_p7 = scmp.ne.s32.totalorder %s1699_s15, 0 }
 0x530   :  { %1703 = shalt.err (%p1966_p7)  }
 0x531   :  { %1705 = vsyncmov [#allocation3 + $0x34] }
 0x534   :  { %s1706_s17 = vpop.sfrf %1705 }
 0x535   :  { %p1967_p8 = scmp.ne.s32.totalorder %s1706_s17, 0 }
 0x537   :  { %1710 = shalt.err (%p1967_p8)  }
 0x538   :  { %1712 = vsyncmov [#allocation3 + $0x35] }
 0x53b   :  { %s1713_s12 = vpop.sfrf %1712 }
 0x53c   :  { %p1968_p9 = scmp.ne.s32.totalorder %s1713_s12, 0 }
 0x53e   :  { %1717 = shalt.err (%p1968_p9)  }
 0x53f   :  { %1719 = vsyncmov [#allocation3 + $0x36] }
 0x542   :  { %s1720_s13 = vpop.sfrf %1719 }
 0x543   :  { %p1969_p10 = scmp.ne.s32.totalorder %s1720_s13, 0 }
 0x545   :  { %1724 = shalt.err (%p1969_p10)  }
 0x546   :  { %1726 = vsyncmov [#allocation3 + $0x37] }
 0x549   :  { %s1727_s22 = vpop.sfrf %1726 }
 0x54a   :  { %p1970_p11 = scmp.ne.s32.totalorder %s1727_s22, 0 }
 0x54c   :  { %1731 = shalt.err (%p1970_p11)  }
 0x54d   :  { %1733 = vsyncmov [#allocation3 + $0x38] }
 0x550   :  { %s1734_s16 = vpop.sfrf %1733 }
 0x551   :  { %p1971_p12 = scmp.ne.s32.totalorder %s1734_s16, 0 }
 0x553   :  { %1738 = shalt.err (%p1971_p12)  }
 0x554   :  { %1740 = vsyncmov [#allocation3 + $0x39] }
 0x557   :  { %s1741_s1 = vpop.sfrf %1740 }
 0x558   :  { %p1972_p13 = scmp.ne.s32.totalorder %s1741_s1, 0 }
 0x55a   :  { %1745 = shalt.err (%p1972_p13)  }
 0x55b   :  { %1747 = vsyncmov [#allocation3 + $0x3a] }
 0x55e   :  { %s1748_s6 = vpop.sfrf %1747 }
 0x55f   :  { %p1973_p0 = scmp.ne.s32.totalorder %s1748_s6, 0 }
 0x561   :  { %1752 = shalt.err (%p1973_p0)  }
 0x562   :  { %1754 = vsyncmov [#allocation3 + $0x3b] }
 0x565   :  { %s1755_s23 = vpop.sfrf %1754 }
 0x566   :  { %p1974_p1 = scmp.ne.s32.totalorder %s1755_s23, 0 }
 0x568   :  { %1759 = shalt.err (%p1974_p1)  }
 0x569   :  { %1761 = vsyncmov [#allocation3 + $0x3c] }
 0x56c   :  { %s1762_s24 = vpop.sfrf %1761 }
 0x56d   :  { %p1975_p2 = scmp.ne.s32.totalorder %s1762_s24, 0 }
 0x56f   :  { %1766 = shalt.err (%p1975_p2)  }
 0x570   :  { %1768 = vsyncmov [#allocation3 + $0x3d] }
 0x573   :  { %s1769_s19 = vpop.sfrf %1768 }
 0x574   :  { %p1976_p3 = scmp.ne.s32.totalorder %s1769_s19, 0 }
 0x576   :  { %1773 = shalt.err (%p1976_p3)  }
 0x577   :  { %1775 = vsyncmov [#allocation3 + $0x3e] }
 0x57a   :  { %s1776_s0 = vpop.sfrf %1775 }
 0x57b   :  { %p1977_p4 = scmp.ne.s32.totalorder %s1776_s0, 0 }
 0x57d   :  { %1780 = shalt.err (%p1977_p4)  }
 0x57e   :  { %1782 = vsyncmov [#allocation3 + $0x3f] }
 0x581   :  { %s1783_s18 = vpop.sfrf %1782 }
 0x582   :  { %p1978_p5 = scmp.ne.s32.totalorder %s1783_s18, 0 }
 0x584   :  { %1787 = shalt.err (%p1978_p5)  }

</bundles_post_ra>
